<compile_context>
chip_gen: v7x
topology: tpu7x:2x2x1
jax: 0.10.0
libtpu: 0.0.40
codegen_flags: <defaults>
</compile_context>

<pallas_src>
import functools

import jax
import jax.numpy as jnp
from jax.experimental import pallas as pl
from jax.experimental.pallas import tpu as pltpu

H = 768        # BERT hidden size implied by the torch module (768 * 3 context features)
LANE = 128


def _round_up(n, m):
    return ((n + m - 1) // m) * m


# ----------------------------------------------------------------------------
# Kernel 1 (hot path, fully fused):
#   gather-only DMA of event rows + masked mean + ce_rep slab + first TopMLP layer.
# ----------------------------------------------------------------------------
def fused_ce_mlp_kernel(e1_idx, e2_idx,                       # scalar prefetch (SMEM, int32)
                        hidden_hbm, cls_ref, w_ref, b_ref,    # inputs (ANY / VMEM)
                        e1m_ref, e2m_ref,                     # inputs (SMEM, f32 masks)
                        out_ref,                              # output (VMEM, lane-dense)
                        rows, ce, sem,                        # scratch
                        *, s_len, n_event, block_b, hdim, residual):
    g = pl.program_id(0)
    b0 = g * block_b
    E = n_event

    # 1) issue one row-sized DMA per event token: only block_b*2*E rows leave HBM
    #    (instead of the full (B, S, H) hidden tensor).
    for i in range(block_b):
        for e in range(E):
            s1 = i * 2 * E + e
            s2 = s1 + E
            r1 = (b0 + i) * s_len + e1_idx[b0 + i, e]
            r2 = (b0 + i) * s_len + e2_idx[b0 + i, e]
            pltpu.make_async_copy(hidden_hbm.at[pl.ds(r1, 1)],
                                  rows.at[pl.ds(s1, 1)], sem.at[s1]).start()
            pltpu.make_async_copy(hidden_hbm.at[pl.ds(r2, 1)],
                                  rows.at[pl.ds(s2, 1)], sem.at[s2]).start()

    # 2) read mask scalars before any DMA wait (keeps SMEM sst->sld forwarding intact).
    #    torch.mean divides by E (not by the mask sum), so fold 1/E into the weights.
    inv_e = 1.0 / float(E)
    w1 = [[e1m_ref[b0 + i, e] * inv_e for e in range(E)] for i in range(block_b)]
    w2 = [[e2m_ref[b0 + i, e] * inv_e for e in range(E)] for i in range(block_b)]

    # 3) stage CLS into the ce_rep slab while the gathers are in flight (no concatenate:
    #    plain lane-aligned slice stores at offsets 0 / H / 2H, all multiples of 128).
    ce[:, pl.ds(0, hdim)] = cls_ref[...]

    # 4) wait for the gathers, then masked mean over the E event tokens (f32 VPU work).
    for s in range(block_b * 2 * E):
        pltpu.make_async_copy(hidden_hbm.at[pl.ds(0, 1)],
                              rows.at[pl.ds(s, 1)], sem.at[s]).wait()

    for i in range(block_b):
        base = i * 2 * E
        acc1 = rows[pl.ds(base, 1), :] * w1[i][0]
        acc2 = rows[pl.ds(base + E, 1), :] * w2[i][0]
        for e in range(1, E):
            acc1 = acc1 + rows[pl.ds(base + e, 1), :] * w1[i][e]
            acc2 = acc2 + rows[pl.ds(base + E + e, 1), :] * w2[i][e]
        ce[pl.ds(i, 1), pl.ds(hdim, hdim)] = acc1
        ce[pl.ds(i, 1), pl.ds(2 * hdim, hdim)] = acc2

    # 5) fused first TopMLP layer: bf16 MXU operands, f32 accumulation, lane-dense store.
    x = ce[...]                                                          # (block_b, 3H) f32
    y = jnp.dot(x.astype(jnp.bfloat16), w_ref[...],
                preferred_element_type=jnp.float32) + b_ref[...]
    if residual:                                                         # square layer -> skip
        y = y + x
    out_ref[...] = y


def fused_context_mlp(hidden_enc, cls, e1, e1_mask, e2, e2_mask, w, b):
    B, S, Hd = hidden_enc.shape
    E = e1.shape[1]
    d_in, d_out = w.shape
    assert d_in == 3 * Hd
    d_out_pad = _round_up(d_out, LANE)
    residual = (d_in == d_out)

    # zero-padded (lane-dense) weights/bias; bf16 weights halve the weight DMA bytes.
    w_pad = jnp.zeros((d_in, d_out_pad), jnp.bfloat16).at[:, :d_out].set(w.astype(jnp.bfloat16))
    b_pad = jnp.zeros((1, d_out_pad), jnp.float32).at[:, :d_out].set(b.astype(jnp.float32))
    hidden_flat = hidden_enc.reshape(B * S, Hd).astype(jnp.float32)      # stays in HBM

    block_b = 8 if B % 8 == 0 else B
    grid = (B // block_b,)

    kernel = functools.partial(fused_ce_mlp_kernel, s_len=S, n_event=E,
                               block_b=block_b, hdim=Hd, residual=residual)

    return pl.pallas_call(
        kernel,
        out_shape=jax.ShapeDtypeStruct((B, d_out_pad), jnp.float32),
        grid_spec=pltpu.PrefetchScalarGridSpec(
            num_scalar_prefetch=2,                                        # e1/e2 indices -> SMEM
            grid=grid,
            in_specs=[
                pl.BlockSpec(memory_space=pl.ANY),                        # hidden: raw HBM ref
                pl.BlockSpec((block_b, Hd), lambda g, *_: (g, 0)),        # cls (per-batch block)
                pl.BlockSpec((d_in, d_out_pad), lambda g, *_: (0, 0)),    # W resident in VMEM
                pl.BlockSpec((1, d_out_pad), lambda g, *_: (0, 0)),       # b resident in VMEM
                pl.BlockSpec(memory_space=pltpu.MemorySpace.SMEM),        # e1_mask (scalars)
                pl.BlockSpec(memory_space=pltpu.MemorySpace.SMEM),        # e2_mask (scalars)
            ],
            out_specs=pl.BlockSpec((block_b, d_out_pad), lambda g, *_: (g, 0)),
            scratch_shapes=[
                pltpu.VMEM((block_b * 2 * E, Hd), jnp.float32),           # gathered event rows
                pltpu.VMEM((block_b, d_in), jnp.float32),                 # ce_rep slab
                pltpu.SemaphoreType.DMA((block_b * 2 * E,)),
            ]),
        compiler_params=pltpu.CompilerParams(
            dimension_semantics=("parallel",),
            vmem_limit_bytes=32 * 1024 * 1024),
    )(e1.astype(jnp.int32), e2.astype(jnp.int32),
      hidden_flat, cls.astype(jnp.float32), w_pad, b_pad,
      e1_mask.astype(jnp.float32), e2_mask.astype(jnp.float32))


# ----------------------------------------------------------------------------
# Kernel 2: additional TopMLP layers (only used when hn_list is non-empty)
#   y = x @ W + b (+ x when square); bf16 MXU operands, lane-dense padded output.
# ----------------------------------------------------------------------------
def linear_kernel(x_ref, w_ref, b_ref, o_ref, *, residual):
    x = x_ref[...]                                                        # (block_b, Din_pad) f32
    y = jnp.dot(x.astype(jnp.bfloat16), w_ref[...],
                preferred_element_type=jnp.float32) + b_ref[...]
    if residual:
        y = y + x
    o_ref[...] = y


def mlp_linear(x_pad, w, b, residual):
    B, d_in_pad = x_pad.shape
    d_out = w.shape[1]
    d_out_pad = _round_up(d_out, LANE)
    w_pad = jnp.zeros((d_in_pad, d_out_pad), jnp.bfloat16).at[:w.shape[0], :d_out].set(
        w.astype(jnp.bfloat16))
    b_pad = jnp.zeros((1, d_out_pad), jnp.float32).at[:, :d_out].set(b.astype(jnp.float32))

    block_b = 8 if B % 8 == 0 else B
    grid = (B // block_b,)
    return pl.pallas_call(
        functools.partial(linear_kernel, residual=residual),
        out_shape=jax.ShapeDtypeStruct((B, d_out_pad), jnp.float32),
        grid_spec=pltpu.PrefetchScalarGridSpec(
            num_scalar_prefetch=0,
            grid=grid,
            in_specs=[pl.BlockSpec((block_b, d_in_pad), lambda g: (g, 0)),
                      pl.BlockSpec((d_in_pad, d_out_pad), lambda g: (0, 0)),
                      pl.BlockSpec((1, d_out_pad), lambda g: (0, 0))],
            out_specs=pl.BlockSpec((block_b, d_out_pad), lambda g: (g, 0))),
        compiler_params=pltpu.CompilerParams(
            dimension_semantics=("parallel",),
            vmem_limit_bytes=32 * 1024 * 1024),
    )(x_pad, w_pad, b_pad)


# ----------------------------------------------------------------------------
# Glue: deterministic synthetic "BERT" + parameter init + MixedModel forward
# ----------------------------------------------------------------------------
# TODO(synk): BertModel.from_pretrained loads an external checkpoint; no in-script Pallas
# equivalent, so it is replaced by a deterministic synthetic token encoder below.
def synthetic_bert(params, input_ids, attention_mask):
    emb = params['emb'][input_ids]                                        # (B, S, H)
    hidden = jnp.tanh(emb) * attention_mask[..., None].astype(jnp.float32)
    cls = jnp.tanh(hidden[:, 0, :] @ params['pool_w'] + params['pool_b'])  # BERT pooler
    return hidden, cls


def init_params(key, vocab, hn_list):
    mlp_dims = [3 * H] + list(hn_list) + [2]
    n_layers = len(mlp_dims) - 1
    keys = jax.random.split(key, 3 + n_layers)
    params = {
        'emb': jax.random.normal(keys[0], (vocab, H), jnp.float32) * 0.02,
        'pool_w': jax.random.normal(keys[1], (H, H), jnp.float32) * 0.02,
        'pool_b': jnp.zeros((H,), jnp.float32),
        'mlp': [],
    }
    for li, (din, dout) in enumerate(zip(mlp_dims[:-1], mlp_dims[1:])):
        w = jax.random.normal(keys[3 + li], (din, dout), jnp.float32) * (1.0 / jnp.sqrt(din))
        b = jnp.full((dout,), 0.01, jnp.float32)
        params['mlp'].append((w, b))
    return params


def mixed_model_forward(params, s_ids, s_mask, e1, e1_mask, e2, e2_mask):
    hidden, cls = synthetic_bert(params, s_ids, s_mask)
    mlp = params['mlp']
    w0, b0 = mlp[0]
    # ContextEncoder tail + first TopMLP layer in one fused kernel (no ce_rep round trip).
    x = fused_context_mlp(hidden, cls, e1, e1_mask, e2, e2_mask, w0, b0)  # (B, pad(d_out0))
    d_cur = w0.shape[1]
    for (w, b) in mlp[1:]:
        residual = (w.shape[0] == w.shape[1])                             # TopMLP skip rule
        x = mlp_linear(x, w, b, residual)
        d_cur = w.shape[1]
    return x[:, :d_cur]                                                   # strip lane padding


def reference_forward(params, s_ids, s_mask, e1, e1_mask, e2, e2_mask):
    """Pure-JAX f32 reference of the same semantics (sanity check)."""
    hidden, cls = synthetic_bert(params, s_ids, s_mask)
    g1 = jnp.take_along_axis(hidden, e1[..., None], axis=1) * e1_mask[..., None].astype(jnp.float32)
    g2 = jnp.take_along_axis(hidden, e2[..., None], axis=1) * e2_mask[..., None].astype(jnp.float32)
    x = jnp.concatenate([cls, jnp.mean(g1, axis=1), jnp.mean(g2, axis=1)], axis=-1)
    for (w, b) in params['mlp']:
        y = x @ w + b
        x = y + x if w.shape[0] == w.shape[1] else y
    return x


if __name__ == "__main__":
    key = jax.random.PRNGKey(0)
    B, S, E, V = 2, 16, 4, 64       # batch, sentence len, event tokens, vocab
    k_pa, k_pb, k_ids, k_e1, k_e2, k_m1, k_m2 = jax.random.split(key, 7)

    s_ids = jax.random.randint(k_ids, (B, S), 0, V, dtype=jnp.int32)
    s_mask = jnp.ones((B, S), jnp.int32)
    e1 = jax.random.randint(k_e1, (B, E), 0, S, dtype=jnp.int32)
    e2 = jax.random.randint(k_e2, (B, E), 0, S, dtype=jnp.int32)
    e1_mask = (jax.random.uniform(k_m1, (B, E)) > 0.3).astype(jnp.int32)
    e2_mask = (jax.random.uniform(k_m2, (B, E)) > 0.3).astype(jnp.int32)

    # Config A: default MixedModel (hn_list=[]): single fused kernel per forward.
    # Config B: hn_list=[256, 256]: exercises the extra linear kernel + residual rule.
    for hn_list, k_param in (([], k_pa), ([256, 256], k_pb)):
        params = init_params(k_param, V, hn_list=hn_list)
        out = mixed_model_forward(params, s_ids, s_mask, e1, e1_mask, e2, e2_mask)
        out = jax.block_until_ready(out)
        ref = reference_forward(params, s_ids, s_mask, e1, e1_mask, e2, e2_mask)
        assert out.shape == (B, 2), (hn_list, out.shape)
        assert bool(jnp.all(jnp.isfinite(out)))
        assert bool(jnp.allclose(out, ref, rtol=1e-2, atol=1e-2)), (hn_list, out, ref)

    print("KERNEL_OK")
</pallas_src>

<mosaic_0001>
module attributes {stable_mosaic.version = 11 : i64} {
  func.func @fused_ce_mlp_kernel(%arg0: i32, %arg1: memref<2x4xi32, #tpu.memory_space<smem>>, %arg2: memref<2x4xi32, #tpu.memory_space<smem>>, %arg3: memref<32x768xf32, #tpu.memory_space<any>>, %arg4: memref<2x768xf32, #tpu.memory_space<vmem>>, %arg5: memref<2304x128xbf16, #tpu.memory_space<vmem>>, %arg6: memref<1x128xf32, #tpu.memory_space<vmem>>, %arg7: memref<2x4xf32, #tpu.memory_space<smem>>, %arg8: memref<2x4xf32, #tpu.memory_space<smem>>, %arg9: memref<2x128xf32, #tpu.memory_space<vmem>>, %arg10: memref<16x768xf32, #tpu.memory_space<vmem>>, %arg11: memref<2x2304xf32, #tpu.memory_space<vmem>>, %arg12: memref<16x!tpu.dma_semaphore, #tpu.memory_space<semaphore_mem>>) attributes {dimension_semantics = [#tpu.dimension_semantics<parallel>], iteration_bounds = array<i64: 1>, scalar_prefetch = 2 : i64, scratch_operands = 3 : i64, tpu.core_type = #tpu.core_type<tc>, window_params = [{}, {transform_indices = @transform_1, window_bounds = array<i64: 2, 768>}, {pipeline_mode = #tpu.pipeline_mode<synchronous>, transform_indices = @transform_2, window_bounds = array<i64: 2304, 128>}, {pipeline_mode = #tpu.pipeline_mode<synchronous>, transform_indices = @transform_3, window_bounds = array<i64: 1, 128>}, {transform_indices = @transform_4, window_bounds = array<i64: 2, 4>}, {transform_indices = @transform_5, window_bounds = array<i64: 2, 4>}, {transform_indices = @transform_6, window_bounds = array<i64: 2, 128>}]} {
    %c2_i32 = arith.constant 2 : i32
    %0 = arith.muli %arg0, %c2_i32 : i32
    %c0_i32 = arith.constant 0 : i32
    %1 = arith.addi %0, %c0_i32 : i32
    %c16_i32 = arith.constant 16 : i32
    %2 = arith.muli %1, %c16_i32 : i32
    %c0_i32_0 = arith.constant 0 : i32
    %3 = arith.addi %0, %c0_i32_0 : i32
    %4 = arith.index_cast %3 : i32 to index
    %c0 = arith.constant 0 : index
    %5 = memref.load %arg1[%4, %c0] : memref<2x4xi32, #tpu.memory_space<smem>>
    %6 = arith.addi %2, %5 : i32
    %c0_i32_1 = arith.constant 0 : i32
    %7 = arith.addi %0, %c0_i32_1 : i32
    %c16_i32_2 = arith.constant 16 : i32
    %8 = arith.muli %7, %c16_i32_2 : i32
    %c0_i32_3 = arith.constant 0 : i32
    %9 = arith.addi %0, %c0_i32_3 : i32
    %10 = arith.index_cast %9 : i32 to index
    %c0_4 = arith.constant 0 : index
    %11 = memref.load %arg2[%10, %c0_4] : memref<2x4xi32, #tpu.memory_space<smem>>
    %12 = arith.addi %8, %11 : i32
    %c0_i32_5 = arith.constant 0 : i32
    %c0_i32_6 = arith.constant 0 : i32
    %13 = tpu.memref_slice %arg3[%6, %c0_i32_6] : memref<32x768xf32, #tpu.memory_space<any>> -> memref<1x768xf32, #tpu.memory_space<any>>
    %c0_i32_7 = arith.constant 0 : i32
    %c0_i32_8 = arith.constant 0 : i32
    %14 = tpu.memref_slice %arg10[%c0_i32_7, %c0_i32_8] : memref<16x768xf32, #tpu.memory_space<vmem>> -> memref<1x768xf32, #tpu.memory_space<vmem>>
    %15 = tpu.memref_slice %arg12[%c0_i32_5] : memref<16x!tpu.dma_semaphore, #tpu.memory_space<semaphore_mem>> -> memref<1x!tpu.dma_semaphore, #tpu.memory_space<semaphore_mem>>
    %16 = tpu.memref_squeeze %15 : memref<1x!tpu.dma_semaphore, #tpu.memory_space<semaphore_mem>> -> memref<!tpu.dma_semaphore, #tpu.memory_space<semaphore_mem>>
    tpu.enqueue_dma source(%13 : memref<1x768xf32, #tpu.memory_space<any>>) target(%14 : memref<1x768xf32, #tpu.memory_space<vmem>>) target_semaphore(%16 : memref<!tpu.dma_semaphore, #tpu.memory_space<semaphore_mem>>)
    %c4_i32 = arith.constant 4 : i32
    %c0_i32_9 = arith.constant 0 : i32
    %17 = tpu.memref_slice %arg3[%12, %c0_i32_9] : memref<32x768xf32, #tpu.memory_space<any>> -> memref<1x768xf32, #tpu.memory_space<any>>
    %c4_i32_10 = arith.constant 4 : i32
    %c0_i32_11 = arith.constant 0 : i32
    %18 = tpu.memref_slice %arg10[%c4_i32_10, %c0_i32_11] : memref<16x768xf32, #tpu.memory_space<vmem>> -> memref<1x768xf32, #tpu.memory_space<vmem>>
    %19 = tpu.memref_slice %arg12[%c4_i32] : memref<16x!tpu.dma_semaphore, #tpu.memory_space<semaphore_mem>> -> memref<1x!tpu.dma_semaphore, #tpu.memory_space<semaphore_mem>>
    %20 = tpu.memref_squeeze %19 : memref<1x!tpu.dma_semaphore, #tpu.memory_space<semaphore_mem>> -> memref<!tpu.dma_semaphore, #tpu.memory_space<semaphore_mem>>
    tpu.enqueue_dma source(%17 : memref<1x768xf32, #tpu.memory_space<any>>) target(%18 : memref<1x768xf32, #tpu.memory_space<vmem>>) target_semaphore(%20 : memref<!tpu.dma_semaphore, #tpu.memory_space<semaphore_mem>>)
    %c0_i32_12 = arith.constant 0 : i32
    %21 = arith.addi %0, %c0_i32_12 : i32
    %c16_i32_13 = arith.constant 16 : i32
    %22 = arith.muli %21, %c16_i32_13 : i32
    %c0_i32_14 = arith.constant 0 : i32
    %23 = arith.addi %0, %c0_i32_14 : i32
    %24 = arith.index_cast %23 : i32 to index
    %c1 = arith.constant 1 : index
    %25 = memref.load %arg1[%24, %c1] : memref<2x4xi32, #tpu.memory_space<smem>>
    %26 = arith.addi %22, %25 : i32
    %c0_i32_15 = arith.constant 0 : i32
    %27 = arith.addi %0, %c0_i32_15 : i32
    %c16_i32_16 = arith.constant 16 : i32
    %28 = arith.muli %27, %c16_i32_16 : i32
    %c0_i32_17 = arith.constant 0 : i32
    %29 = arith.addi %0, %c0_i32_17 : i32
    %30 = arith.index_cast %29 : i32 to index
    %c1_18 = arith.constant 1 : index
    %31 = memref.load %arg2[%30, %c1_18] : memref<2x4xi32, #tpu.memory_space<smem>>
    %32 = arith.addi %28, %31 : i32
    %c1_i32 = arith.constant 1 : i32
    %c0_i32_19 = arith.constant 0 : i32
    %33 = tpu.memref_slice %arg3[%26, %c0_i32_19] : memref<32x768xf32, #tpu.memory_space<any>> -> memref<1x768xf32, #tpu.memory_space<any>>
    %c1_i32_20 = arith.constant 1 : i32
    %c0_i32_21 = arith.constant 0 : i32
    %34 = tpu.memref_slice %arg10[%c1_i32_20, %c0_i32_21] : memref<16x768xf32, #tpu.memory_space<vmem>> -> memref<1x768xf32, #tpu.memory_space<vmem>>
    %35 = tpu.memref_slice %arg12[%c1_i32] : memref<16x!tpu.dma_semaphore, #tpu.memory_space<semaphore_mem>> -> memref<1x!tpu.dma_semaphore, #tpu.memory_space<semaphore_mem>>
    %36 = tpu.memref_squeeze %35 : memref<1x!tpu.dma_semaphore, #tpu.memory_space<semaphore_mem>> -> memref<!tpu.dma_semaphore, #tpu.memory_space<semaphore_mem>>
    tpu.enqueue_dma source(%33 : memref<1x768xf32, #tpu.memory_space<any>>) target(%34 : memref<1x768xf32, #tpu.memory_space<vmem>>) target_semaphore(%36 : memref<!tpu.dma_semaphore, #tpu.memory_space<semaphore_mem>>)
    %c5_i32 = arith.constant 5 : i32
    %c0_i32_22 = arith.constant 0 : i32
    %37 = tpu.memref_slice %arg3[%32, %c0_i32_22] : memref<32x768xf32, #tpu.memory_space<any>> -> memref<1x768xf32, #tpu.memory_space<any>>
    %c5_i32_23 = arith.constant 5 : i32
    %c0_i32_24 = arith.constant 0 : i32
    %38 = tpu.memref_slice %arg10[%c5_i32_23, %c0_i32_24] : memref<16x768xf32, #tpu.memory_space<vmem>> -> memref<1x768xf32, #tpu.memory_space<vmem>>
    %39 = tpu.memref_slice %arg12[%c5_i32] : memref<16x!tpu.dma_semaphore, #tpu.memory_space<semaphore_mem>> -> memref<1x!tpu.dma_semaphore, #tpu.memory_space<semaphore_mem>>
    %40 = tpu.memref_squeeze %39 : memref<1x!tpu.dma_semaphore, #tpu.memory_space<semaphore_mem>> -> memref<!tpu.dma_semaphore, #tpu.memory_space<semaphore_mem>>
    tpu.enqueue_dma source(%37 : memref<1x768xf32, #tpu.memory_space<any>>) target(%38 : memref<1x768xf32, #tpu.memory_space<vmem>>) target_semaphore(%40 : memref<!tpu.dma_semaphore, #tpu.memory_space<semaphore_mem>>)
    %c0_i32_25 = arith.constant 0 : i32
    %41 = arith.addi %0, %c0_i32_25 : i32
    %c16_i32_26 = arith.constant 16 : i32
    %42 = arith.muli %41, %c16_i32_26 : i32
    %c0_i32_27 = arith.constant 0 : i32
    %43 = arith.addi %0, %c0_i32_27 : i32
    %44 = arith.index_cast %43 : i32 to index
    %c2 = arith.constant 2 : index
    %45 = memref.load %arg1[%44, %c2] : memref<2x4xi32, #tpu.memory_space<smem>>
    %46 = arith.addi %42, %45 : i32
    %c0_i32_28 = arith.constant 0 : i32
    %47 = arith.addi %0, %c0_i32_28 : i32
    %c16_i32_29 = arith.constant 16 : i32
    %48 = arith.muli %47, %c16_i32_29 : i32
    %c0_i32_30 = arith.constant 0 : i32
    %49 = arith.addi %0, %c0_i32_30 : i32
    %50 = arith.index_cast %49 : i32 to index
    %c2_31 = arith.constant 2 : index
    %51 = memref.load %arg2[%50, %c2_31] : memref<2x4xi32, #tpu.memory_space<smem>>
    %52 = arith.addi %48, %51 : i32
    %c2_i32_32 = arith.constant 2 : i32
    %c0_i32_33 = arith.constant 0 : i32
    %53 = tpu.memref_slice %arg3[%46, %c0_i32_33] : memref<32x768xf32, #tpu.memory_space<any>> -> memref<1x768xf32, #tpu.memory_space<any>>
    %c2_i32_34 = arith.constant 2 : i32
    %c0_i32_35 = arith.constant 0 : i32
    %54 = tpu.memref_slice %arg10[%c2_i32_34, %c0_i32_35] : memref<16x768xf32, #tpu.memory_space<vmem>> -> memref<1x768xf32, #tpu.memory_space<vmem>>
    %55 = tpu.memref_slice %arg12[%c2_i32_32] : memref<16x!tpu.dma_semaphore, #tpu.memory_space<semaphore_mem>> -> memref<1x!tpu.dma_semaphore, #tpu.memory_space<semaphore_mem>>
    %56 = tpu.memref_squeeze %55 : memref<1x!tpu.dma_semaphore, #tpu.memory_space<semaphore_mem>> -> memref<!tpu.dma_semaphore, #tpu.memory_space<semaphore_mem>>
    tpu.enqueue_dma source(%53 : memref<1x768xf32, #tpu.memory_space<any>>) target(%54 : memref<1x768xf32, #tpu.memory_space<vmem>>) target_semaphore(%56 : memref<!tpu.dma_semaphore, #tpu.memory_space<semaphore_mem>>)
    %c6_i32 = arith.constant 6 : i32
    %c0_i32_36 = arith.constant 0 : i32
    %57 = tpu.memref_slice %arg3[%52, %c0_i32_36] : memref<32x768xf32, #tpu.memory_space<any>> -> memref<1x768xf32, #tpu.memory_space<any>>
    %c6_i32_37 = arith.constant 6 : i32
    %c0_i32_38 = arith.constant 0 : i32
    %58 = tpu.memref_slice %arg10[%c6_i32_37, %c0_i32_38] : memref<16x768xf32, #tpu.memory_space<vmem>> -> memref<1x768xf32, #tpu.memory_space<vmem>>
    %59 = tpu.memref_slice %arg12[%c6_i32] : memref<16x!tpu.dma_semaphore, #tpu.memory_space<semaphore_mem>> -> memref<1x!tpu.dma_semaphore, #tpu.memory_space<semaphore_mem>>
    %60 = tpu.memref_squeeze %59 : memref<1x!tpu.dma_semaphore, #tpu.memory_space<semaphore_mem>> -> memref<!tpu.dma_semaphore, #tpu.memory_space<semaphore_mem>>
    tpu.enqueue_dma source(%57 : memref<1x768xf32, #tpu.memory_space<any>>) target(%58 : memref<1x768xf32, #tpu.memory_space<vmem>>) target_semaphore(%60 : memref<!tpu.dma_semaphore, #tpu.memory_space<semaphore_mem>>)
    %c0_i32_39 = arith.constant 0 : i32
    %61 = arith.addi %0, %c0_i32_39 : i32
    %c16_i32_40 = arith.constant 16 : i32
    %62 = arith.muli %61, %c16_i32_40 : i32
    %c0_i32_41 = arith.constant 0 : i32
    %63 = arith.addi %0, %c0_i32_41 : i32
    %64 = arith.index_cast %63 : i32 to index
    %c3 = arith.constant 3 : index
    %65 = memref.load %arg1[%64, %c3] : memref<2x4xi32, #tpu.memory_space<smem>>
    %66 = arith.addi %62, %65 : i32
    %c0_i32_42 = arith.constant 0 : i32
    %67 = arith.addi %0, %c0_i32_42 : i32
    %c16_i32_43 = arith.constant 16 : i32
    %68 = arith.muli %67, %c16_i32_43 : i32
    %c0_i32_44 = arith.constant 0 : i32
    %69 = arith.addi %0, %c0_i32_44 : i32
    %70 = arith.index_cast %69 : i32 to index
    %c3_45 = arith.constant 3 : index
    %71 = memref.load %arg2[%70, %c3_45] : memref<2x4xi32, #tpu.memory_space<smem>>
    %72 = arith.addi %68, %71 : i32
    %c3_i32 = arith.constant 3 : i32
    %c0_i32_46 = arith.constant 0 : i32
    %73 = tpu.memref_slice %arg3[%66, %c0_i32_46] : memref<32x768xf32, #tpu.memory_space<any>> -> memref<1x768xf32, #tpu.memory_space<any>>
    %c3_i32_47 = arith.constant 3 : i32
    %c0_i32_48 = arith.constant 0 : i32
    %74 = tpu.memref_slice %arg10[%c3_i32_47, %c0_i32_48] : memref<16x768xf32, #tpu.memory_space<vmem>> -> memref<1x768xf32, #tpu.memory_space<vmem>>
    %75 = tpu.memref_slice %arg12[%c3_i32] : memref<16x!tpu.dma_semaphore, #tpu.memory_space<semaphore_mem>> -> memref<1x!tpu.dma_semaphore, #tpu.memory_space<semaphore_mem>>
    %76 = tpu.memref_squeeze %75 : memref<1x!tpu.dma_semaphore, #tpu.memory_space<semaphore_mem>> -> memref<!tpu.dma_semaphore, #tpu.memory_space<semaphore_mem>>
    tpu.enqueue_dma source(%73 : memref<1x768xf32, #tpu.memory_space<any>>) target(%74 : memref<1x768xf32, #tpu.memory_space<vmem>>) target_semaphore(%76 : memref<!tpu.dma_semaphore, #tpu.memory_space<semaphore_mem>>)
    %c7_i32 = arith.constant 7 : i32
    %c0_i32_49 = arith.constant 0 : i32
    %77 = tpu.memref_slice %arg3[%72, %c0_i32_49] : memref<32x768xf32, #tpu.memory_space<any>> -> memref<1x768xf32, #tpu.memory_space<any>>
    %c7_i32_50 = arith.constant 7 : i32
    %c0_i32_51 = arith.constant 0 : i32
    %78 = tpu.memref_slice %arg10[%c7_i32_50, %c0_i32_51] : memref<16x768xf32, #tpu.memory_space<vmem>> -> memref<1x768xf32, #tpu.memory_space<vmem>>
    %79 = tpu.memref_slice %arg12[%c7_i32] : memref<16x!tpu.dma_semaphore, #tpu.memory_space<semaphore_mem>> -> memref<1x!tpu.dma_semaphore, #tpu.memory_space<semaphore_mem>>
    %80 = tpu.memref_squeeze %79 : memref<1x!tpu.dma_semaphore, #tpu.memory_space<semaphore_mem>> -> memref<!tpu.dma_semaphore, #tpu.memory_space<semaphore_mem>>
    tpu.enqueue_dma source(%77 : memref<1x768xf32, #tpu.memory_space<any>>) target(%78 : memref<1x768xf32, #tpu.memory_space<vmem>>) target_semaphore(%80 : memref<!tpu.dma_semaphore, #tpu.memory_space<semaphore_mem>>)
    %c1_i32_52 = arith.constant 1 : i32
    %81 = arith.addi %0, %c1_i32_52 : i32
    %c16_i32_53 = arith.constant 16 : i32
    %82 = arith.muli %81, %c16_i32_53 : i32
    %c1_i32_54 = arith.constant 1 : i32
    %83 = arith.addi %0, %c1_i32_54 : i32
    %84 = arith.index_cast %83 : i32 to index
    %c0_55 = arith.constant 0 : index
    %85 = memref.load %arg1[%84, %c0_55] : memref<2x4xi32, #tpu.memory_space<smem>>
    %86 = arith.addi %82, %85 : i32
    %c1_i32_56 = arith.constant 1 : i32
    %87 = arith.addi %0, %c1_i32_56 : i32
    %c16_i32_57 = arith.constant 16 : i32
    %88 = arith.muli %87, %c16_i32_57 : i32
    %c1_i32_58 = arith.constant 1 : i32
    %89 = arith.addi %0, %c1_i32_58 : i32
    %90 = arith.index_cast %89 : i32 to index
    %c0_59 = arith.constant 0 : index
    %91 = memref.load %arg2[%90, %c0_59] : memref<2x4xi32, #tpu.memory_space<smem>>
    %92 = arith.addi %88, %91 : i32
    %c8_i32 = arith.constant 8 : i32
    %c0_i32_60 = arith.constant 0 : i32
    %93 = tpu.memref_slice %arg3[%86, %c0_i32_60] : memref<32x768xf32, #tpu.memory_space<any>> -> memref<1x768xf32, #tpu.memory_space<any>>
    %c8_i32_61 = arith.constant 8 : i32
    %c0_i32_62 = arith.constant 0 : i32
    %94 = tpu.memref_slice %arg10[%c8_i32_61, %c0_i32_62] : memref<16x768xf32, #tpu.memory_space<vmem>> -> memref<1x768xf32, #tpu.memory_space<vmem>>
    %95 = tpu.memref_slice %arg12[%c8_i32] : memref<16x!tpu.dma_semaphore, #tpu.memory_space<semaphore_mem>> -> memref<1x!tpu.dma_semaphore, #tpu.memory_space<semaphore_mem>>
    %96 = tpu.memref_squeeze %95 : memref<1x!tpu.dma_semaphore, #tpu.memory_space<semaphore_mem>> -> memref<!tpu.dma_semaphore, #tpu.memory_space<semaphore_mem>>
    tpu.enqueue_dma source(%93 : memref<1x768xf32, #tpu.memory_space<any>>) target(%94 : memref<1x768xf32, #tpu.memory_space<vmem>>) target_semaphore(%96 : memref<!tpu.dma_semaphore, #tpu.memory_space<semaphore_mem>>)
    %c12_i32 = arith.constant 12 : i32
    %c0_i32_63 = arith.constant 0 : i32
    %97 = tpu.memref_slice %arg3[%92, %c0_i32_63] : memref<32x768xf32, #tpu.memory_space<any>> -> memref<1x768xf32, #tpu.memory_space<any>>
    %c12_i32_64 = arith.constant 12 : i32
    %c0_i32_65 = arith.constant 0 : i32
    %98 = tpu.memref_slice %arg10[%c12_i32_64, %c0_i32_65] : memref<16x768xf32, #tpu.memory_space<vmem>> -> memref<1x768xf32, #tpu.memory_space<vmem>>
    %99 = tpu.memref_slice %arg12[%c12_i32] : memref<16x!tpu.dma_semaphore, #tpu.memory_space<semaphore_mem>> -> memref<1x!tpu.dma_semaphore, #tpu.memory_space<semaphore_mem>>
    %100 = tpu.memref_squeeze %99 : memref<1x!tpu.dma_semaphore, #tpu.memory_space<semaphore_mem>> -> memref<!tpu.dma_semaphore, #tpu.memory_space<semaphore_mem>>
    tpu.enqueue_dma source(%97 : memref<1x768xf32, #tpu.memory_space<any>>) target(%98 : memref<1x768xf32, #tpu.memory_space<vmem>>) target_semaphore(%100 : memref<!tpu.dma_semaphore, #tpu.memory_space<semaphore_mem>>)
    %c1_i32_66 = arith.constant 1 : i32
    %101 = arith.addi %0, %c1_i32_66 : i32
    %c16_i32_67 = arith.constant 16 : i32
    %102 = arith.muli %101, %c16_i32_67 : i32
    %c1_i32_68 = arith.constant 1 : i32
    %103 = arith.addi %0, %c1_i32_68 : i32
    %104 = arith.index_cast %103 : i32 to index
    %c1_69 = arith.constant 1 : index
    %105 = memref.load %arg1[%104, %c1_69] : memref<2x4xi32, #tpu.memory_space<smem>>
    %106 = arith.addi %102, %105 : i32
    %c1_i32_70 = arith.constant 1 : i32
    %107 = arith.addi %0, %c1_i32_70 : i32
    %c16_i32_71 = arith.constant 16 : i32
    %108 = arith.muli %107, %c16_i32_71 : i32
    %c1_i32_72 = arith.constant 1 : i32
    %109 = arith.addi %0, %c1_i32_72 : i32
    %110 = arith.index_cast %109 : i32 to index
    %c1_73 = arith.constant 1 : index
    %111 = memref.load %arg2[%110, %c1_73] : memref<2x4xi32, #tpu.memory_space<smem>>
    %112 = arith.addi %108, %111 : i32
    %c9_i32 = arith.constant 9 : i32
    %c0_i32_74 = arith.constant 0 : i32
    %113 = tpu.memref_slice %arg3[%106, %c0_i32_74] : memref<32x768xf32, #tpu.memory_space<any>> -> memref<1x768xf32, #tpu.memory_space<any>>
    %c9_i32_75 = arith.constant 9 : i32
    %c0_i32_76 = arith.constant 0 : i32
    %114 = tpu.memref_slice %arg10[%c9_i32_75, %c0_i32_76] : memref<16x768xf32, #tpu.memory_space<vmem>> -> memref<1x768xf32, #tpu.memory_space<vmem>>
    %115 = tpu.memref_slice %arg12[%c9_i32] : memref<16x!tpu.dma_semaphore, #tpu.memory_space<semaphore_mem>> -> memref<1x!tpu.dma_semaphore, #tpu.memory_space<semaphore_mem>>
    %116 = tpu.memref_squeeze %115 : memref<1x!tpu.dma_semaphore, #tpu.memory_space<semaphore_mem>> -> memref<!tpu.dma_semaphore, #tpu.memory_space<semaphore_mem>>
    tpu.enqueue_dma source(%113 : memref<1x768xf32, #tpu.memory_space<any>>) target(%114 : memref<1x768xf32, #tpu.memory_space<vmem>>) target_semaphore(%116 : memref<!tpu.dma_semaphore, #tpu.memory_space<semaphore_mem>>)
    %c13_i32 = arith.constant 13 : i32
    %c0_i32_77 = arith.constant 0 : i32
    %117 = tpu.memref_slice %arg3[%112, %c0_i32_77] : memref<32x768xf32, #tpu.memory_space<any>> -> memref<1x768xf32, #tpu.memory_space<any>>
    %c13_i32_78 = arith.constant 13 : i32
    %c0_i32_79 = arith.constant 0 : i32
    %118 = tpu.memref_slice %arg10[%c13_i32_78, %c0_i32_79] : memref<16x768xf32, #tpu.memory_space<vmem>> -> memref<1x768xf32, #tpu.memory_space<vmem>>
    %119 = tpu.memref_slice %arg12[%c13_i32] : memref<16x!tpu.dma_semaphore, #tpu.memory_space<semaphore_mem>> -> memref<1x!tpu.dma_semaphore, #tpu.memory_space<semaphore_mem>>
    %120 = tpu.memref_squeeze %119 : memref<1x!tpu.dma_semaphore, #tpu.memory_space<semaphore_mem>> -> memref<!tpu.dma_semaphore, #tpu.memory_space<semaphore_mem>>
    tpu.enqueue_dma source(%117 : memref<1x768xf32, #tpu.memory_space<any>>) target(%118 : memref<1x768xf32, #tpu.memory_space<vmem>>) target_semaphore(%120 : memref<!tpu.dma_semaphore, #tpu.memory_space<semaphore_mem>>)
    %c1_i32_80 = arith.constant 1 : i32
    %121 = arith.addi %0, %c1_i32_80 : i32
    %c16_i32_81 = arith.constant 16 : i32
    %122 = arith.muli %121, %c16_i32_81 : i32
    %c1_i32_82 = arith.constant 1 : i32
    %123 = arith.addi %0, %c1_i32_82 : i32
    %124 = arith.index_cast %123 : i32 to index
    %c2_83 = arith.constant 2 : index
    %125 = memref.load %arg1[%124, %c2_83] : memref<2x4xi32, #tpu.memory_space<smem>>
    %126 = arith.addi %122, %125 : i32
    %c1_i32_84 = arith.constant 1 : i32
    %127 = arith.addi %0, %c1_i32_84 : i32
    %c16_i32_85 = arith.constant 16 : i32
    %128 = arith.muli %127, %c16_i32_85 : i32
    %c1_i32_86 = arith.constant 1 : i32
    %129 = arith.addi %0, %c1_i32_86 : i32
    %130 = arith.index_cast %129 : i32 to index
    %c2_87 = arith.constant 2 : index
    %131 = memref.load %arg2[%130, %c2_87] : memref<2x4xi32, #tpu.memory_space<smem>>
    %132 = arith.addi %128, %131 : i32
    %c10_i32 = arith.constant 10 : i32
    %c0_i32_88 = arith.constant 0 : i32
    %133 = tpu.memref_slice %arg3[%126, %c0_i32_88] : memref<32x768xf32, #tpu.memory_space<any>> -> memref<1x768xf32, #tpu.memory_space<any>>
    %c10_i32_89 = arith.constant 10 : i32
    %c0_i32_90 = arith.constant 0 : i32
    %134 = tpu.memref_slice %arg10[%c10_i32_89, %c0_i32_90] : memref<16x768xf32, #tpu.memory_space<vmem>> -> memref<1x768xf32, #tpu.memory_space<vmem>>
    %135 = tpu.memref_slice %arg12[%c10_i32] : memref<16x!tpu.dma_semaphore, #tpu.memory_space<semaphore_mem>> -> memref<1x!tpu.dma_semaphore, #tpu.memory_space<semaphore_mem>>
    %136 = tpu.memref_squeeze %135 : memref<1x!tpu.dma_semaphore, #tpu.memory_space<semaphore_mem>> -> memref<!tpu.dma_semaphore, #tpu.memory_space<semaphore_mem>>
    tpu.enqueue_dma source(%133 : memref<1x768xf32, #tpu.memory_space<any>>) target(%134 : memref<1x768xf32, #tpu.memory_space<vmem>>) target_semaphore(%136 : memref<!tpu.dma_semaphore, #tpu.memory_space<semaphore_mem>>)
    %c14_i32 = arith.constant 14 : i32
    %c0_i32_91 = arith.constant 0 : i32
    %137 = tpu.memref_slice %arg3[%132, %c0_i32_91] : memref<32x768xf32, #tpu.memory_space<any>> -> memref<1x768xf32, #tpu.memory_space<any>>
    %c14_i32_92 = arith.constant 14 : i32
    %c0_i32_93 = arith.constant 0 : i32
    %138 = tpu.memref_slice %arg10[%c14_i32_92, %c0_i32_93] : memref<16x768xf32, #tpu.memory_space<vmem>> -> memref<1x768xf32, #tpu.memory_space<vmem>>
    %139 = tpu.memref_slice %arg12[%c14_i32] : memref<16x!tpu.dma_semaphore, #tpu.memory_space<semaphore_mem>> -> memref<1x!tpu.dma_semaphore, #tpu.memory_space<semaphore_mem>>
    %140 = tpu.memref_squeeze %139 : memref<1x!tpu.dma_semaphore, #tpu.memory_space<semaphore_mem>> -> memref<!tpu.dma_semaphore, #tpu.memory_space<semaphore_mem>>
    tpu.enqueue_dma source(%137 : memref<1x768xf32, #tpu.memory_space<any>>) target(%138 : memref<1x768xf32, #tpu.memory_space<vmem>>) target_semaphore(%140 : memref<!tpu.dma_semaphore, #tpu.memory_space<semaphore_mem>>)
    %c1_i32_94 = arith.constant 1 : i32
    %141 = arith.addi %0, %c1_i32_94 : i32
    %c16_i32_95 = arith.constant 16 : i32
    %142 = arith.muli %141, %c16_i32_95 : i32
    %c1_i32_96 = arith.constant 1 : i32
    %143 = arith.addi %0, %c1_i32_96 : i32
    %144 = arith.index_cast %143 : i32 to index
    %c3_97 = arith.constant 3 : index
    %145 = memref.load %arg1[%144, %c3_97] : memref<2x4xi32, #tpu.memory_space<smem>>
    %146 = arith.addi %142, %145 : i32
    %c1_i32_98 = arith.constant 1 : i32
    %147 = arith.addi %0, %c1_i32_98 : i32
    %c16_i32_99 = arith.constant 16 : i32
    %148 = arith.muli %147, %c16_i32_99 : i32
    %c1_i32_100 = arith.constant 1 : i32
    %149 = arith.addi %0, %c1_i32_100 : i32
    %150 = arith.index_cast %149 : i32 to index
    %c3_101 = arith.constant 3 : index
    %151 = memref.load %arg2[%150, %c3_101] : memref<2x4xi32, #tpu.memory_space<smem>>
    %152 = arith.addi %148, %151 : i32
    %c11_i32 = arith.constant 11 : i32
    %c0_i32_102 = arith.constant 0 : i32
    %153 = tpu.memref_slice %arg3[%146, %c0_i32_102] : memref<32x768xf32, #tpu.memory_space<any>> -> memref<1x768xf32, #tpu.memory_space<any>>
    %c11_i32_103 = arith.constant 11 : i32
    %c0_i32_104 = arith.constant 0 : i32
    %154 = tpu.memref_slice %arg10[%c11_i32_103, %c0_i32_104] : memref<16x768xf32, #tpu.memory_space<vmem>> -> memref<1x768xf32, #tpu.memory_space<vmem>>
    %155 = tpu.memref_slice %arg12[%c11_i32] : memref<16x!tpu.dma_semaphore, #tpu.memory_space<semaphore_mem>> -> memref<1x!tpu.dma_semaphore, #tpu.memory_space<semaphore_mem>>
    %156 = tpu.memref_squeeze %155 : memref<1x!tpu.dma_semaphore, #tpu.memory_space<semaphore_mem>> -> memref<!tpu.dma_semaphore, #tpu.memory_space<semaphore_mem>>
    tpu.enqueue_dma source(%153 : memref<1x768xf32, #tpu.memory_space<any>>) target(%154 : memref<1x768xf32, #tpu.memory_space<vmem>>) target_semaphore(%156 : memref<!tpu.dma_semaphore, #tpu.memory_space<semaphore_mem>>)
    %c15_i32 = arith.constant 15 : i32
    %c0_i32_105 = arith.constant 0 : i32
    %157 = tpu.memref_slice %arg3[%152, %c0_i32_105] : memref<32x768xf32, #tpu.memory_space<any>> -> memref<1x768xf32, #tpu.memory_space<any>>
    %c15_i32_106 = arith.constant 15 : i32
    %c0_i32_107 = arith.constant 0 : i32
    %158 = tpu.memref_slice %arg10[%c15_i32_106, %c0_i32_107] : memref<16x768xf32, #tpu.memory_space<vmem>> -> memref<1x768xf32, #tpu.memory_space<vmem>>
    %159 = tpu.memref_slice %arg12[%c15_i32] : memref<16x!tpu.dma_semaphore, #tpu.memory_space<semaphore_mem>> -> memref<1x!tpu.dma_semaphore, #tpu.memory_space<semaphore_mem>>
    %160 = tpu.memref_squeeze %159 : memref<1x!tpu.dma_semaphore, #tpu.memory_space<semaphore_mem>> -> memref<!tpu.dma_semaphore, #tpu.memory_space<semaphore_mem>>
    tpu.enqueue_dma source(%157 : memref<1x768xf32, #tpu.memory_space<any>>) target(%158 : memref<1x768xf32, #tpu.memory_space<vmem>>) target_semaphore(%160 : memref<!tpu.dma_semaphore, #tpu.memory_space<semaphore_mem>>)
    %c0_i32_108 = arith.constant 0 : i32
    %161 = arith.addi %0, %c0_i32_108 : i32
    %162 = arith.index_cast %161 : i32 to index
    %c0_109 = arith.constant 0 : index
    %163 = memref.load %arg7[%162, %c0_109] : memref<2x4xf32, #tpu.memory_space<smem>>
    %cst = arith.constant 2.500000e-01 : f32
    %164 = arith.mulf %163, %cst : f32
    %c0_i32_110 = arith.constant 0 : i32
    %165 = arith.addi %0, %c0_i32_110 : i32
    %166 = arith.index_cast %165 : i32 to index
    %c1_111 = arith.constant 1 : index
    %167 = memref.load %arg7[%166, %c1_111] : memref<2x4xf32, #tpu.memory_space<smem>>
    %cst_112 = arith.constant 2.500000e-01 : f32
    %168 = arith.mulf %167, %cst_112 : f32
    %c0_i32_113 = arith.constant 0 : i32
    %169 = arith.addi %0, %c0_i32_113 : i32
    %170 = arith.index_cast %169 : i32 to index
    %c2_114 = arith.constant 2 : index
    %171 = memref.load %arg7[%170, %c2_114] : memref<2x4xf32, #tpu.memory_space<smem>>
    %cst_115 = arith.constant 2.500000e-01 : f32
    %172 = arith.mulf %171, %cst_115 : f32
    %c0_i32_116 = arith.constant 0 : i32
    %173 = arith.addi %0, %c0_i32_116 : i32
    %174 = arith.index_cast %173 : i32 to index
    %c3_117 = arith.constant 3 : index
    %175 = memref.load %arg7[%174, %c3_117] : memref<2x4xf32, #tpu.memory_space<smem>>
    %cst_118 = arith.constant 2.500000e-01 : f32
    %176 = arith.mulf %175, %cst_118 : f32
    %c1_i32_119 = arith.constant 1 : i32
    %177 = arith.addi %0, %c1_i32_119 : i32
    %178 = arith.index_cast %177 : i32 to index
    %c0_120 = arith.constant 0 : index
    %179 = memref.load %arg7[%178, %c0_120] : memref<2x4xf32, #tpu.memory_space<smem>>
    %cst_121 = arith.constant 2.500000e-01 : f32
    %180 = arith.mulf %179, %cst_121 : f32
    %c1_i32_122 = arith.constant 1 : i32
    %181 = arith.addi %0, %c1_i32_122 : i32
    %182 = arith.index_cast %181 : i32 to index
    %c1_123 = arith.constant 1 : index
    %183 = memref.load %arg7[%182, %c1_123] : memref<2x4xf32, #tpu.memory_space<smem>>
    %cst_124 = arith.constant 2.500000e-01 : f32
    %184 = arith.mulf %183, %cst_124 : f32
    %c1_i32_125 = arith.constant 1 : i32
    %185 = arith.addi %0, %c1_i32_125 : i32
    %186 = arith.index_cast %185 : i32 to index
    %c2_126 = arith.constant 2 : index
    %187 = memref.load %arg7[%186, %c2_126] : memref<2x4xf32, #tpu.memory_space<smem>>
    %cst_127 = arith.constant 2.500000e-01 : f32
    %188 = arith.mulf %187, %cst_127 : f32
    %c1_i32_128 = arith.constant 1 : i32
    %189 = arith.addi %0, %c1_i32_128 : i32
    %190 = arith.index_cast %189 : i32 to index
    %c3_129 = arith.constant 3 : index
    %191 = memref.load %arg7[%190, %c3_129] : memref<2x4xf32, #tpu.memory_space<smem>>
    %cst_130 = arith.constant 2.500000e-01 : f32
    %192 = arith.mulf %191, %cst_130 : f32
    %c0_i32_131 = arith.constant 0 : i32
    %193 = arith.addi %0, %c0_i32_131 : i32
    %194 = arith.index_cast %193 : i32 to index
    %c0_132 = arith.constant 0 : index
    %195 = memref.load %arg8[%194, %c0_132] : memref<2x4xf32, #tpu.memory_space<smem>>
    %cst_133 = arith.constant 2.500000e-01 : f32
    %196 = arith.mulf %195, %cst_133 : f32
    %c0_i32_134 = arith.constant 0 : i32
    %197 = arith.addi %0, %c0_i32_134 : i32
    %198 = arith.index_cast %197 : i32 to index
    %c1_135 = arith.constant 1 : index
    %199 = memref.load %arg8[%198, %c1_135] : memref<2x4xf32, #tpu.memory_space<smem>>
    %cst_136 = arith.constant 2.500000e-01 : f32
    %200 = arith.mulf %199, %cst_136 : f32
    %c0_i32_137 = arith.constant 0 : i32
    %201 = arith.addi %0, %c0_i32_137 : i32
    %202 = arith.index_cast %201 : i32 to index
    %c2_138 = arith.constant 2 : index
    %203 = memref.load %arg8[%202, %c2_138] : memref<2x4xf32, #tpu.memory_space<smem>>
    %cst_139 = arith.constant 2.500000e-01 : f32
    %204 = arith.mulf %203, %cst_139 : f32
    %c0_i32_140 = arith.constant 0 : i32
    %205 = arith.addi %0, %c0_i32_140 : i32
    %206 = arith.index_cast %205 : i32 to index
    %c3_141 = arith.constant 3 : index
    %207 = memref.load %arg8[%206, %c3_141] : memref<2x4xf32, #tpu.memory_space<smem>>
    %cst_142 = arith.constant 2.500000e-01 : f32
    %208 = arith.mulf %207, %cst_142 : f32
    %c1_i32_143 = arith.constant 1 : i32
    %209 = arith.addi %0, %c1_i32_143 : i32
    %210 = arith.index_cast %209 : i32 to index
    %c0_144 = arith.constant 0 : index
    %211 = memref.load %arg8[%210, %c0_144] : memref<2x4xf32, #tpu.memory_space<smem>>
    %cst_145 = arith.constant 2.500000e-01 : f32
    %212 = arith.mulf %211, %cst_145 : f32
    %c1_i32_146 = arith.constant 1 : i32
    %213 = arith.addi %0, %c1_i32_146 : i32
    %214 = arith.index_cast %213 : i32 to index
    %c1_147 = arith.constant 1 : index
    %215 = memref.load %arg8[%214, %c1_147] : memref<2x4xf32, #tpu.memory_space<smem>>
    %cst_148 = arith.constant 2.500000e-01 : f32
    %216 = arith.mulf %215, %cst_148 : f32
    %c1_i32_149 = arith.constant 1 : i32
    %217 = arith.addi %0, %c1_i32_149 : i32
    %218 = arith.index_cast %217 : i32 to index
    %c2_150 = arith.constant 2 : index
    %219 = memref.load %arg8[%218, %c2_150] : memref<2x4xf32, #tpu.memory_space<smem>>
    %cst_151 = arith.constant 2.500000e-01 : f32
    %220 = arith.mulf %219, %cst_151 : f32
    %c1_i32_152 = arith.constant 1 : i32
    %221 = arith.addi %0, %c1_i32_152 : i32
    %222 = arith.index_cast %221 : i32 to index
    %c3_153 = arith.constant 3 : index
    %223 = memref.load %arg8[%222, %c3_153] : memref<2x4xf32, #tpu.memory_space<smem>>
    %cst_154 = arith.constant 2.500000e-01 : f32
    %224 = arith.mulf %223, %cst_154 : f32
    %c0_155 = arith.constant 0 : index
    %c0_156 = arith.constant 0 : index
    %225 = vector.load %arg4[%c0_155, %c0_156] : memref<2x768xf32, #tpu.memory_space<vmem>>, vector<2x768xf32>
    %c0_157 = arith.constant 0 : index
    %c0_158 = arith.constant 0 : index
    %226 = vector.load %arg11[%c0_157, %c0_158] : memref<2x2304xf32, #tpu.memory_space<vmem>>, vector<2x768xf32>
    tpu.vector_store %arg11[%c0_157, %c0_158], %225 {strides = array<i32>} : memref<2x2304xf32, #tpu.memory_space<vmem>>, vector<2x768xf32>,
    %c0_i32_159 = arith.constant 0 : i32
    %c0_i32_160 = arith.constant 0 : i32
    %c0_i32_161 = arith.constant 0 : i32
    %227 = tpu.memref_slice %arg3[%c0_i32_160, %c0_i32_161] : memref<32x768xf32, #tpu.memory_space<any>> -> memref<1x768xf32, #tpu.memory_space<any>>
    %c0_i32_162 = arith.constant 0 : i32
    %c0_i32_163 = arith.constant 0 : i32
    %228 = tpu.memref_slice %arg10[%c0_i32_162, %c0_i32_163] : memref<16x768xf32, #tpu.memory_space<vmem>> -> memref<1x768xf32, #tpu.memory_space<vmem>>
    %229 = tpu.memref_slice %arg12[%c0_i32_159] : memref<16x!tpu.dma_semaphore, #tpu.memory_space<semaphore_mem>> -> memref<1x!tpu.dma_semaphore, #tpu.memory_space<semaphore_mem>>
    %230 = tpu.memref_squeeze %229 : memref<1x!tpu.dma_semaphore, #tpu.memory_space<semaphore_mem>> -> memref<!tpu.dma_semaphore, #tpu.memory_space<semaphore_mem>>
    tpu.wait_dma2 semaphore(%230 : memref<!tpu.dma_semaphore, #tpu.memory_space<semaphore_mem>>) src(%227 : memref<1x768xf32, #tpu.memory_space<any>>) dst(%228 : memref<1x768xf32, #tpu.memory_space<vmem>>)
    %c1_i32_164 = arith.constant 1 : i32
    %c0_i32_165 = arith.constant 0 : i32
    %c0_i32_166 = arith.constant 0 : i32
    %231 = tpu.memref_slice %arg3[%c0_i32_165, %c0_i32_166] : memref<32x768xf32, #tpu.memory_space<any>> -> memref<1x768xf32, #tpu.memory_space<any>>
    %c1_i32_167 = arith.constant 1 : i32
    %c0_i32_168 = arith.constant 0 : i32
    %232 = tpu.memref_slice %arg10[%c1_i32_167, %c0_i32_168] : memref<16x768xf32, #tpu.memory_space<vmem>> -> memref<1x768xf32, #tpu.memory_space<vmem>>
    %233 = tpu.memref_slice %arg12[%c1_i32_164] : memref<16x!tpu.dma_semaphore, #tpu.memory_space<semaphore_mem>> -> memref<1x!tpu.dma_semaphore, #tpu.memory_space<semaphore_mem>>
    %234 = tpu.memref_squeeze %233 : memref<1x!tpu.dma_semaphore, #tpu.memory_space<semaphore_mem>> -> memref<!tpu.dma_semaphore, #tpu.memory_space<semaphore_mem>>
    tpu.wait_dma2 semaphore(%234 : memref<!tpu.dma_semaphore, #tpu.memory_space<semaphore_mem>>) src(%231 : memref<1x768xf32, #tpu.memory_space<any>>) dst(%232 : memref<1x768xf32, #tpu.memory_space<vmem>>)
    %c2_i32_169 = arith.constant 2 : i32
    %c0_i32_170 = arith.constant 0 : i32
    %c0_i32_171 = arith.constant 0 : i32
    %235 = tpu.memref_slice %arg3[%c0_i32_170, %c0_i32_171] : memref<32x768xf32, #tpu.memory_space<any>> -> memref<1x768xf32, #tpu.memory_space<any>>
    %c2_i32_172 = arith.constant 2 : i32
    %c0_i32_173 = arith.constant 0 : i32
    %236 = tpu.memref_slice %arg10[%c2_i32_172, %c0_i32_173] : memref<16x768xf32, #tpu.memory_space<vmem>> -> memref<1x768xf32, #tpu.memory_space<vmem>>
    %237 = tpu.memref_slice %arg12[%c2_i32_169] : memref<16x!tpu.dma_semaphore, #tpu.memory_space<semaphore_mem>> -> memref<1x!tpu.dma_semaphore, #tpu.memory_space<semaphore_mem>>
    %238 = tpu.memref_squeeze %237 : memref<1x!tpu.dma_semaphore, #tpu.memory_space<semaphore_mem>> -> memref<!tpu.dma_semaphore, #tpu.memory_space<semaphore_mem>>
    tpu.wait_dma2 semaphore(%238 : memref<!tpu.dma_semaphore, #tpu.memory_space<semaphore_mem>>) src(%235 : memref<1x768xf32, #tpu.memory_space<any>>) dst(%236 : memref<1x768xf32, #tpu.memory_space<vmem>>)
    %c3_i32_174 = arith.constant 3 : i32
    %c0_i32_175 = arith.constant 0 : i32
    %c0_i32_176 = arith.constant 0 : i32
    %239 = tpu.memref_slice %arg3[%c0_i32_175, %c0_i32_176] : memref<32x768xf32, #tpu.memory_space<any>> -> memref<1x768xf32, #tpu.memory_space<any>>
    %c3_i32_177 = arith.constant 3 : i32
    %c0_i32_178 = arith.constant 0 : i32
    %240 = tpu.memref_slice %arg10[%c3_i32_177, %c0_i32_178] : memref<16x768xf32, #tpu.memory_space<vmem>> -> memref<1x768xf32, #tpu.memory_space<vmem>>
    %241 = tpu.memref_slice %arg12[%c3_i32_174] : memref<16x!tpu.dma_semaphore, #tpu.memory_space<semaphore_mem>> -> memref<1x!tpu.dma_semaphore, #tpu.memory_space<semaphore_mem>>
    %242 = tpu.memref_squeeze %241 : memref<1x!tpu.dma_semaphore, #tpu.memory_space<semaphore_mem>> -> memref<!tpu.dma_semaphore, #tpu.memory_space<semaphore_mem>>
    tpu.wait_dma2 semaphore(%242 : memref<!tpu.dma_semaphore, #tpu.memory_space<semaphore_mem>>) src(%239 : memref<1x768xf32, #tpu.memory_space<any>>) dst(%240 : memref<1x768xf32, #tpu.memory_space<vmem>>)
    %c4_i32_179 = arith.constant 4 : i32
    %c0_i32_180 = arith.constant 0 : i32
    %c0_i32_181 = arith.constant 0 : i32
    %243 = tpu.memref_slice %arg3[%c0_i32_180, %c0_i32_181] : memref<32x768xf32, #tpu.memory_space<any>> -> memref<1x768xf32, #tpu.memory_space<any>>
    %c4_i32_182 = arith.constant 4 : i32
    %c0_i32_183 = arith.constant 0 : i32
    %244 = tpu.memref_slice %arg10[%c4_i32_182, %c0_i32_183] : memref<16x768xf32, #tpu.memory_space<vmem>> -> memref<1x768xf32, #tpu.memory_space<vmem>>
    %245 = tpu.memref_slice %arg12[%c4_i32_179] : memref<16x!tpu.dma_semaphore, #tpu.memory_space<semaphore_mem>> -> memref<1x!tpu.dma_semaphore, #tpu.memory_space<semaphore_mem>>
    %246 = tpu.memref_squeeze %245 : memref<1x!tpu.dma_semaphore, #tpu.memory_space<semaphore_mem>> -> memref<!tpu.dma_semaphore, #tpu.memory_space<semaphore_mem>>
    tpu.wait_dma2 semaphore(%246 : memref<!tpu.dma_semaphore, #tpu.memory_space<semaphore_mem>>) src(%243 : memref<1x768xf32, #tpu.memory_space<any>>) dst(%244 : memref<1x768xf32, #tpu.memory_space<vmem>>)
    %c5_i32_184 = arith.constant 5 : i32
    %c0_i32_185 = arith.constant 0 : i32
    %c0_i32_186 = arith.constant 0 : i32
    %247 = tpu.memref_slice %arg3[%c0_i32_185, %c0_i32_186] : memref<32x768xf32, #tpu.memory_space<any>> -> memref<1x768xf32, #tpu.memory_space<any>>
    %c5_i32_187 = arith.constant 5 : i32
    %c0_i32_188 = arith.constant 0 : i32
    %248 = tpu.memref_slice %arg10[%c5_i32_187, %c0_i32_188] : memref<16x768xf32, #tpu.memory_space<vmem>> -> memref<1x768xf32, #tpu.memory_space<vmem>>
    %249 = tpu.memref_slice %arg12[%c5_i32_184] : memref<16x!tpu.dma_semaphore, #tpu.memory_space<semaphore_mem>> -> memref<1x!tpu.dma_semaphore, #tpu.memory_space<semaphore_mem>>
    %250 = tpu.memref_squeeze %249 : memref<1x!tpu.dma_semaphore, #tpu.memory_space<semaphore_mem>> -> memref<!tpu.dma_semaphore, #tpu.memory_space<semaphore_mem>>
    tpu.wait_dma2 semaphore(%250 : memref<!tpu.dma_semaphore, #tpu.memory_space<semaphore_mem>>) src(%247 : memref<1x768xf32, #tpu.memory_space<any>>) dst(%248 : memref<1x768xf32, #tpu.memory_space<vmem>>)
    %c6_i32_189 = arith.constant 6 : i32
    %c0_i32_190 = arith.constant 0 : i32
    %c0_i32_191 = arith.constant 0 : i32
    %251 = tpu.memref_slice %arg3[%c0_i32_190, %c0_i32_191] : memref<32x768xf32, #tpu.memory_space<any>> -> memref<1x768xf32, #tpu.memory_space<any>>
    %c6_i32_192 = arith.constant 6 : i32
    %c0_i32_193 = arith.constant 0 : i32
    %252 = tpu.memref_slice %arg10[%c6_i32_192, %c0_i32_193] : memref<16x768xf32, #tpu.memory_space<vmem>> -> memref<1x768xf32, #tpu.memory_space<vmem>>
    %253 = tpu.memref_slice %arg12[%c6_i32_189] : memref<16x!tpu.dma_semaphore, #tpu.memory_space<semaphore_mem>> -> memref<1x!tpu.dma_semaphore, #tpu.memory_space<semaphore_mem>>
    %254 = tpu.memref_squeeze %253 : memref<1x!tpu.dma_semaphore, #tpu.memory_space<semaphore_mem>> -> memref<!tpu.dma_semaphore, #tpu.memory_space<semaphore_mem>>
    tpu.wait_dma2 semaphore(%254 : memref<!tpu.dma_semaphore, #tpu.memory_space<semaphore_mem>>) src(%251 : memref<1x768xf32, #tpu.memory_space<any>>) dst(%252 : memref<1x768xf32, #tpu.memory_space<vmem>>)
    %c7_i32_194 = arith.constant 7 : i32
    %c0_i32_195 = arith.constant 0 : i32
    %c0_i32_196 = arith.constant 0 : i32
    %255 = tpu.memref_slice %arg3[%c0_i32_195, %c0_i32_196] : memref<32x768xf32, #tpu.memory_space<any>> -> memref<1x768xf32, #tpu.memory_space<any>>
    %c7_i32_197 = arith.constant 7 : i32
    %c0_i32_198 = arith.constant 0 : i32
    %256 = tpu.memref_slice %arg10[%c7_i32_197, %c0_i32_198] : memref<16x768xf32, #tpu.memory_space<vmem>> -> memref<1x768xf32, #tpu.memory_space<vmem>>
    %257 = tpu.memref_slice %arg12[%c7_i32_194] : memref<16x!tpu.dma_semaphore, #tpu.memory_space<semaphore_mem>> -> memref<1x!tpu.dma_semaphore, #tpu.memory_space<semaphore_mem>>
    %258 = tpu.memref_squeeze %257 : memref<1x!tpu.dma_semaphore, #tpu.memory_space<semaphore_mem>> -> memref<!tpu.dma_semaphore, #tpu.memory_space<semaphore_mem>>
    tpu.wait_dma2 semaphore(%258 : memref<!tpu.dma_semaphore, #tpu.memory_space<semaphore_mem>>) src(%255 : memref<1x768xf32, #tpu.memory_space<any>>) dst(%256 : memref<1x768xf32, #tpu.memory_space<vmem>>)
    %c8_i32_199 = arith.constant 8 : i32
    %c0_i32_200 = arith.constant 0 : i32
    %c0_i32_201 = arith.constant 0 : i32
    %259 = tpu.memref_slice %arg3[%c0_i32_200, %c0_i32_201] : memref<32x768xf32, #tpu.memory_space<any>> -> memref<1x768xf32, #tpu.memory_space<any>>
    %c8_i32_202 = arith.constant 8 : i32
    %c0_i32_203 = arith.constant 0 : i32
    %260 = tpu.memref_slice %arg10[%c8_i32_202, %c0_i32_203] : memref<16x768xf32, #tpu.memory_space<vmem>> -> memref<1x768xf32, #tpu.memory_space<vmem>>
    %261 = tpu.memref_slice %arg12[%c8_i32_199] : memref<16x!tpu.dma_semaphore, #tpu.memory_space<semaphore_mem>> -> memref<1x!tpu.dma_semaphore, #tpu.memory_space<semaphore_mem>>
    %262 = tpu.memref_squeeze %261 : memref<1x!tpu.dma_semaphore, #tpu.memory_space<semaphore_mem>> -> memref<!tpu.dma_semaphore, #tpu.memory_space<semaphore_mem>>
    tpu.wait_dma2 semaphore(%262 : memref<!tpu.dma_semaphore, #tpu.memory_space<semaphore_mem>>) src(%259 : memref<1x768xf32, #tpu.memory_space<any>>) dst(%260 : memref<1x768xf32, #tpu.memory_space<vmem>>)
    %c9_i32_204 = arith.constant 9 : i32
    %c0_i32_205 = arith.constant 0 : i32
    %c0_i32_206 = arith.constant 0 : i32
    %263 = tpu.memref_slice %arg3[%c0_i32_205, %c0_i32_206] : memref<32x768xf32, #tpu.memory_space<any>> -> memref<1x768xf32, #tpu.memory_space<any>>
    %c9_i32_207 = arith.constant 9 : i32
    %c0_i32_208 = arith.constant 0 : i32
    %264 = tpu.memref_slice %arg10[%c9_i32_207, %c0_i32_208] : memref<16x768xf32, #tpu.memory_space<vmem>> -> memref<1x768xf32, #tpu.memory_space<vmem>>
    %265 = tpu.memref_slice %arg12[%c9_i32_204] : memref<16x!tpu.dma_semaphore, #tpu.memory_space<semaphore_mem>> -> memref<1x!tpu.dma_semaphore, #tpu.memory_space<semaphore_mem>>
    %266 = tpu.memref_squeeze %265 : memref<1x!tpu.dma_semaphore, #tpu.memory_space<semaphore_mem>> -> memref<!tpu.dma_semaphore, #tpu.memory_space<semaphore_mem>>
    tpu.wait_dma2 semaphore(%266 : memref<!tpu.dma_semaphore, #tpu.memory_space<semaphore_mem>>) src(%263 : memref<1x768xf32, #tpu.memory_space<any>>) dst(%264 : memref<1x768xf32, #tpu.memory_space<vmem>>)
    %c10_i32_209 = arith.constant 10 : i32
    %c0_i32_210 = arith.constant 0 : i32
    %c0_i32_211 = arith.constant 0 : i32
    %267 = tpu.memref_slice %arg3[%c0_i32_210, %c0_i32_211] : memref<32x768xf32, #tpu.memory_space<any>> -> memref<1x768xf32, #tpu.memory_space<any>>
    %c10_i32_212 = arith.constant 10 : i32
    %c0_i32_213 = arith.constant 0 : i32
    %268 = tpu.memref_slice %arg10[%c10_i32_212, %c0_i32_213] : memref<16x768xf32, #tpu.memory_space<vmem>> -> memref<1x768xf32, #tpu.memory_space<vmem>>
    %269 = tpu.memref_slice %arg12[%c10_i32_209] : memref<16x!tpu.dma_semaphore, #tpu.memory_space<semaphore_mem>> -> memref<1x!tpu.dma_semaphore, #tpu.memory_space<semaphore_mem>>
    %270 = tpu.memref_squeeze %269 : memref<1x!tpu.dma_semaphore, #tpu.memory_space<semaphore_mem>> -> memref<!tpu.dma_semaphore, #tpu.memory_space<semaphore_mem>>
    tpu.wait_dma2 semaphore(%270 : memref<!tpu.dma_semaphore, #tpu.memory_space<semaphore_mem>>) src(%267 : memref<1x768xf32, #tpu.memory_space<any>>) dst(%268 : memref<1x768xf32, #tpu.memory_space<vmem>>)
    %c11_i32_214 = arith.constant 11 : i32
    %c0_i32_215 = arith.constant 0 : i32
    %c0_i32_216 = arith.constant 0 : i32
    %271 = tpu.memref_slice %arg3[%c0_i32_215, %c0_i32_216] : memref<32x768xf32, #tpu.memory_space<any>> -> memref<1x768xf32, #tpu.memory_space<any>>
    %c11_i32_217 = arith.constant 11 : i32
    %c0_i32_218 = arith.constant 0 : i32
    %272 = tpu.memref_slice %arg10[%c11_i32_217, %c0_i32_218] : memref<16x768xf32, #tpu.memory_space<vmem>> -> memref<1x768xf32, #tpu.memory_space<vmem>>
    %273 = tpu.memref_slice %arg12[%c11_i32_214] : memref<16x!tpu.dma_semaphore, #tpu.memory_space<semaphore_mem>> -> memref<1x!tpu.dma_semaphore, #tpu.memory_space<semaphore_mem>>
    %274 = tpu.memref_squeeze %273 : memref<1x!tpu.dma_semaphore, #tpu.memory_space<semaphore_mem>> -> memref<!tpu.dma_semaphore, #tpu.memory_space<semaphore_mem>>
    tpu.wait_dma2 semaphore(%274 : memref<!tpu.dma_semaphore, #tpu.memory_space<semaphore_mem>>) src(%271 : memref<1x768xf32, #tpu.memory_space<any>>) dst(%272 : memref<1x768xf32, #tpu.memory_space<vmem>>)
    %c12_i32_219 = arith.constant 12 : i32
    %c0_i32_220 = arith.constant 0 : i32
    %c0_i32_221 = arith.constant 0 : i32
    %275 = tpu.memref_slice %arg3[%c0_i32_220, %c0_i32_221] : memref<32x768xf32, #tpu.memory_space<any>> -> memref<1x768xf32, #tpu.memory_space<any>>
    %c12_i32_222 = arith.constant 12 : i32
    %c0_i32_223 = arith.constant 0 : i32
    %276 = tpu.memref_slice %arg10[%c12_i32_222, %c0_i32_223] : memref<16x768xf32, #tpu.memory_space<vmem>> -> memref<1x768xf32, #tpu.memory_space<vmem>>
    %277 = tpu.memref_slice %arg12[%c12_i32_219] : memref<16x!tpu.dma_semaphore, #tpu.memory_space<semaphore_mem>> -> memref<1x!tpu.dma_semaphore, #tpu.memory_space<semaphore_mem>>
    %278 = tpu.memref_squeeze %277 : memref<1x!tpu.dma_semaphore, #tpu.memory_space<semaphore_mem>> -> memref<!tpu.dma_semaphore, #tpu.memory_space<semaphore_mem>>
    tpu.wait_dma2 semaphore(%278 : memref<!tpu.dma_semaphore, #tpu.memory_space<semaphore_mem>>) src(%275 : memref<1x768xf32, #tpu.memory_space<any>>) dst(%276 : memref<1x768xf32, #tpu.memory_space<vmem>>)
    %c13_i32_224 = arith.constant 13 : i32
    %c0_i32_225 = arith.constant 0 : i32
    %c0_i32_226 = arith.constant 0 : i32
    %279 = tpu.memref_slice %arg3[%c0_i32_225, %c0_i32_226] : memref<32x768xf32, #tpu.memory_space<any>> -> memref<1x768xf32, #tpu.memory_space<any>>
    %c13_i32_227 = arith.constant 13 : i32
    %c0_i32_228 = arith.constant 0 : i32
    %280 = tpu.memref_slice %arg10[%c13_i32_227, %c0_i32_228] : memref<16x768xf32, #tpu.memory_space<vmem>> -> memref<1x768xf32, #tpu.memory_space<vmem>>
    %281 = tpu.memref_slice %arg12[%c13_i32_224] : memref<16x!tpu.dma_semaphore, #tpu.memory_space<semaphore_mem>> -> memref<1x!tpu.dma_semaphore, #tpu.memory_space<semaphore_mem>>
    %282 = tpu.memref_squeeze %281 : memref<1x!tpu.dma_semaphore, #tpu.memory_space<semaphore_mem>> -> memref<!tpu.dma_semaphore, #tpu.memory_space<semaphore_mem>>
    tpu.wait_dma2 semaphore(%282 : memref<!tpu.dma_semaphore, #tpu.memory_space<semaphore_mem>>) src(%279 : memref<1x768xf32, #tpu.memory_space<any>>) dst(%280 : memref<1x768xf32, #tpu.memory_space<vmem>>)
    %c14_i32_229 = arith.constant 14 : i32
    %c0_i32_230 = arith.constant 0 : i32
    %c0_i32_231 = arith.constant 0 : i32
    %283 = tpu.memref_slice %arg3[%c0_i32_230, %c0_i32_231] : memref<32x768xf32, #tpu.memory_space<any>> -> memref<1x768xf32, #tpu.memory_space<any>>
    %c14_i32_232 = arith.constant 14 : i32
    %c0_i32_233 = arith.constant 0 : i32
    %284 = tpu.memref_slice %arg10[%c14_i32_232, %c0_i32_233] : memref<16x768xf32, #tpu.memory_space<vmem>> -> memref<1x768xf32, #tpu.memory_space<vmem>>
    %285 = tpu.memref_slice %arg12[%c14_i32_229] : memref<16x!tpu.dma_semaphore, #tpu.memory_space<semaphore_mem>> -> memref<1x!tpu.dma_semaphore, #tpu.memory_space<semaphore_mem>>
    %286 = tpu.memref_squeeze %285 : memref<1x!tpu.dma_semaphore, #tpu.memory_space<semaphore_mem>> -> memref<!tpu.dma_semaphore, #tpu.memory_space<semaphore_mem>>
    tpu.wait_dma2 semaphore(%286 : memref<!tpu.dma_semaphore, #tpu.memory_space<semaphore_mem>>) src(%283 : memref<1x768xf32, #tpu.memory_space<any>>) dst(%284 : memref<1x768xf32, #tpu.memory_space<vmem>>)
    %c15_i32_234 = arith.constant 15 : i32
    %c0_i32_235 = arith.constant 0 : i32
    %c0_i32_236 = arith.constant 0 : i32
    %287 = tpu.memref_slice %arg3[%c0_i32_235, %c0_i32_236] : memref<32x768xf32, #tpu.memory_space<any>> -> memref<1x768xf32, #tpu.memory_space<any>>
    %c15_i32_237 = arith.constant 15 : i32
    %c0_i32_238 = arith.constant 0 : i32
    %288 = tpu.memref_slice %arg10[%c15_i32_237, %c0_i32_238] : memref<16x768xf32, #tpu.memory_space<vmem>> -> memref<1x768xf32, #tpu.memory_space<vmem>>
    %289 = tpu.memref_slice %arg12[%c15_i32_234] : memref<16x!tpu.dma_semaphore, #tpu.memory_space<semaphore_mem>> -> memref<1x!tpu.dma_semaphore, #tpu.memory_space<semaphore_mem>>
    %290 = tpu.memref_squeeze %289 : memref<1x!tpu.dma_semaphore, #tpu.memory_space<semaphore_mem>> -> memref<!tpu.dma_semaphore, #tpu.memory_space<semaphore_mem>>
    tpu.wait_dma2 semaphore(%290 : memref<!tpu.dma_semaphore, #tpu.memory_space<semaphore_mem>>) src(%287 : memref<1x768xf32, #tpu.memory_space<any>>) dst(%288 : memref<1x768xf32, #tpu.memory_space<vmem>>)
    %c0_239 = arith.constant 0 : index
    %c0_240 = arith.constant 0 : index
    %291 = vector.load %arg10[%c0_239, %c0_240] : memref<16x768xf32, #tpu.memory_space<vmem>>, vector<1x768xf32>
    %292 = vector.broadcast %164 : f32 to vector<1x768xf32>
    %293 = arith.mulf %291, %292 : vector<1x768xf32>
    %c4 = arith.constant 4 : index
    %c0_241 = arith.constant 0 : index
    %294 = vector.load %arg10[%c4, %c0_241] : memref<16x768xf32, #tpu.memory_space<vmem>>, vector<1x768xf32>
    %295 = vector.broadcast %196 : f32 to vector<1x768xf32>
    %296 = arith.mulf %294, %295 : vector<1x768xf32>
    %c1_242 = arith.constant 1 : index
    %c0_243 = arith.constant 0 : index
    %297 = vector.load %arg10[%c1_242, %c0_243] : memref<16x768xf32, #tpu.memory_space<vmem>>, vector<1x768xf32>
    %298 = vector.broadcast %168 : f32 to vector<1x768xf32>
    %299 = arith.mulf %297, %298 : vector<1x768xf32>
    %300 = arith.addf %293, %299 : vector<1x768xf32>
    %c5 = arith.constant 5 : index
    %c0_244 = arith.constant 0 : index
    %301 = vector.load %arg10[%c5, %c0_244] : memref<16x768xf32, #tpu.memory_space<vmem>>, vector<1x768xf32>
    %302 = vector.broadcast %200 : f32 to vector<1x768xf32>
    %303 = arith.mulf %301, %302 : vector<1x768xf32>
    %304 = arith.addf %296, %303 : vector<1x768xf32>
    %c2_245 = arith.constant 2 : index
    %c0_246 = arith.constant 0 : index
    %305 = vector.load %arg10[%c2_245, %c0_246] : memref<16x768xf32, #tpu.memory_space<vmem>>, vector<1x768xf32>
    %306 = vector.broadcast %172 : f32 to vector<1x768xf32>
    %307 = arith.mulf %305, %306 : vector<1x768xf32>
    %308 = arith.addf %300, %307 : vector<1x768xf32>
    %c6 = arith.constant 6 : index
    %c0_247 = arith.constant 0 : index
    %309 = vector.load %arg10[%c6, %c0_247] : memref<16x768xf32, #tpu.memory_space<vmem>>, vector<1x768xf32>
    %310 = vector.broadcast %204 : f32 to vector<1x768xf32>
    %311 = arith.mulf %309, %310 : vector<1x768xf32>
    %312 = arith.addf %304, %311 : vector<1x768xf32>
    %c3_248 = arith.constant 3 : index
    %c0_249 = arith.constant 0 : index
    %313 = vector.load %arg10[%c3_248, %c0_249] : memref<16x768xf32, #tpu.memory_space<vmem>>, vector<1x768xf32>
    %314 = vector.broadcast %176 : f32 to vector<1x768xf32>
    %315 = arith.mulf %313, %314 : vector<1x768xf32>
    %316 = arith.addf %308, %315 : vector<1x768xf32>
    %c7 = arith.constant 7 : index
    %c0_250 = arith.constant 0 : index
    %317 = vector.load %arg10[%c7, %c0_250] : memref<16x768xf32, #tpu.memory_space<vmem>>, vector<1x768xf32>
    %318 = vector.broadcast %208 : f32 to vector<1x768xf32>
    %319 = arith.mulf %317, %318 : vector<1x768xf32>
    %320 = arith.addf %312, %319 : vector<1x768xf32>
    %c0_251 = arith.constant 0 : index
    %c768 = arith.constant 768 : index
    %321 = vector.load %arg11[%c0_251, %c768] : memref<2x2304xf32, #tpu.memory_space<vmem>>, vector<1x768xf32>
    tpu.vector_store %arg11[%c0_251, %c768], %316 {strides = array<i32>} : memref<2x2304xf32, #tpu.memory_space<vmem>>, vector<1x768xf32>,
    %c0_252 = arith.constant 0 : index
    %c1536 = arith.constant 1536 : index
    %322 = vector.load %arg11[%c0_252, %c1536] : memref<2x2304xf32, #tpu.memory_space<vmem>>, vector<1x768xf32>
    tpu.vector_store %arg11[%c0_252, %c1536], %320 {strides = array<i32>} : memref<2x2304xf32, #tpu.memory_space<vmem>>, vector<1x768xf32>,
    %c8 = arith.constant 8 : index
    %c0_253 = arith.constant 0 : index
    %323 = vector.load %arg10[%c8, %c0_253] : memref<16x768xf32, #tpu.memory_space<vmem>>, vector<1x768xf32>
    %324 = vector.broadcast %180 : f32 to vector<1x768xf32>
    %325 = arith.mulf %323, %324 : vector<1x768xf32>
    %c12 = arith.constant 12 : index
    %c0_254 = arith.constant 0 : index
    %326 = vector.load %arg10[%c12, %c0_254] : memref<16x768xf32, #tpu.memory_space<vmem>>, vector<1x768xf32>
    %327 = vector.broadcast %212 : f32 to vector<1x768xf32>
    %328 = arith.mulf %326, %327 : vector<1x768xf32>
    %c9 = arith.constant 9 : index
    %c0_255 = arith.constant 0 : index
    %329 = vector.load %arg10[%c9, %c0_255] : memref<16x768xf32, #tpu.memory_space<vmem>>, vector<1x768xf32>
    %330 = vector.broadcast %184 : f32 to vector<1x768xf32>
    %331 = arith.mulf %329, %330 : vector<1x768xf32>
    %332 = arith.addf %325, %331 : vector<1x768xf32>
    %c13 = arith.constant 13 : index
    %c0_256 = arith.constant 0 : index
    %333 = vector.load %arg10[%c13, %c0_256] : memref<16x768xf32, #tpu.memory_space<vmem>>, vector<1x768xf32>
    %334 = vector.broadcast %216 : f32 to vector<1x768xf32>
    %335 = arith.mulf %333, %334 : vector<1x768xf32>
    %336 = arith.addf %328, %335 : vector<1x768xf32>
    %c10 = arith.constant 10 : index
    %c0_257 = arith.constant 0 : index
    %337 = vector.load %arg10[%c10, %c0_257] : memref<16x768xf32, #tpu.memory_space<vmem>>, vector<1x768xf32>
    %338 = vector.broadcast %188 : f32 to vector<1x768xf32>
    %339 = arith.mulf %337, %338 : vector<1x768xf32>
    %340 = arith.addf %332, %339 : vector<1x768xf32>
    %c14 = arith.constant 14 : index
    %c0_258 = arith.constant 0 : index
    %341 = vector.load %arg10[%c14, %c0_258] : memref<16x768xf32, #tpu.memory_space<vmem>>, vector<1x768xf32>
    %342 = vector.broadcast %220 : f32 to vector<1x768xf32>
    %343 = arith.mulf %341, %342 : vector<1x768xf32>
    %344 = arith.addf %336, %343 : vector<1x768xf32>
    %c11 = arith.constant 11 : index
    %c0_259 = arith.constant 0 : index
    %345 = vector.load %arg10[%c11, %c0_259] : memref<16x768xf32, #tpu.memory_space<vmem>>, vector<1x768xf32>
    %346 = vector.broadcast %192 : f32 to vector<1x768xf32>
    %347 = arith.mulf %345, %346 : vector<1x768xf32>
    %348 = arith.addf %340, %347 : vector<1x768xf32>
    %c15 = arith.constant 15 : index
    %c0_260 = arith.constant 0 : index
    %349 = vector.load %arg10[%c15, %c0_260] : memref<16x768xf32, #tpu.memory_space<vmem>>, vector<1x768xf32>
    %350 = vector.broadcast %224 : f32 to vector<1x768xf32>
    %351 = arith.mulf %349, %350 : vector<1x768xf32>
    %352 = arith.addf %344, %351 : vector<1x768xf32>
    %c1_261 = arith.constant 1 : index
    %c768_262 = arith.constant 768 : index
    %353 = vector.load %arg11[%c1_261, %c768_262] : memref<2x2304xf32, #tpu.memory_space<vmem>>, vector<1x768xf32>
    tpu.vector_store %arg11[%c1_261, %c768_262], %348 {strides = array<i32>} : memref<2x2304xf32, #tpu.memory_space<vmem>>, vector<1x768xf32>,
    %c1_263 = arith.constant 1 : index
    %c1536_264 = arith.constant 1536 : index
    %354 = vector.load %arg11[%c1_263, %c1536_264] : memref<2x2304xf32, #tpu.memory_space<vmem>>, vector<1x768xf32>
    tpu.vector_store %arg11[%c1_263, %c1536_264], %352 {strides = array<i32>} : memref<2x2304xf32, #tpu.memory_space<vmem>>, vector<1x768xf32>,
    %c0_265 = arith.constant 0 : index
    %c0_266 = arith.constant 0 : index
    %355 = vector.load %arg11[%c0_265, %c0_266] : memref<2x2304xf32, #tpu.memory_space<vmem>>, vector<2x2304xf32>
    %356 = arith.truncf %355 : vector<2x2304xf32> to vector<2x2304xbf16>
    %c0_267 = arith.constant 0 : index
    %c0_268 = arith.constant 0 : index
    %357 = vector.load %arg5[%c0_267, %c0_268] : memref<2304x128xbf16, #tpu.memory_space<vmem>>, vector<2304x128xbf16>
    %cst_269 = arith.constant dense<0.000000e+00> : vector<2x128xf32>
    %358 = tpu.matmul %356, %357, %cst_269 {dimension_numbers = #tpu.dot_dimension_numbers<[1], [0], [0], [1], [0, 0, 1, 1], [], []>} : vector<2x2304xbf16>, vector<2304x128xbf16>, vector<2x128xf32> -> vector<2x128xf32>
    %c0_270 = arith.constant 0 : index
    %c0_271 = arith.constant 0 : index
    %359 = vector.load %arg6[%c0_270, %c0_271] : memref<1x128xf32, #tpu.memory_space<vmem>>, vector<1x128xf32>
    %360 = vector.broadcast %359 : vector<1x128xf32> to vector<2x128xf32>
    %361 = arith.addf %358, %360 : vector<2x128xf32>
    %c0_272 = arith.constant 0 : index
    %c0_273 = arith.constant 0 : index
    %362 = vector.load %arg9[%c0_272, %c0_273] : memref<2x128xf32, #tpu.memory_space<vmem>>, vector<2x128xf32>
    tpu.vector_store %arg9[%c0_272, %c0_273], %361 {strides = array<i32>} : memref<2x128xf32, #tpu.memory_space<vmem>>, vector<2x128xf32>,
    return
  }
  func.func @transform_1(%arg0: i32, %arg1: memref<2x4xi32, #tpu.memory_space<smem>>, %arg2: memref<2x4xi32, #tpu.memory_space<smem>>) -> (i32, i32) {
    %c0_i32 = arith.constant 0 : i32
    %c0_i32_0 = arith.constant 0 : i32
    return %arg0, %c0_i32 : i32, i32
  }
  func.func @transform_2(%arg0: i32, %arg1: memref<2x4xi32, #tpu.memory_space<smem>>, %arg2: memref<2x4xi32, #tpu.memory_space<smem>>) -> (i32, i32) {
    %c0_i32 = arith.constant 0 : i32
    %c0_i32_0 = arith.constant 0 : i32
    %c0_i32_1 = arith.constant 0 : i32
    return %c0_i32, %c0_i32_0 : i32, i32
  }
  func.func @transform_3(%arg0: i32, %arg1: memref<2x4xi32, #tpu.memory_space<smem>>, %arg2: memref<2x4xi32, #tpu.memory_space<smem>>) -> (i32, i32) {
    %c0_i32 = arith.constant 0 : i32
    %c0_i32_0 = arith.constant 0 : i32
    %c0_i32_1 = arith.constant 0 : i32
    return %c0_i32, %c0_i32_0 : i32, i32
  }
  func.func @transform_4(%arg0: i32, %arg1: memref<2x4xi32, #tpu.memory_space<smem>>, %arg2: memref<2x4xi32, #tpu.memory_space<smem>>) -> (i32, i32) {
    %c0_i32 = arith.constant 0 : i32
    %c0_i32_0 = arith.constant 0 : i32
    %c0_i32_1 = arith.constant 0 : i32
    return %c0_i32, %c0_i32_0 : i32, i32
  }
  func.func @transform_5(%arg0: i32, %arg1: memref<2x4xi32, #tpu.memory_space<smem>>, %arg2: memref<2x4xi32, #tpu.memory_space<smem>>) -> (i32, i32) {
    %c0_i32 = arith.constant 0 : i32
    %c0_i32_0 = arith.constant 0 : i32
    %c0_i32_1 = arith.constant 0 : i32
    return %c0_i32, %c0_i32_0 : i32, i32
  }
  func.func @transform_6(%arg0: i32, %arg1: memref<2x4xi32, #tpu.memory_space<smem>>, %arg2: memref<2x4xi32, #tpu.memory_space<smem>>) -> (i32, i32) {
    %c0_i32 = arith.constant 0 : i32
    %c0_i32_0 = arith.constant 0 : i32
    return %arg0, %c0_i32 : i32, i32
  }
}

</mosaic_0001>

<bundles_post_ra>
// kernel: tpu_custom_call.1
= control target key start
LH: loop header
LB: loop body
LE: loop exit
PB: predicated region body
PF: predicated region fallthrough
CT: control target
= control target key end

     0   :  { %s4024_s0 = inlined_call_operand.hbm [shape: s32[2,4], index: 0, kind: input, shape index: {}]   ;;  %s4025_s2 = inlined_call_operand.hbm [shape: f32[32,768], index: 2, kind: input, shape index: {}]   ;;  %s4026_s3 = inlined_call_operand.hbm [shape: f32[2,768], index: 3, kind: input, shape index: {}]   ;;  %s4027_s4 = inlined_call_operand.hbm [shape: bf16[2304,128], index: 4, kind: input, shape index: {}]   ;;  %s4028_s5 = inlined_call_operand.vmem [shape: f32[1,128], index: 5, kind: input, shape index: {}]   ;;  %s4029_s6 = inlined_call_operand.vmem [shape: f32[2,4], index: 6, kind: input, shape index: {}]   ;;  %s4030_s7 = inlined_call_operand.vmem [shape: f32[2,4], index: 7, kind: input, shape index: {}]   ;;  %s4031_s8 = inlined_call_operand.hbm [shape: f32[2,128], index: 8, kind: output, shape index: {}]   ;;  %s4032_s1 = inlined_call_operand.vmem [shape: s32[2,4], index: 1, kind: input, shape index: {}]  }
   0x1   :  { %4038 = sst [smem:[#allocation56_spill]] %s4031_s8  ;;  %s2937_s29 = scalar_lea.hbm %s4024_s0, 32 }
   0x2   :  { %p2938_p0 = scmp.ne.s32.totalorder %s4024_s0, %s2937_s29  ;;  %p2941_p1 = scmp.lt.u32.totalorder %s2937_s29, %s4024_s0 }
   0x4   :  { %p2943_p2 = pnand %p2941_p1, %p2938_p0 }
   0x6   :  { %2946 = shalt.err (!%p2943_p2)  }
   0x7   :  { %s3477_s12 = smov [#allocation6]   ;;  %s15_s17 = sshll.u32 %s4032_s1, 4  ;;  %s16_s17 = int_to_ptr.vmem [resolvable:$true] %s15_s17 }
   0x8   :  { %14 = dma.hbm_to_smem %s4024_s0, 32, %s3477_s12, [#allocation5] }
   0x9   :  { %s2947_s18 = scalar_lea.vmem %s16_s17, 32  ;;  %p2952_p4 = scmp.lt.s32.totalorder %s16_s17, %s16_s17 }
   0xa   :  { %p2948_p3 = scmp.ne.s32.totalorder %s16_s17, %s2947_s18  ;;  %p2953_p5 = scmp.lt.s32.totalorder %s2947_s18, %s2947_s18 }
   0xc   :  { %p2954_p6 = por %p2953_p5, %p2952_p4 }
   0xe   :  { %p2955_p7 = pnand %p2954_p6, %p2948_p3 }
  0x10   :  { %2958 = shalt.err (!%p2955_p7)  }
  0x11   :  { %s3478_s19 = smov [#allocation7]  }
  0x12   :  { %18 = dma.vmem_to_smem %s16_s17, 32, %s3478_s19, [#allocation5] }
  0x13   :  { %3433 = dma.done.wait [#allocation5], 64 }
  0x14   :  { %3434 = vsyncadd [#allocation5], 4294967232 }
  0x15   :  { %20 = sfence }
  0x16   :  { %21 = vsyncpa [#allocation9], 0 }
  0x17   :  { %22 = vsyncpa [#allocation13], 0 }
  0x18   :  { %23 = vsyncpa [#allocation11], 0 }
  0x19   :  { %24 = vsyncpa [#allocation16], 0 }
  0x1a   :  { %25 = vsyncpa [#allocation10], 0  ;;  %s3479_s0 = smov [#allocation8]   ;;  %s3480_s20 = smov [#allocation12]  }
  0x1b   :  { %s32_s1 = sshll.u32 %s3479_s0, 4  ;;  %s41_s21 = sshll.u32 %s3480_s20, 4  ;;  %s33_s1 = int_to_ptr.vmem [resolvable:$true] %s32_s1  ;;  %s3565_s21 = int_to_ptr.vmem [resolvable:$true] %s41_s21 }
  0x1c   :  { %s2959_s24 = scalar_lea.hbm %s4026_s3, 192 }
  0x1d   :  { %p2960_p8 = scmp.ne.s32.totalorder %s4026_s3, %s2959_s24  ;;  %p2963_p9 = scmp.lt.u32.totalorder %s2959_s24, %s4026_s3 }
  0x1f   :  { %p2965_p10 = pnand %p2963_p9, %p2960_p8 }
  0x21   :  { %2968 = shalt.err (!%p2965_p10)
}
  0x22   :  { %s2969_s29 = scalar_lea.vmem %s33_s1, 192  ;;  %p2974_p12 = scmp.lt.s32.totalorder %s33_s1, %s33_s1 }
  0x23   :  { %p2970_p11 = scmp.ne.s32.totalorder %s33_s1, %s2969_s29  ;;  %p2975_p13 = scmp.lt.s32.totalorder %s2969_s29, %s2969_s29 }
  0x25   :  { %p2976_p0 = por %p2975_p13, %p2974_p12 }
  0x27   :  { %p2977_p1 = pnand %p2976_p0, %p2970_p11 }
  0x29   :  { %2980 = shalt.err (!%p2977_p1)
}
  0x2a   :  { %35 = dma.hbm_to_vmem [thread:$0]  %s4026_s3, 192, %s33_s1, [#allocation9]  }
  0x2b   :  { %s2981_s12 = scalar_lea.hbm %s4027_s4, 18432 }
  0x2c   :  { %p2982_p2 = scmp.ne.s32.totalorder %s4027_s4, %s2981_s12  ;;  %p2985_p3 = scmp.lt.u32.totalorder %s2981_s12, %s4027_s4 }
  0x2e   :  { %p2987_p4 = pnand %p2985_p3, %p2982_p2 }
  0x30   :  { %2990 = shalt.err (!%p2987_p4)
}
  0x31   :  { %s2991_s17 = scalar_lea.vmem %s3565_s21, 18432  ;;  %p2996_p6 = scmp.lt.s32.totalorder %s3565_s21, %s3565_s21 }
  0x32   :  { %p2992_p5 = scmp.ne.s32.totalorder %s3565_s21, %s2991_s17  ;;  %p2997_p7 = scmp.lt.s32.totalorder %s2991_s17, %s2991_s17 }
  0x34   :  { %p2998_p8 = por %p2997_p7, %p2996_p6 }
  0x36   :  { %p2999_p9 = pnand %p2998_p8, %p2992_p5 }
  0x38   :  { %3002 = shalt.err (!%p2999_p9)
}
  0x39   :  { %s3481_s3 = smov 64   ;;  %s3482_s18 = smov 4  }
  0x3a   :  { %47 = dma.hbm_to_vmem [thread:$0]  %s4027_s4, 18432, %s3565_s21, [#allocation13], %s3481_s3, %s3481_s3, %s3482_s18  }
  0x3b   :  { %s56_s22 = sshll.u32 %s4029_s6, 4  ;;  %s66_s25 = sshll.u32 %s4030_s7, 4  ;;  %s57_s22 = int_to_ptr.vmem [resolvable:$true] %s56_s22  ;;  %s67_s25 = int_to_ptr.vmem [resolvable:$true] %s66_s25 }
  0x3c   :  { %s3003_s26 = scalar_lea.vmem %s57_s22, 32  ;;  %p3008_p11 = scmp.lt.s32.totalorder %s57_s22, %s57_s22 }
  0x3d   :  { %p3004_p10 = scmp.ne.s32.totalorder %s57_s22, %s3003_s26  ;;  %p3009_p12 = scmp.lt.s32.totalorder %s3003_s26, %s3003_s26 }
  0x3f   :  { %p3010_p13 = por %p3009_p12, %p3008_p11 }
  0x41   :  { %p3011_p0 = pnand %p3010_p13, %p3004_p10 }
  0x43   :  { %3014 = shalt.err (!%p3011_p0)
}
  0x44   :  { %s3483_s27 = smov [#allocation14]   ;;  %s3015_s4 = scalar_lea.vmem %s67_s25, 32 }
  0x45   :  { %59 = dma.vmem_to_smem %s57_s22, 32, %s3483_s27, [#allocation11]  }
  0x46   :  { %p3016_p1 = scmp.ne.s32.totalorder %s67_s25, %s3015_s4  ;;  %p3020_p2 = scmp.lt.s32.totalorder %s67_s25, %s67_s25 }
  0x47   :  { %p3021_p3 = scmp.lt.s32.totalorder %s3015_s4, %s3015_s4 }
  0x49   :  { %p3022_p4 = por %p3021_p3, %p3020_p2 }
  0x4b   :  { %p3023_p5 = pnand %p3022_p4, %p3016_p1 }
  0x4d   :  { %3026 = shalt.err (!%p3023_p5)
}
  0x4e   :  { %s3484_s6 = smov [#allocation15]  }
  0x4f   :  { %69 = dma.vmem_to_smem %s67_s25, 32, %s3484_s6, [#allocation16]  }
  0x50   :  { %3435 = dma.done.wait [#allocation9], 192  }
  0x51   :  { %3436 = vsyncadd [#allocation9], 4294967104 }
  0x52   :  { %3437 = dma.done.wait [#allocation13], 18432  }
  0x53   :  { %3438 = vsyncadd [#allocation13], 4294948864 }
  0x54   :  { %3439 = dma.done.wait [#allocation11], 32  }
  0x55   :  { %3440 = vsyncadd [#allocation11], 4294967264 }
  0x56   :  { %3441 = dma.done.wait [#allocation16], 32  }
  0x57   :  { %3442 = vsyncadd [#allocation16], 4294967264 }
  0x58   :  { %82 = sfence }
  0x59   :  { %s87_s7 = sld [smem:[#allocation6]]  ;;  %v366_v0 = vld [vmem:[#allocation8] sm:$0xff]  ;;  %v367_v1 = vld [vmem:[#allocation8 + $0x8] sm:$0xf]  ;;  %s3485_s21 = smov [#allocation2]  }
  0x5a   :  { %s98_s28 = sshll.u32 %s3485_s21, 4  ;;  %368 = vst [vmem:[#allocation3] sm:$0xff] %v366_v0  ;;  %369 = vst [vmem:[#allocation3 + $0x8] sm:$0xf] %v367_v1  ;;  %s3604_s29 = sld [smem:[#allocation7]]  ;;  %s3602_s28 = int_to_ptr.vmem [resolvable:$true] %s98_s28 }
  0x5b   :  { %s3486_s30 = smov [#allocation2 + $0x4]   ;;  %s3606_s10 = sld [smem:[#allocation6 + $0x1]] }
  0x5c   :  { %s111_s9 = sshll.u32 %s3486_s30, 4  ;;  %s3487_s14 = smov [#allocation2 + $0x1]   ;;  %s3608_s9 = int_to_ptr.vmem [resolvable:$true] %s111_s9 }
  0x5d   :  { %s129_s15 = sshll.u32 %s3487_s14, 4  ;;  %s3612_s16 = sld [smem:[#allocation7 + $0x1]]  ;;  %s3610_s15 = int_to_ptr.vmem [resolvable:$true] %s129_s15 }
  0x5e   :  { %s3622_s26 = scalar_lea.hbm %s4025_s2, 3072 }
  0x5f   :  { %s91_s11 = sshrl.u32 %s87_s7, 3  ;;  %s92_s12 = sand.u32 7, %s87_s7  }
  0x60   :  { %s93_s13 = smul.u32 48, %s91_s11  ;;  %s102_s3 = sshrl.u32 %s3604_s29, 3 }
  0x61   :  { %s103_s19 = sand.u32 7, %s3604_s29   ;;  %s104_s22 = smul.u32 48, %s102_s3 }
  0x62   :  { %s94_s17 = sadd.s32 %s93_s13, %s92_s12 }
  0x63   :  { %s2357_s18 = sshll.u32 %s94_s17, 4 }
  0x64   :  { %s96_s20 = scalar_lea.hbm %s4025_s2, %s2357_s18 }
  0x65   :  { %s3027_s23 = scalar_lea.hbm %s96_s20, 96  ;;  %p3030_p7 = scmp.lt.u32.totalorder %s96_s20, %s4025_s2 }
  0x66   :  { %p3028_p6 = scmp.ne.s32.totalorder %s96_s20, %s3027_s23  ;;  %p3031_p8 = scmp.lt.u32.totalorder %s3622_s26, %s3027_s23 }
  0x67   :  { %p3033_p10 = scmp.lt.u32.totalorder %s3027_s23, %s96_s20 }
  0x68   :  { %p3032_p9 = por %p3031_p8, %p3030_p7 }
  0x6a   :  { %p3034_p11 = por %p3033_p10, %p3032_p9 }
  0x6c   :  { %p3035_p12 = pnand %p3034_p11, %p3028_p6 }
  0x6e   :  { %3038 = shalt.err (!%p3035_p12)  }
  0x6f   :  { %s3039_s6 = scalar_lea.vmem %s3602_s28, 96  ;;  %s3631_s7 = scalar_lea.vmem %s3602_s28, 1536 }
  0x70   :  { %p3040_p13 = scmp.ne.s32.totalorder %s3602_s28, %s3039_s6  ;;  %p3044_p0 = scmp.lt.s32.totalorder %s3602_s28, %s3602_s28 }
  0x71   :  { %p3045_p1 = scmp.lt.s32.totalorder %s3631_s7, %s3039_s6 }
  0x73   :  { %p3046_p2 = por %p3045_p1, %p3044_p0 }
  0x75   :  { %p3047_p3 = pnand %p3046_p2, %p3040_p13 }
  0x77   :  { %3050 = shalt.err (!%p3047_p3)  }
  0x78   :  { %s4033_s21 = smov 128   ;;  %s4035_s29 = smov 1  }
  0x79   :  { %101 = dma.hbm_to_vmem [thread:$0]  %s96_s20, 96, %s3602_s28, [#allocation4], %s4033_s21, %s4033_s21, %s4035_s29 }
  0x7a   :  { %s105_s30 = sadd.s32 %s104_s22, %s103_s19  ;;  %s120_s11 = sshrl.u32 %s3606_s10, 3 }
  0x7b   :  { %s2358_s12 = sshll.u32 %s105_s30, 4  ;;  %s121_s13 = sand.u32 7, %s3606_s10  }
  0x7c   :  { %s107_s3 = scalar_lea.hbm %s4025_s2, %s2358_s12  ;;  %s122_s18 = smul.u32 48, %s120_s11 }
  0x7d   :  { %s3051_s0 = scalar_lea.hbm %s107_s3, 96  ;;  %p3054_p5 = scmp.lt.u32.totalorder %s107_s3, %s4025_s2 }
  0x7e   :  { %p3052_p4 = scmp.ne.s32.totalorder %s107_s3, %s3051_s0  ;;  %p3055_p6 = scmp.lt.u32.totalorder %s3622_s26, %s3051_s0 }
  0x7f   :  { %p3057_p8 = scmp.lt.u32.totalorder %s3051_s0, %s107_s3 }
  0x80   :  { %p3056_p7 = por %p3055_p6, %p3054_p5 }
  0x82   :  { %p3058_p9 = por %p3057_p8, %p3056_p7 }
  0x84   :  { %p3059_p10 = pnand %p3058_p9, %p3052_p4 }
  0x86   :  { %3062 = shalt.err (!%p3059_p10)  }
  0x87   :  { %s3063_s10 = scalar_lea.vmem %s3608_s9, 96  ;;  %p3068_p12 = scmp.lt.s32.totalorder %s3608_s9, %s3602_s28 }
  0x88   :  { %p3064_p11 = scmp.ne.s32.totalorder %s3608_s9, %s3063_s10  ;;  %p3069_p13 = scmp.lt.s32.totalorder %s3631_s7, %s3063_s10 }
  0x8a   :  { %p3070_p0 = por %p3069_p13, %p3068_p12 }
  0x8c   :  { %p3071_p1 = pnand %p3070_p0, %p3064_p11 }
  0x8e   :  { %3074 = shalt.err (!%p3071_p1)  }
  0x8f   :  { %114 = dma.hbm_to_vmem [thread:$0]  %s107_s3, 96, %s3608_s9, [#allocation4 + $0x4], %s4033_s21, %s4033_s21, %s4035_s29 }
  0x90   :  { %s123_s19 = sadd.s32 %s122_s18, %s121_s13  ;;  %s133_s20 = sshrl.u32 %s3612_s16, 3 }
  0x91   :  { %s2361_s22 = sshll.u32 %s123_s19, 4  ;;  %s134_s24 = sand.u32 7, %s3612_s16  }
  0x92   :  { %s125_s4 = scalar_lea.hbm %s4025_s2, %s2361_s22  ;;  %s135_s6 = smul.u32 48, %s133_s20 }
  0x93   :  { %s3075_s30 = scalar_lea.hbm %s125_s4, 96  ;;  %p3078_p3 = scmp.lt.u32.totalorder %s125_s4, %s4025_s2 }
  0x94   :  { %p3076_p2 = scmp.ne.s32.totalorder %s125_s4, %s3075_s30  ;;  %p3079_p4 = scmp.lt.u32.totalorder %s3622_s26, %s3075_s30 }
  0x95   :  { %p3081_p6 = scmp.lt.u32.totalorder %s3075_s30, %s125_s4 }
  0x96   :  { %p3080_p5 = por %p3079_p4, %p3078_p3 }
  0x98   :  { %p3082_p7 = por %p3081_p6, %p3080_p5 }
  0x9a   :  { %p3083_p8 = pnand %p3082_p7, %p3076_p2 }
  0x9c   :  { %3086 = shalt.err (!%p3083_p8)  }
  0x9d   :  { %s3087_s9 = scalar_lea.vmem %s3610_s15, 96  ;;  %p3092_p10 = scmp.lt.s32.totalorder %s3610_s15, %s3602_s28 }
  0x9e   :  { %p3088_p9 = scmp.ne.s32.totalorder %s3610_s15, %s3087_s9  ;;  %p3093_p11 = scmp.lt.s32.totalorder %s3631_s7, %s3087_s9 }
  0xa0   :  { %p3094_p12 = por %p3093_p11, %p3092_p10 }
  0xa2   :  { %p3095_p13 = pnand %p3094_p12, %p3088_p9 }
  0xa4   :  { %3098 = shalt.err (!%p3095_p13)  }
  0xa5   :  { %132 = dma.hbm_to_vmem [thread:$0]  %s125_s4, 96, %s3610_s15, [#allocation4 + $0x1], %s4033_s21, %s4033_s21, %s4035_s29 }
  0xa6   :  { %s136_s16 = sadd.s32 %s135_s6, %s134_s24  ;;  %s3490_s14 = smov [#allocation2 + $0x5]  }
  0xa7   :  { %s2362_s13 = sshll.u32 %s136_s16, 4  ;;  %s142_s17 = sshll.u32 %s3490_s14, 4  ;;  %s143_s17 = int_to_ptr.vmem [resolvable:$true] %s142_s17 }
  0xa8   :  { %s138_s0 = scalar_lea.hbm %s4025_s2, %s2362_s13 }
  0xa9   :  { %s3099_s1 = scalar_lea.hbm %s138_s0, 96  ;;  %p3102_p1 = scmp.lt.u32.totalorder %s138_s0, %s4025_s2 }
  0xaa   :  { %p3100_p0 = scmp.ne.s32.totalorder %s138_s0, %s3099_s1  ;;  %p3103_p2 = scmp.lt.u32.totalorder %s3622_s26, %s3099_s1 }
  0xab   :  { %p3105_p4 = scmp.lt.u32.totalorder %s3099_s1, %s138_s0 }
  0xac   :  { %p3104_p3 = por %p3103_p2, %p3102_p1 }
  0xae   :  { %p3106_p5 = por %p3105_p4, %p3104_p3 }
  0xb0   :  { %p3107_p6 = pnand %p3106_p5, %p3100_p0 }
  0xb2   :  { %3110 = shalt.err (!%p3107_p6)  }
  0xb3   :  { %s3111_s15 = scalar_lea.vmem %s143_s17, 96  ;;  %p3116_p8 = scmp.lt.s32.totalorder %s143_s17, %s3602_s28 }
  0xb4   :  { %p3112_p7 = scmp.ne.s32.totalorder %s143_s17, %s3111_s15  ;;  %p3117_p9 = scmp.lt.s32.totalorder %s3631_s7, %s3111_s15 }
  0xb6   :  { %p3118_p10 = por %p3117_p9, %p3116_p8 }
  0xb8   :  { %p3119_p11 = pnand %p3118_p10, %p3112_p7 }
  0xba   :  { %3122 = shalt.err (!%p3119_p11)  }
  0xbb   :  { %145 = dma.hbm_to_vmem [thread:$0]  %s138_s0, 96, %s143_s17, [#allocation4 + $0x5], %s4033_s21, %s4033_s21, %s4035_s29 }
  0xbc   :  { %s2363_s19 = sld [smem:[#allocation6 + $0x2]]  ;;  %s3491_s20 = smov [#allocation2 + $0x2]  }
  0xbd   :  { %s160_s22 = sshll.u32 %s3491_s20, 4  ;;  %s2364_s24 = sld [smem:[#allocation7 + $0x2]]  ;;  %s3688_s22 = int_to_ptr.vmem [resolvable:$true] %s160_s22 }
  0xbe   :  { %s3492_s25 = smov [#allocation2 + $0x6]   ;;  %s3690_s4 = sld [smem:[#allocation6 + $0x3]] }
  0xbf   :  { %s173_s27 = sshll.u32 %s3492_s25, 4  ;;  %s3493_s6 = smov [#allocation2 + $0x3]   ;;  %s3692_s27 = int_to_ptr.vmem [resolvable:$true] %s173_s27 }
  0xc0   :  { %s3694_s30 = sshll.u32 %s3493_s6, 4  ;;  %s3696_s11 = sld [smem:[#allocation7 + $0x3]]  ;;  %s192_s30 = int_to_ptr.vmem [resolvable:$true] %s3694_s30 }
  0xc2   :  { %s151_s12 = sshrl.u32 %s2363_s19, 3  ;;  %s152_s9 = sand.u32 7, %s2363_s19  }
  0xc3   :  { %s153_s16 = smul.u32 48, %s151_s12  ;;  %s164_s13 = sshrl.u32 %s2364_s24, 3 }
  0xc4   :  { %s165_s14 = sand.u32 7, %s2364_s24   ;;  %s166_s17 = smul.u32 48, %s164_s13 }
  0xc5   :  { %s154_s3 = sadd.s32 %s153_s16, %s152_s9  ;;  %s182_s18 = sshrl.u32 %s3690_s4, 3 }
  0xc6   :  { %s2365_s0 = sshll.u32 %s154_s3, 4  ;;  %s167_s1 = sadd.s32 %s166_s17, %s165_s14 }
  0xc7   :  { %s156_s15 = scalar_lea.hbm %s4025_s2, %s2365_s0  ;;  %s2366_s20 = sshll.u32 %s167_s1, 4 }
  0xc8   :  { %s3123_s25 = scalar_lea.hbm %s156_s15, 96  ;;  %p3126_p13 = scmp.lt.u32.totalorder %s156_s15, %s4025_s2 }
  0xc9   :  { %p3124_p12 = scmp.ne.s32.totalorder %s156_s15, %s3123_s25  ;;  %p3127_p0 = scmp.lt.u32.totalorder %s3622_s26, %s3123_s25 }
  0xca   :  { %p3129_p2 = scmp.lt.u32.totalorder %s3123_s25, %s156_s15 }
  0xcb   :  { %p3128_p1 = por %p3127_p0, %p3126_p13 }
  0xcd   :  { %p3130_p3 = por %p3129_p2, %p3128_p1 }
  0xcf   :  { %p3131_p4 = pnand %p3130_p3, %p3124_p12 }
  0xd1   :  { %3134 = shalt.err (!%p3131_p4)  }
  0xd2   :  { %s3135_s19 = scalar_lea.vmem %s3688_s22, 96  ;;  %p3140_p6 = scmp.lt.s32.totalorder %s3688_s22, %s3602_s28 }
  0xd3   :  { %p3136_p5 = scmp.ne.s32.totalorder %s3688_s22, %s3135_s19  ;;  %p3141_p7 = scmp.lt.s32.totalorder %s3631_s7, %s3135_s19 }
  0xd5   :  { %p3142_p8 = por %p3141_p7, %p3140_p6 }
  0xd7   :  { %p3143_p9 = pnand %p3142_p8, %p3136_p5 }
  0xd9   :  { %3146 = shalt.err (!%p3143_p9)  }
  0xda   :  { %s4039_s21 = smov 128   ;;  %s169_s9 = scalar_lea.hbm %s4025_s2, %s2366_s20 }
  0xdb   :  { %163 = dma.hbm_to_vmem [thread:$0]  %s156_s15, 96, %s3688_s22, [#allocation4 + $0x2], %s4039_s21, %s4039_s21, %s4035_s29 }
  0xdc   :  { %s183_s16 = sand.u32 7, %s3690_s4   ;;  %s3147_s13 = scalar_lea.hbm %s169_s9, 96 }
  0xdd   :  { %p3148_p10 = scmp.ne.s32.totalorder %s169_s9, %s3147_s13  ;;  %p3150_p11 = scmp.lt.u32.totalorder %s169_s9, %s4025_s2 }
  0xde   :  { %p3151_p12 = scmp.lt.u32.totalorder %s3622_s26, %s3147_s13  ;;  %p3153_p0 = scmp.lt.u32.totalorder %s3147_s13, %s169_s9 }
  0xe0   :  { %p3152_p13 = por %p3151_p12, %p3150_p11 }
  0xe2   :  { %p3154_p1 = por %p3153_p0, %p3152_p13 }
  0xe4   :  { %p3155_p2 = pnand %p3154_p1, %p3148_p10 }
  0xe6   :  { %3158 = shalt.err (!%p3155_p2)  }
  0xe7   :  { %s3159_s22 = scalar_lea.vmem %s3692_s27, 96  ;;  %p3164_p4 = scmp.lt.s32.totalorder %s3692_s27, %s3602_s28 }
  0xe8   :  { %p3160_p3 = scmp.ne.s32.totalorder %s3692_s27, %s3159_s22  ;;  %p3165_p5 = scmp.lt.s32.totalorder %s3631_s7, %s3159_s22 }
  0xea   :  { %p3166_p6 = por %p3165_p5, %p3164_p4 }
  0xec   :  { %p3167_p7 = pnand %p3166_p6, %p3160_p3 }
  0xee   :  { %3170 = shalt.err (!%p3167_p7)  }
  0xef   :  { %176 = dma.hbm_to_vmem [thread:$0]  %s169_s9, 96, %s3692_s27, [#allocation4 + $0x6], %s4039_s21, %s4039_s21, %s4035_s29 }
  0xf0   :  { %s184_s3 = smul.u32 48, %s182_s18  ;;  %s195_s0 = sshrl.u32 %s3696_s11, 3 }
  0xf1   :  { %s196_s1 = sand.u32 7, %s3696_s11   ;;  %s197_s10 = smul.u32 48, %s195_s0 }
  0xf2   :  { %s185_s23 = sadd.s32 %s184_s3, %s183_s16 }
  0xf3   :  { %s2369_s15 = sshll.u32 %s185_s23, 4  ;;  %s198_s19 = sadd.s32 %s197_s10, %s196_s1 }
  0xf4   :  { %s187_s6 = scalar_lea.hbm %s4025_s2, %s2369_s15 }
  0xf5   :  { %s3171_s24 = scalar_lea.hbm %s187_s6, 96  ;;  %p3174_p9 = scmp.lt.u32.totalorder %s187_s6, %s4025_s2 }
  0xf6   :  { %p3172_p8 = scmp.ne.s32.totalorder %s187_s6, %s3171_s24  ;;  %p3175_p10 = scmp.lt.u32.totalorder %s3622_s26, %s3171_s24 }
  0xf7   :  { %p3177_p12 = scmp.lt.u32.totalorder %s3171_s24, %s187_s6 }
  0xf8   :  { %p3176_p11 = por %p3175_p10, %p3174_p9 }
  0xfa   :  { %p3178_p13 = por %p3177_p12, %p3176_p11 }
  0xfc   :  { %p3179_p0 = pnand %p3178_p13, %p3172_p8 }
  0xfe   :  { %3182 = shalt.err (!%p3179_p0)  }
  0xff   :  { %s3183_s27 = scalar_lea.vmem %s192_s30, 96  ;;  %p3188_p2 = scmp.lt.s32.totalorder %s192_s30, %s3602_s28 }
 0x100   :  { %p3184_p1 = scmp.ne.s32.totalorder %s192_s30, %s3183_s27  ;;  %p3189_p3 = scmp.lt.s32.totalorder %s3631_s7, %s3183_s27 }
 0x102   :  { %p3190_p4 = por %p3189_p3, %p3188_p2 }
 0x104   :  { %p3191_p5 = pnand %p3190_p4, %p3184_p1 }
 0x106   :  { %3194 = shalt.err (!%p3191_p5)  }
 0x107   :  { %194 = dma.hbm_to_vmem [thread:$0]  %s187_s6, 96, %s192_s30, [#allocation4 + $0x3], %s4039_s21, %s4039_s21, %s4035_s29 }
 0x108   :  { %s2370_s4 = sshll.u32 %s198_s19, 4  ;;  %s3494_s11 = smov [#allocation2 + $0x7]  }
 0x109   :  { %s204_s18 = sshll.u32 %s3494_s11, 4  ;;  %s200_s14 = scalar_lea.hbm %s4025_s2, %s2370_s4  ;;  %s205_s18 = int_to_ptr.vmem [resolvable:$true] %s204_s18 }
 0x10a   :  { %s3195_s17 = scalar_lea.hbm %s200_s14, 96  ;;  %p3198_p7 = scmp.lt.u32.totalorder %s200_s14, %s4025_s2 }
 0x10b   :  { %p3196_p6 = scmp.ne.s32.totalorder %s200_s14, %s3195_s17  ;;  %p3199_p8 = scmp.lt.u32.totalorder %s3622_s26, %s3195_s17 }
 0x10c   :  { %p3201_p10 = scmp.lt.u32.totalorder %s3195_s17, %s200_s14 }
 0x10d   :  { %p3200_p9 = por %p3199_p8, %p3198_p7 }
 0x10f   :  { %p3202_p11 = por %p3201_p10, %p3200_p9 }
 0x111   :  { %p3203_p12 = pnand %p3202_p11, %p3196_p6 }
 0x113   :  { %3206 = shalt.err (!%p3203_p12)  }
 0x114   :  { %s3207_s30 = scalar_lea.vmem %s205_s18, 96  ;;  %p3212_p0 = scmp.lt.s32.totalorder %s205_s18, %s3602_s28 }
 0x115   :  { %p3208_p13 = scmp.ne.s32.totalorder %s205_s18, %s3207_s30  ;;  %p3213_p1 = scmp.lt.s32.totalorder %s3631_s7, %s3207_s30 }
 0x117   :  { %p3214_p2 = por %p3213_p1, %p3212_p0 }
 0x119   :  { %p3215_p3 = pnand %p3214_p2, %p3208_p13 }
 0x11b   :  { %3218 = shalt.err (!%p3215_p3)  }
 0x11c   :  { %207 = dma.hbm_to_vmem [thread:$0]  %s200_s14, 96, %s205_s18, [#allocation4 + $0x7], %s4039_s21, %s4039_s21, %s4035_s29 }
 0x11d   :  { %s2371_s0 = sld [smem:[#allocation6 + $0x80]]  ;;  %s3495_s1 = smov [#allocation2 + $0x30]  }
 0x11e   :  { %s224_s23 = sshll.u32 %s3495_s1, 4  ;;  %s2372_s10 = sld [smem:[#allocation7 + $0x80]]  ;;  %s3761_s23 = int_to_ptr.vmem [resolvable:$true] %s224_s23 }
 0x11f   :  { %s3496_s15 = smov [#allocation2 + $0x34]   ;;  %s3763_s25 = sld [smem:[#allocation6 + $0x81]] }
 0x120   :  { %s237_s20 = sshll.u32 %s3496_s15, 4  ;;  %s3497_s6 = smov [#allocation2 + $0x31]   ;;  %s3765_s20 = int_to_ptr.vmem [resolvable:$true] %s237_s20 }
 0x121   :  { %s255_s19 = sshll.u32 %s3497_s6, 4  ;;  %s3767_s24 = sld [smem:[#allocation7 + $0x81]]  ;;  %s3769_s19 = int_to_ptr.vmem [resolvable:$true] %s255_s19 }
 0x123   :  { %s212_s12 = sadd.s32 16, %s2371_s0 }
 0x124   :  { %s215_s13 = sshrl.u32 %s212_s12, 3  ;;  %s216_s27 = sand.u32 7, %s212_s12  }
 0x125   :  { %s217_s4 = smul.u32 48, %s215_s13  ;;  %s214_s11 = sadd.s32 16, %s2372_s10 }
 0x126   :  { %s228_s18 = sshrl.u32 %s214_s11, 3  ;;  %s229_s9 = sand.u32 7, %s214_s11  }
 0x127   :  { %s218_s16 = sadd.s32 %s217_s4, %s216_s27  ;;  %s230_s14 = smul.u32 48, %s228_s18 }
 0x128   :  { %s2373_s17 = sshll.u32 %s218_s16, 4  ;;  %s243_s22 = sadd.s32 16, %s3763_s25 }
 0x129   :  { %s220_s1 = scalar_lea.hbm %s4025_s2, %s2373_s17  ;;  %s231_s15 = sadd.s32 %s230_s14, %s229_s9 }
 0x12a   :  { %s3219_s6 = scalar_lea.hbm %s220_s1, 96  ;;  %p3222_p5 = scmp.lt.u32.totalorder %s220_s1, %s4025_s2 }
 0x12b   :  { %p3220_p4 = scmp.ne.s32.totalorder %s220_s1, %s3219_s6  ;;  %p3223_p6 = scmp.lt.u32.totalorder %s3622_s26, %s3219_s6 }
 0x12c   :  { %p3225_p8 = scmp.lt.u32.totalorder %s3219_s6, %s220_s1 }
 0x12d   :  { %p3224_p7 = por %p3223_p6, %p3222_p5 }
 0x12f   :  { %p3226_p9 = por %p3225_p8, %p3224_p7 }
 0x131   :  { %p3227_p10 = pnand %p3226_p9, %p3220_p4 }
 0x133   :  { %3230 = shalt.err (!%p3227_p10)  }
 0x134   :  { %s3231_s10 = scalar_lea.vmem %s3761_s23, 96  ;;  %p3236_p12 = scmp.lt.s32.totalorder %s3761_s23, %s3602_s28 }
 0x135   :  { %p3232_p11 = scmp.ne.s32.totalorder %s3761_s23, %s3231_s10  ;;  %p3237_p13 = scmp.lt.s32.totalorder %s3631_s7, %s3231_s10 }
 0x137   :  { %p3238_p0 = por %p3237_p13, %p3236_p12 }
 0x139   :  { %p3239_p1 = pnand %p3238_p0, %p3232_p11 }
 0x13b   :  { %3242 = shalt.err (!%p3239_p1)  }
 0x13c   :  { %s4040_s29 = smov 1   ;;  %s2374_s25 = sshll.u32 %s231_s15, 4 }
 0x13d   :  { %227 = dma.hbm_to_vmem [thread:$0]  %s220_s1, 96, %s3761_s23, [#allocation4 + $0x8], %s4039_s21, %s4039_s21, %s4040_s29 }
 0x13e   :  { %s246_s12 = sshrl.u32 %s243_s22, 3  ;;  %s233_s4 = scalar_lea.hbm %s4025_s2, %s2374_s25 }
 0x13f   :  { %s247_s11 = sand.u32 7, %s243_s22   ;;  %s3243_s18 = scalar_lea.hbm %s233_s4, 96 }
 0x140   :  { %p3244_p2 = scmp.ne.s32.totalorder %s233_s4, %s3243_s18  ;;  %p3246_p3 = scmp.lt.u32.totalorder %s233_s4, %s4025_s2 }
 0x141   :  { %p3247_p4 = scmp.lt.u32.totalorder %s3622_s26, %s3243_s18  ;;  %p3249_p6 = scmp.lt.u32.totalorder %s3243_s18, %s233_s4 }
 0x143   :  { %p3248_p5 = por %p3247_p4, %p3246_p3 }
 0x145   :  { %p3250_p7 = por %p3249_p6, %p3248_p5 }
 0x147   :  { %p3251_p8 = pnand %p3250_p7, %p3244_p2 }
 0x149   :  { %3254 = shalt.err (!%p3251_p8)  }
 0x14a   :  { %s3255_s23 = scalar_lea.vmem %s3765_s20, 96  ;;  %p3260_p10 = scmp.lt.s32.totalorder %s3765_s20, %s3602_s28 }
 0x14b   :  { %p3256_p9 = scmp.ne.s32.totalorder %s3765_s20, %s3255_s23  ;;  %p3261_p11 = scmp.lt.s32.totalorder %s3631_s7, %s3255_s23 }
 0x14d   :  { %p3262_p12 = por %p3261_p11, %p3260_p10 }
 0x14f   :  { %p3263_p13 = pnand %p3262_p12, %p3256_p9 }
 0x151   :  { %3266 = shalt.err (!%p3263_p13)  }
 0x152   :  { %240 = dma.hbm_to_vmem [thread:$0]  %s233_s4, 96, %s3765_s20, [#allocation4 + $0xc], %s4039_s21, %s4039_s21, %s4040_s29 }
 0x153   :  { %s248_s14 = smul.u32 48, %s246_s12  ;;  %s245_s17 = sadd.s32 16, %s3767_s24 }
 0x154   :  { %s259_s22 = sshrl.u32 %s245_s17, 3  ;;  %s260_s3 = sand.u32 7, %s245_s17  }
 0x155   :  { %s249_s30 = sadd.s32 %s248_s14, %s247_s11  ;;  %s261_s1 = smul.u32 48, %s259_s22 }
 0x156   :  { %s2377_s15 = sshll.u32 %s249_s30, 4 }
 0x157   :  { %s251_s10 = scalar_lea.hbm %s4025_s2, %s2377_s15  ;;  %s262_s25 = sadd.s32 %s261_s1, %s260_s3 }
 0x158   :  { %s3267_s13 = scalar_lea.hbm %s251_s10, 96  ;;  %p3270_p1 = scmp.lt.u32.totalorder %s251_s10, %s4025_s2 }
 0x159   :  { %p3268_p0 = scmp.ne.s32.totalorder %s251_s10, %s3267_s13  ;;  %p3271_p2 = scmp.lt.u32.totalorder %s3622_s26, %s3267_s13 }
 0x15a   :  { %p3273_p4 = scmp.lt.u32.totalorder %s3267_s13, %s251_s10 }
 0x15b   :  { %p3272_p3 = por %p3271_p2, %p3270_p1 }
 0x15d   :  { %p3274_p5 = por %p3273_p4, %p3272_p3 }
 0x15f   :  { %p3275_p6 = pnand %p3274_p5, %p3268_p0 }
 0x161   :  { %3278 = shalt.err (!%p3275_p6)  }
 0x162   :  { %s3279_s20 = scalar_lea.vmem %s3769_s19, 96  ;;  %p3284_p8 = scmp.lt.s32.totalorder %s3769_s19, %s3602_s28 }
 0x163   :  { %p3280_p7 = scmp.ne.s32.totalorder %s3769_s19, %s3279_s20  ;;  %p3285_p9 = scmp.lt.s32.totalorder %s3631_s7, %s3279_s20 }
 0x165   :  { %p3286_p10 = por %p3285_p9, %p3284_p8 }
 0x167   :  { %p3287_p11 = pnand %p3286_p10, %p3280_p7 }
 0x169   :  { %3290 = shalt.err (!%p3287_p11)  }
 0x16a   :  { %258 = dma.hbm_to_vmem [thread:$0]  %s251_s10, 96, %s3769_s19, [#allocation4 + $0x9], %s4039_s21, %s4039_s21, %s4040_s29 }
 0x16b   :  { %s2378_s24 = sshll.u32 %s262_s25, 4  ;;  %s3498_s12 = smov [#allocation2 + $0x35]  }
 0x16c   :  { %s268_s4 = sshll.u32 %s3498_s12, 4  ;;  %s264_s16 = scalar_lea.hbm %s4025_s2, %s2378_s24  ;;  %s269_s4 = int_to_ptr.vmem [resolvable:$true] %s268_s4 }
 0x16d   :  { %s3291_s23 = scalar_lea.hbm %s264_s16, 96  ;;  %p3294_p13 = scmp.lt.u32.totalorder %s264_s16, %s4025_s2 }
 0x16e   :  { %p3292_p12 = scmp.ne.s32.totalorder %s264_s16, %s3291_s23  ;;  %p3295_p0 = scmp.lt.u32.totalorder %s3622_s26, %s3291_s23 }
 0x16f   :  { %p3297_p2 = scmp.lt.u32.totalorder %s3291_s23, %s264_s16 }
 0x170   :  { %p3296_p1 = por %p3295_p0, %p3294_p13 }
 0x172   :  { %p3298_p3 = por %p3297_p2, %p3296_p1 }
 0x174   :  { %p3299_p4 = pnand %p3298_p3, %p3292_p12 }
 0x176   :  { %3302 = shalt.err (!%p3299_p4)  }
 0x177   :  { %s3303_s19 = scalar_lea.vmem %s269_s4, 96  ;;  %p3308_p6 = scmp.lt.s32.totalorder %s269_s4, %s3602_s28 }
 0x178   :  { %p3304_p5 = scmp.ne.s32.totalorder %s269_s4, %s3303_s19  ;;  %p3309_p7 = scmp.lt.s32.totalorder %s3631_s7, %s3303_s19 }
 0x17a   :  { %p3310_p8 = por %p3309_p7, %p3308_p6 }
 0x17c   :  { %p3311_p9 = pnand %p3310_p8, %p3304_p5 }
 0x17e   :  { %3314 = shalt.err (!%p3311_p9)  }
 0x17f   :  { %271 = dma.hbm_to_vmem [thread:$0]  %s264_s16, 96, %s269_s4, [#allocation4 + $0xd], %s4039_s21, %s4039_s21, %s4040_s29 }
 0x180   :  { %s2379_s22 = sld [smem:[#allocation6 + $0x82]]  ;;  %s3499_s3 = smov [#allocation2 + $0x32]  }
 0x181   :  { %s286_s30 = sshll.u32 %s3499_s3, 4  ;;  %s2380_s1 = sld [smem:[#allocation7 + $0x82]]  ;;  %s3833_s30 = int_to_ptr.vmem [resolvable:$true] %s286_s30 }
 0x182   :  { %s3500_s15 = smov [#allocation2 + $0x36]   ;;  %s3835_s0 = sld [smem:[#allocation6 + $0x83]] }
 0x183   :  { %s299_s6 = sshll.u32 %s3500_s15, 4  ;;  %s3501_s10 = smov [#allocation2 + $0x33]   ;;  %s3837_s6 = int_to_ptr.vmem [resolvable:$true] %s299_s6 }
 0x184   :  { %s317_s25 = sshll.u32 %s3501_s10, 4  ;;  %s3839_s13 = sld [smem:[#allocation7 + $0x83]]  ;;  %s3841_s25 = int_to_ptr.vmem [resolvable:$true] %s317_s25 }
 0x186   :  { %s274_s27 = sadd.s32 16, %s2379_s22 }
 0x187   :  { %s277_s18 = sshrl.u32 %s274_s27, 3  ;;  %s278_s20 = sand.u32 7, %s274_s27  }
 0x188   :  { %s279_s24 = smul.u32 48, %s277_s18  ;;  %s276_s12 = sadd.s32 16, %s2380_s1 }
 0x189   :  { %s290_s4 = sshrl.u32 %s276_s12, 3  ;;  %s291_s11 = sand.u32 7, %s276_s12  }
 0x18a   :  { %s280_s9 = sadd.s32 %s279_s24, %s278_s20  ;;  %s292_s16 = smul.u32 48, %s290_s4 }
 0x18b   :  { %s2381_s23 = sshll.u32 %s280_s9, 4  ;;  %s305_s14 = sadd.s32 16, %s3835_s0 }
 0x18c   :  { %s282_s3 = scalar_lea.hbm %s4025_s2, %s2381_s23  ;;  %s293_s15 = sadd.s32 %s292_s16, %s291_s11 }
 0x18d   :  { %s3315_s10 = scalar_lea.hbm %s282_s3, 96  ;;  %p3318_p11 = scmp.lt.u32.totalorder %s282_s3, %s4025_s2 }
 0x18e   :  { %p3316_p10 = scmp.ne.s32.totalorder %s282_s3, %s3315_s10  ;;  %p3319_p12 = scmp.lt.u32.totalorder %s3622_s26, %s3315_s10 }
 0x18f   :  { %p3321_p0 = scmp.lt.u32.totalorder %s3315_s10, %s282_s3 }
 0x190   :  { %p3320_p13 = por %p3319_p12, %p3318_p11 }
 0x192   :  { %p3322_p1 = por %p3321_p0, %p3320_p13 }
 0x194   :  { %p3323_p2 = pnand %p3322_p1, %p3316_p10 }
 0x196   :  { %3326 = shalt.err (!%p3323_p2)  }
 0x197   :  { %s3327_s1 = scalar_lea.vmem %s3833_s30, 96  ;;  %p3332_p4 = scmp.lt.s32.totalorder %s3833_s30, %s3602_s28 }
 0x198   :  { %p3328_p3 = scmp.ne.s32.totalorder %s3833_s30, %s3327_s1  ;;  %p3333_p5 = scmp.lt.s32.totalorder %s3631_s7, %s3327_s1 }
 0x19a   :  { %p3334_p6 = por %p3333_p5, %p3332_p4 }
 0x19c   :  { %p3335_p7 = pnand %p3334_p6, %p3328_p3 }
 0x19e   :  { %3338 = shalt.err (!%p3335_p7)  }
 0x19f   :  { %289 = dma.hbm_to_vmem [thread:$0]  %s282_s3, 96, %s3833_s30, [#allocation4 + $0xa], %s4039_s21, %s4039_s21, %s4040_s29 }
 0x1a0   :  { %s2382_s8 = sshll.u32 %s293_s15, 4  ;;  %s308_s0 = sshrl.u32 %s305_s14, 3 }
 0x1a1   :  { %s295_s20 = scalar_lea.hbm %s4025_s2, %s2382_s8  ;;  %s309_s24 = sand.u32 7, %s305_s14  }
 0x1a2   :  { %s3339_s12 = scalar_lea.hbm %s295_s20, 96  ;;  %p3342_p9 = scmp.lt.u32.totalorder %s295_s20, %s4025_s2 }
 0x1a3   :  { %p3340_p8 = scmp.ne.s32.totalorder %s295_s20, %s3339_s12  ;;  %p3343_p10 = scmp.lt.u32.totalorder %s3622_s26, %s3339_s12 }
 0x1a4   :  { %p3345_p12 = scmp.lt.u32.totalorder %s3339_s12, %s295_s20 }
 0x1a5   :  { %p3344_p11 = por %p3343_p10, %p3342_p9 }
 0x1a7   :  { %p3346_p13 = por %p3345_p12, %p3344_p11 }
 0x1a9   :  { %p3347_p0 = pnand %p3346_p13, %p3340_p8 }
 0x1ab   :  { %3350 = shalt.err (!%p3347_p0)  }
 0x1ac   :  { %s3351_s30 = scalar_lea.vmem %s3837_s6, 96  ;;  %p3356_p2 = scmp.lt.s32.totalorder %s3837_s6, %s3602_s28 }
 0x1ad   :  { %p3352_p1 = scmp.ne.s32.totalorder %s3837_s6, %s3351_s30  ;;  %p3357_p3 = scmp.lt.s32.totalorder %s3631_s7, %s3351_s30 }
 0x1af   :  { %p3358_p4 = por %p3357_p3, %p3356_p2 }
 0x1b1   :  { %p3359_p5 = pnand %p3358_p4, %p3352_p1 }
 0x1b3   :  { %3362 = shalt.err (!%p3359_p5)  }
 0x1b4   :  { %302 = dma.hbm_to_vmem [thread:$0]  %s295_s20, 96, %s3837_s6, [#allocation4 + $0xe], %s4039_s21, %s4039_s21, %s4040_s29 }
 0x1b5   :  { %s310_s9 = smul.u32 48, %s308_s0  ;;  %s307_s16 = sadd.s32 16, %s3839_s13 }
 0x1b6   :  { %s321_s23 = sshrl.u32 %s307_s16, 3  ;;  %s322_s14 = sand.u32 7, %s307_s16  }
 0x1b7   :  { %s311_s17 = sadd.s32 %s310_s9, %s309_s24  ;;  %s323_s19 = smul.u32 48, %s321_s23 }
 0x1b8   :  { %s2385_s3 = sshll.u32 %s311_s17, 4 }
 0x1b9   :  { %s313_s22 = scalar_lea.hbm %s4025_s2, %s2385_s3  ;;  %s324_s1 = sadd.s32 %s323_s19, %s322_s14 }
 0x1ba   :  { %s3363_s8 = scalar_lea.hbm %s313_s22, 96  ;;  %p3366_p7 = scmp.lt.u32.totalorder %s313_s22, %s4025_s2 }
 0x1bb   :  { %p3364_p6 = scmp.ne.s32.totalorder %s313_s22, %s3363_s8  ;;  %p3367_p8 = scmp.lt.u32.totalorder %s3622_s26, %s3363_s8 }
 0x1bc   :  { %p3369_p10 = scmp.lt.u32.totalorder %s3363_s8, %s313_s22 }
 0x1bd   :  { %p3368_p9 = por %p3367_p8, %p3366_p7 }
 0x1bf   :  { %p3370_p11 = por %p3369_p10, %p3368_p9 }
 0x1c1   :  { %p3371_p12 = pnand %p3370_p11, %p3364_p6 }
 0x1c3   :  { %3374 = shalt.err (!%p3371_p12)  }
 0x1c4   :  { %s3375_s6 = scalar_lea.vmem %s3841_s25, 96  ;;  %p3380_p0 = scmp.lt.s32.totalorder %s3841_s25, %s3602_s28 }
 0x1c5   :  { %p3376_p13 = scmp.ne.s32.totalorder %s3841_s25, %s3375_s6  ;;  %p3381_p1 = scmp.lt.s32.totalorder %s3631_s7, %s3375_s6 }
 0x1c7   :  { %p3382_p2 = por %p3381_p1, %p3380_p0 }
 0x1c9   :  { %p3383_p3 = pnand %p3382_p2, %p3376_p13 }
 0x1cb   :  { %3386 = shalt.err (!%p3383_p3)  }
 0x1cc   :  { %320 = dma.hbm_to_vmem [thread:$0]  %s313_s22, 96, %s3841_s25, [#allocation4 + $0xb], %s4039_s21, %s4039_s21, %s4040_s29 }
 0x1cd   :  { %s2386_s13 = sshll.u32 %s324_s1, 4  ;;  %s3502_s0 = smov [#allocation2 + $0x37]  }
 0x1ce   :  { %s330_s20 = sshll.u32 %s3502_s0, 4  ;;  %s326_s4 = scalar_lea.hbm %s4025_s2, %s2386_s13  ;;  %s331_s20 = int_to_ptr.vmem [resolvable:$true] %s330_s20 }
 0x1cf   :  { %s3387_s11 = scalar_lea.hbm %s326_s4, 96  ;;  %p3390_p5 = scmp.lt.u32.totalorder %s326_s4, %s4025_s2 }
 0x1d0   :  { %p3388_p4 = scmp.ne.s32.totalorder %s326_s4, %s3387_s11  ;;  %p3391_p6 = scmp.lt.u32.totalorder %s3622_s26, %s3387_s11 }
 0x1d1   :  { %p3393_p8 = scmp.lt.u32.totalorder %s3387_s11, %s326_s4 }
 0x1d2   :  { %p3392_p7 = por %p3391_p6, %p3390_p5 }
 0x1d4   :  { %p3394_p9 = por %p3393_p8, %p3392_p7 }
 0x1d6   :  { %p3395_p10 = pnand %p3394_p9, %p3388_p4 }
 0x1d8   :  { %3398 = shalt.err (!%p3395_p10)  }
 0x1d9   :  { %s3399_s25 = scalar_lea.vmem %s331_s20, 96  ;;  %p3404_p12 = scmp.lt.s32.totalorder %s331_s20, %s3602_s28 }
 0x1da   :  { %p3400_p11 = scmp.ne.s32.totalorder %s331_s20, %s3399_s25  ;;  %p3405_p13 = scmp.lt.s32.totalorder %s3631_s7, %s3399_s25 }
 0x1dc   :  { %p3406_p0 = por %p3405_p13, %p3404_p12 }
 0x1de   :  { %p3407_p1 = pnand %p3406_p0, %p3400_p11 }
 0x1e0   :  { %3410 = shalt.err (!%p3407_p1)  }
 0x1e1   :  { %333 = dma.hbm_to_vmem [thread:$0]  %s326_s4, 96, %s331_s20, [#allocation4 + $0xf], %s4039_s21, %s4039_s21, %s4040_s29 }
 0x1e2   :  { %s3905_s2 = sld [smem:[#allocation14]]  ;;  %s3907_s26 = sld [smem:[#allocation14 + $0x1]] }
 0x1e3   :  { %s3909_s16 = sld [smem:[#allocation14 + $0x2]]  ;;  %s3911_s23 = sld [smem:[#allocation14 + $0x3]] }
 0x1e4   :  { %s3913_s28 = sld [smem:[#allocation14 + $0x80]]  ;;  %s3915_s7 = sld [smem:[#allocation14 + $0x81]] }
 0x1e5   :  { %s3917_s14 = sld [smem:[#allocation14 + $0x82]]  ;;  %s3919_s21 = sld [smem:[#allocation14 + $0x83]] }
 0x1e6   :  { %s3922_s17 = sld [smem:[#allocation15]]  ;;  %s3925_s3 = sld [smem:[#allocation15 + $0x1]] }
 0x1e7   :  { %s3928_s10 = sld [smem:[#allocation15 + $0x2]]  ;;  %s3931_s1 = sld [smem:[#allocation15 + $0x3]] }
 0x1e8   :  { %s335_s29 = smul.f32 0.25, %s3905_s2  ;;  %s3934_s27 = sld [smem:[#allocation15 + $0x80]] }
 0x1e9   :  { %s337_s19 = smul.f32 0.25, %s3907_s26  ;;  %s3937_s6 = sld [smem:[#allocation15 + $0x81]] }
 0x1ea   :  { %s339_s15 = smul.f32 0.25, %s3909_s16  ;;  %s3940_s0 = sld [smem:[#allocation15 + $0x82]] }
 0x1eb   :  { %s345_s18 = smul.f32 0.25, %s3915_s7  ;;  %s3943_s24 = sld [smem:[#allocation15 + $0x83]] }
 0x1ec   :  { %s347_s13 = smul.f32 0.25, %s3917_s14 }
 0x1ed   :  { %s349_s20 = smul.f32 0.25, %s3919_s21 }
 0x1ee   :  { %s351_s12 = smul.f32 0.25, %s3922_s17 }
 0x1ef   :  { %s353_s4 = smul.f32 0.25, %s3925_s3 }
 0x1f0   :  { %s355_s11 = smul.f32 0.25, %s3928_s10 }
 0x1f1   :  { %s357_s30 = smul.f32 0.25, %s3931_s1 }
 0x1f2   :  { %s359_s9 = smul.f32 0.25, %s3934_s27 }
 0x1f3   :  { %s361_s25 = smul.f32 0.25, %s3937_s6 }
 0x1f4   :  { %s363_s8 = smul.f32 0.25, %s3940_s0 }
 0x1f5   :  { %s365_s22 = smul.f32 0.25, %s3943_s24 }
 0x1f6   :  { %3443 = dma.done.wait [#allocation4], 96 }
 0x1f7   :  { %3444 = vsyncadd [#allocation4], 4294967200 }
 0x1f8   :  { %3445 = dma.done.wait [#allocation4 + $0x1], 96 }
 0x1f9   :  { %3446 = vsyncadd [#allocation4 + $0x1], 4294967200 }
 0x1fa   :  { %3447 = dma.done.wait [#allocation4 + $0x2], 96 }
 0x1fb   :  { %3448 = vsyncadd [#allocation4 + $0x2], 4294967200 }
 0x1fc   :  { %3449 = dma.done.wait [#allocation4 + $0x3], 96 }
 0x1fd   :  { %3450 = vsyncadd [#allocation4 + $0x3], 4294967200 }
 0x1fe   :  { %3451 = dma.done.wait [#allocation4 + $0x4], 96 }
 0x1ff   :  { %3452 = vsyncadd [#allocation4 + $0x4], 4294967200 }
 0x200   :  { %3453 = dma.done.wait [#allocation4 + $0x5], 96 }
 0x201   :  { %3454 = vsyncadd [#allocation4 + $0x5], 4294967200 }
 0x202   :  { %3455 = dma.done.wait [#allocation4 + $0x6], 96 }
 0x203   :  { %3456 = vsyncadd [#allocation4 + $0x6], 4294967200 }
 0x204   :  { %3457 = dma.done.wait [#allocation4 + $0x7], 96 }
 0x205   :  { %3458 = vsyncadd [#allocation4 + $0x7], 4294967200 }
 0x206   :  { %3459 = dma.done.wait [#allocation4 + $0x8], 96 }
 0x207   :  { %3460 = vsyncadd [#allocation4 + $0x8], 4294967200 }
 0x208   :  { %3461 = dma.done.wait [#allocation4 + $0x9], 96 }
 0x209   :  { %3462 = vsyncadd [#allocation4 + $0x9], 4294967200 }
 0x20a   :  { %3463 = dma.done.wait [#allocation4 + $0xa], 96 }
 0x20b   :  { %3464 = vsyncadd [#allocation4 + $0xa], 4294967200 }
 0x20c   :  { %3465 = dma.done.wait [#allocation4 + $0xb], 96 }
 0x20d   :  { %3466 = vsyncadd [#allocation4 + $0xb], 4294967200 }
 0x20e   :  { %3467 = dma.done.wait [#allocation4 + $0xc], 96 }
 0x20f   :  { %3468 = vsyncadd [#allocation4 + $0xc], 4294967200 }
 0x210   :  { %3469 = dma.done.wait [#allocation4 + $0xd], 96 }
 0x211   :  { %3470 = vsyncadd [#allocation4 + $0xd], 4294967200 }
 0x212   :  { %3471 = dma.done.wait [#allocation4 + $0xe], 96 }
 0x213   :  { %3472 = vsyncadd [#allocation4 + $0xe], 4294967200 }
 0x214   :  { %3473 = dma.done.wait [#allocation4 + $0xf], 96 }
 0x215   :  { %3474 = vsyncadd [#allocation4 + $0xf], 4294967200  ;;  %v2789_v2 = vld [vmem:[#allocation12 + $0x40] sm:$0xff]   ;;  %v2793_v6 = vld [vmem:[#allocation12 + $0x48] sm:$0xff]   ;;  %v456_v23 = vlaneseq  ;;  %v3503_v24 = vmov 1983009808  }
 0x216   :  { %v2790_v3 = vld [vmem:[#allocation12] sm:$0xff]   ;;  %2563 = vmatprep.subr.bf16.mxu0 %v2789_v2  ;;  %v2794_v7 = vld [vmem:[#allocation12 + $0x8] sm:$0xff]   ;;  %v2797_v10 = vld [vmem:[#allocation12 + $0x50] sm:$0xff]   ;;  %v534_v25 = vunpack.c.l.s4 %v3503_v24  ;;  %v418_v24 = vstv %s337_s19  ;;  %s4041_s2 = smul.f32 0.25, %s3911_s23 }
 0x217   :  { %v2791_v4 = vld [vmem:[#allocation12 + $0xc0] sm:$0xff]   ;;  %2564 = vmatpush3.bf16.msra.mxu0 %v2790_v3  ;;  %v2795_v8 = vld [vmem:[#allocation12 + $0xc8] sm:$0xff]   ;;  %v2798_v11 = vld [vmem:[#allocation12 + $0x10] sm:$0xff]   ;;  %v537_v31 = vshrl.u32 %v456_v23, 7  ;;  %s4042_s26 = smul.f32 0.25, %s3913_s28  ;;  %vm3975_vm0 = vcmp.lt.s32.totalorder %v456_v23, 768 }
 0x218   :  { %v2792_v5 = vld [vmem:[#allocation12 + $0x80] sm:$0xff]   ;;  %2585 = vmatprep.subr.bf16.mxu1 %v2791_v4  ;;  %2565 = vmatprep.subr.bf16.mxu0 %v2793_v6  ;;  %v2796_v9 = vld [vmem:[#allocation12 + $0x88] sm:$0xff]   ;;  %v2799_v12 = vld [vmem:[#allocation12 + $0xd0] sm:$0xff]   ;;  %v535_v30 = vunpack.c.0.s8 %v534_v25 }
 0x219   :  { %2586 = vmatpush3.bf16.msra.mxu1 %v2792_v5  ;;  %v2800_v13 = vld [vmem:[#allocation12 + $0x90] sm:$0xff]   ;;  %v2801_v14 = vld [vmem:[#allocation12 + $0x58] sm:$0xff]   ;;  %v2805_v18 = vld [vmem:[#allocation12 + $0x60] sm:$0xff]  }
 0x21a   :  { %2587 = vmatprep.subr.bf16.mxu1 %v2795_v8  ;;  %v2802_v15 = vld [vmem:[#allocation12 + $0x18] sm:$0xff]   ;;  %v2806_v19 = vld [vmem:[#allocation12 + $0x20] sm:$0xff]   ;;  %v2809_v22 = vld [vmem:[#allocation12 + $0x68] sm:$0xff]   ;;  %v3954_v36 = vsub.s32 %v535_v30, %v537_v31 }
 0x21b   :  { %2566 = vmatpush3.bf16.msra.mxu0 %v2794_v7  ;;  %v2803_v16 = vld [vmem:[#allocation12 + $0xd8] sm:$0xff]   ;;  %v2807_v20 = vld [vmem:[#allocation12 + $0xe0] sm:$0xff]   ;;  %v2810_v26 = vld [vmem:[#allocation12 + $0x28] sm:$0xff]  }
 0x21c   :  { %2567 = vmatprep.subr.bf16.mxu0 %v2797_v10  ;;  %v2804_v17 = vld [vmem:[#allocation12 + $0x98] sm:$0xff]   ;;  %v2808_v21 = vld [vmem:[#allocation12 + $0xa0] sm:$0xff]   ;;  %v2811_v27 = vld [vmem:[#allocation12 + $0xe8] sm:$0xff]  }
 0x21d   :  { %2588 = vmatpush3.bf16.msra.mxu1 %v2796_v9  ;;  %v2812_v28 = vld [vmem:[#allocation12 + $0xa8] sm:$0xff]   ;;  %v2813_v29 = vld [vmem:[#allocation12 + $0x70] sm:$0xff]   ;;  %v2817_v35 = vld [vmem:[#allocation12 + $0x78] sm:$0xff]  }
 0x21e   :  { %2589 = vmatprep.subr.bf16.mxu1 %v2799_v12  ;;  %v2814_v32 = vld [vmem:[#allocation12 + $0x30] sm:$0xff]   ;;  %v2818_v37 = vld [vmem:[#allocation12 + $0x38] sm:$0xff]   ;;  %v2821_v43 = vld [vmem:[#allocation12 + $0x140] sm:$0xff]  }
 0x21f   :  { %2568 = vmatpush3.bf16.msra.mxu0 %v2798_v11  ;;  %v2815_v33 = vld [vmem:[#allocation12 + $0xf0] sm:$0xff]   ;;  %v2819_v38 = vld [vmem:[#allocation12 + $0xf8] sm:$0xff]   ;;  %v2823_v46 = vld [vmem:[#allocation12 + $0x100] sm:$0xff]  }
 0x220   :  { %2569 = vmatprep.subr.bf16.mxu0 %v2801_v14  ;;  %v2816_v34 = vld [vmem:[#allocation12 + $0xb0] sm:$0xff]   ;;  %v2820_v41 = vld [vmem:[#allocation12 + $0xb8] sm:$0xff]   ;;  %v2824_v48 = vld [vmem:[#allocation12 + $0x1c0] sm:$0xff]  }
 0x221   :  { %2590 = vmatpush3.bf16.msra.mxu1 %v2800_v13  ;;  %v522_v39 = vld [vmem:[#allocation3] sm:$0xff]  ;;  %v2825_v51 = vld [vmem:[#allocation12 + $0x180] sm:$0xff]   ;;  %v2826_v53 = vld [vmem:[#allocation12 + $0x148] sm:$0xff]  }
 0x222   :  { %2591 = vmatprep.subr.bf16.mxu1 %v2803_v16  ;;  %v539_v40 = vrot.slane %v522_v39, %v3954_v36  ;;  %v532_v42 = vcombine.high %v522_v39, %v522_v39  ;;  %v2827_v55 = vld [vmem:[#allocation12 + $0x108] sm:$0xff]   ;;  %v2830_v58 = vld [vmem:[#allocation12 + $0x150] sm:$0xff]   ;;  %v2834_v62 = vld [vmem:[#allocation12 + $0x158] sm:$0xff]   ;;  %v468_v39 = vstv %s4042_s26 }
 0x223   :  { %2570 = vmatpush3.bf16.msra.mxu0 %v2802_v15  ;;  %v2828_v56 = vld [vmem:[#allocation12 + $0x1c8] sm:$0xff]   ;;  %v2831_v59 = vld [vmem:[#allocation12 + $0x110] sm:$0xff]   ;;  %v2835_v63 = vld [vmem:[#allocation12 + $0x118] sm:$0xff]  }
 0x224   :  { %2571 = vmatprep.subr.bf16.mxu0 %v2805_v18  ;;  %v547_v44 = vcombine.high %v539_v40, %v539_v40  ;;  %v546_v45 = vrot.slane %v532_v42, %v3954_v36  ;;  %v626_v47 = vpack.c.bf16 %v539_v40, %v539_v40  ;;  %v2829_v57 = vld [vmem:[#allocation12 + $0x188] sm:$0xff]   ;;  %v2832_v60 = vld [vmem:[#allocation12 + $0x1d0] sm:$0xff]   ;;  %v2836_v0 = vld [vmem:[#allocation12 + $0x1d8] sm:$0xff]  }
 0x225   :  { %2592 = vmatpush3.bf16.msra.mxu1 %v2804_v17  ;;  %v2833_v61 = vld [vmem:[#allocation12 + $0x190] sm:$0xff]   ;;  %v2837_v1 = vld [vmem:[#allocation12 + $0x198] sm:$0xff]   ;;  %v2838_v2 = vld [vmem:[#allocation12 + $0x160] sm:$0xff]  }
 0x226   :  { %2593 = vmatprep.subr.bf16.mxu1 %v2807_v20  ;;  %v627_v49 = vpack.c.bf16 %v547_v44, %v547_v44  ;;  %v548_v50 = vcombine.high %v546_v45, %v546_v45  ;;  %v628_v52 = vpack.c.bf16 %v546_v45, %v546_v45  ;;  %v2839_v3 = vld [vmem:[#allocation12 + $0x120] sm:$0xff]   ;;  %v2842_v6 = vld [vmem:[#allocation12 + $0x168] sm:$0xff]   ;;  %v2846_v10 = vld [vmem:[#allocation12 + $0x170] sm:$0xff]   ;;  %v480_v44 = vstv %s345_s18 }
 0x227   :  { %2572 = vmatpush3.bf16.msra.mxu0 %v2806_v19  ;;  %v2840_v4 = vld [vmem:[#allocation12 + $0x1e0] sm:$0xff]   ;;  %v2843_v7 = vld [vmem:[#allocation12 + $0x128] sm:$0xff]   ;;  %v2847_v11 = vld [vmem:[#allocation12 + $0x130] sm:$0xff]   ;;  %v406_v19 = vstv %s335_s29 }
 0x228   :  { %2573 = vmatprep.subr.bf16.mxu0 %v2809_v22  ;;  %1835 = vmatprep.mubr.bf16.mxu0 %v627_v49  ;;  %v629_v54 = vpack.c.bf16 %v548_v50, %v548_v50  ;;  %v2841_v5 = vld [vmem:[#allocation12 + $0x1a0] sm:$0xff]   ;;  %v2844_v8 = vld [vmem:[#allocation12 + $0x1e8] sm:$0xff]   ;;  %v2848_v12 = vld [vmem:[#allocation12 + $0x1f0] sm:$0xff]   ;;  %v494_v50 = vstv %s347_s13 }
 0x229   :  { %2594 = vmatpush3.bf16.msra.mxu1 %v2808_v21  ;;  %v2845_v9 = vld [vmem:[#allocation12 + $0x1a8] sm:$0xff]   ;;  %v2849_v13 = vld [vmem:[#allocation12 + $0x1b0] sm:$0xff]   ;;  %v2850_v14 = vld [vmem:[#allocation12 + $0x178] sm:$0xff]  }
 0x22a   :  { %2595 = vmatprep.subr.bf16.mxu1 %v2811_v27  ;;  %1875 = vmatprep.mubr.bf16.mxu1 %v629_v54  ;;  %v2851_v15 = vld [vmem:[#allocation12 + $0x138] sm:$0xff]   ;;  %v492_v49 = vld [vmem:[#allocation2 + $0x32] ss:$8 sm:$0x30] }
 0x22b   :  { %2574 = vmatpush3.bf16.msra.mxu0 %v2810_v26  ;;  %v2852_v16 = vld [vmem:[#allocation12 + $0x1f8] sm:$0xff]   ;;  %v506_v54 = vld [vmem:[#allocation2 + $0x33] ss:$8 sm:$0x30] }
 0x22c   :  { %2575 = vmatprep.subr.bf16.mxu0 %v2813_v29  ;;  %v403_v17 = vld [vmem:[#allocation2] ss:$8 sm:$0xf]  ;;  %v415_v20 = vld [vmem:[#allocation2 + $0x1] ss:$8 sm:$0xf] }
 0x22d   :  { %2596 = vmatpush3.bf16.msra.mxu1 %v2812_v28  ;;  %v404_v18 = vld [vmem:[#allocation2] ss:$8 sm:$0x30]  ;;  %v416_v22 = vld [vmem:[#allocation2 + $0x1] ss:$8 sm:$0x30]  ;;  %v432_v28 = vstv %s339_s15 }
 0x22e   :  { %2597 = vmatprep.subr.bf16.mxu1 %v2815_v33  ;;  %v405_v21 = vor.u32 %v404_v18, %v403_v17  ;;  %v429_v25 = vld [vmem:[#allocation2 + $0x2] ss:$8 sm:$0xf]  ;;  %v417_v26 = vor.u32 %v416_v22, %v415_v20  ;;  %v443_v29 = vld [vmem:[#allocation2 + $0x3] ss:$8 sm:$0xf]  ;;  %v446_v33 = vstv %s4041_s2 }
 0x22f   :  { %2576 = vmatpush3.bf16.msra.mxu0 %v2814_v32  ;;  %v430_v27 = vld [vmem:[#allocation2 + $0x2] ss:$8 sm:$0x30]  ;;  %v444_v32 = vld [vmem:[#allocation2 + $0x3] ss:$8 sm:$0x30] }
 0x230   :  { %2577 = vmatprep.subr.bf16.mxu0 %v2817_v35  ;;  %v407_v30 = vmul.f32 %v406_v19, %v405_v21  ;;  %v431_v31 = vor.u32 %v430_v27, %v429_v25  ;;  %v419_v35 = vmul.f32 %v418_v24, %v417_v26  ;;  %v477_v40 = vld [vmem:[#allocation2 + $0x31] ss:$8 sm:$0xf]  ;;  %v491_v45 = vld [vmem:[#allocation2 + $0x32] ss:$8 sm:$0xf] }
 0x231   :  { %2598 = vmatpush3.bf16.msra.mxu1 %v2816_v34  ;;  %v465_v34 = vld [vmem:[#allocation2 + $0x30] ss:$8 sm:$0xf] }
 0x232   :  { %2599 = vmatprep.subr.bf16.mxu1 %v2819_v38  ;;  %v466_v38 = vld [vmem:[#allocation2 + $0x30] ss:$8 sm:$0x30]  ;;  %v2863_v20 = vld [vmem:[#allocation12 + $0x250] sm:$0xff]   ;;  %v2867_v25 = vld [vmem:[#allocation12 + $0x258] sm:$0xff]  }
 0x233   :  { %2578 = vmatpush3.bf16.msra.mxu0 %v2818_v37  ;;  %v445_v37 = vor.u32 %v444_v32, %v443_v29  ;;  %v467_v42 = vor.u32 %v466_v38, %v465_v34  ;;  %v2860_v17 = vld [vmem:[#allocation12 + $0x208] sm:$0xff]   ;;  %v2864_v21 = vld [vmem:[#allocation12 + $0x210] sm:$0xff]   ;;  %v2868_v26 = vld [vmem:[#allocation12 + $0x218] sm:$0xff]  }
 0x234   :  { %2607 = vmatprep.subr.bf16.mxu0 %v2821_v43  ;;  %v478_v43 = vld [vmem:[#allocation2 + $0x31] ss:$8 sm:$0x30]  ;;  %v2865_v22 = vld [vmem:[#allocation12 + $0x2d0] sm:$0xff]   ;;  %v2869_v27 = vld [vmem:[#allocation12 + $0x2d8] sm:$0xff]  }
 0x235   :  { %2600 = vmatpush3.bf16.msra.mxu1 %v2820_v41  ;;  %v433_v41 = vmul.f32 %v432_v28, %v431_v31  ;;  %v2861_v18 = vld [vmem:[#allocation12 + $0x2c8] sm:$0xff]   ;;  %v2866_v24 = vld [vmem:[#allocation12 + $0x290] sm:$0xff]   ;;  %v2870_v29 = vld [vmem:[#allocation12 + $0x298] sm:$0xff]  }
 0x236   :  { %2629 = vmatprep.subr.bf16.mxu1 %v2824_v48  ;;  %1836 = vmatmul.mubr.bf16.vlgmr.msra.gmra.mrb[0].mxu0 %v626_v47  ;;  %v447_v47 = vmul.f32 %v446_v33, %v445_v37  ;;  %v479_v48 = vor.u32 %v478_v43, %v477_v40  ;;  %v2862_v19 = vld [vmem:[#allocation12 + $0x288] sm:$0xff]   ;;  %v2871_v32 = vld [vmem:[#allocation12 + $0x260] sm:$0xff]  }
 0x237   :  { %2608 = vmatpush3.bf16.msra.mxu0 %v2823_v46  ;;  %v420_v46 = vadd.f32 %v419_v35, %v407_v30  ;;  %v2872_v33 = vld [vmem:[#allocation12 + $0x220] sm:$0xff]  }
 0x238   :  { %1876 = vmatmul.mubr.bf16.vlgmr.msra.gmra.mrb[0].mxu1 %v628_v52  ;;  %2609 = vmatprep.subr.bf16.mxu0 %v2826_v53  ;;  %v469_v52 = vmul.f32 %v468_v39, %v467_v42  ;;  %v493_v53 = vor.u32 %v492_v49, %v491_v45  ;;  %v2873_v37 = vld [vmem:[#allocation12 + $0x2e0] sm:$0xff]   ;;  %v2876_v42 = vld [vmem:[#allocation12 + $0x228] sm:$0xff]   ;;  %v2882_v49 = vld [vmem:[#allocation12 + $0x2b0] sm:$0xff]  }
 0x239   :  { %2630 = vmatpush3.bf16.msra.mxu1 %v2825_v51  ;;  %v505_v51 = vld [vmem:[#allocation2 + $0x33] ss:$8 sm:$0xf] }
 0x23a   :  { %2631 = vmatprep.subr.bf16.mxu1 %v2828_v56  ;;  %v2853_v56 = vld [vmem:[#allocation12 + $0x1b8] sm:$0xff]   ;;  %v2874_v38 = vld [vmem:[#allocation12 + $0x2a0] sm:$0xff]   ;;  %v2878_v45 = vld [vmem:[#allocation12 + $0x2a8] sm:$0xff]  }
 0x23b   :  { %2610 = vmatpush3.bf16.msra.mxu0 %v2827_v55  ;;  %v508_v55 = vstv %s349_s20 }
 0x23c   :  { %2611 = vmatprep.subr.bf16.mxu0 %v2830_v58  ;;  %v481_v58 = vmul.f32 %v480_v44, %v479_v48  ;;  %v2877_v44 = vld [vmem:[#allocation12 + $0x2e8] sm:$0xff]   ;;  %v2881_v48 = vld [vmem:[#allocation12 + $0x2f0] sm:$0xff]  }
 0x23d   :  { %2632 = vmatpush3.bf16.msra.mxu1 %v2829_v57  ;;  %v434_v57 = vadd.f32 %v433_v41, %v420_v46  ;;  %v2875_v41 = vld [vmem:[#allocation12 + $0x268] sm:$0xff]   ;;  %v2879_v46 = vld [vmem:[#allocation12 + $0x270] sm:$0xff]  }
 0x23e   :  { %2633 = vmatprep.subr.bf16.mxu1 %v2832_v60  ;;  %v2854_v60 = vld [vmem:[#allocation12 + $0x240] sm:$0xff]  }
 0x23f   :  { %2612 = vmatpush3.bf16.msra.mxu0 %v2831_v59  ;;  %v507_v59 = vor.u32 %v506_v54, %v505_v51  ;;  %v2884_v51 = vld [vmem:[#allocation12 + $0x238] sm:$0xff]   ;;  %v2887_v54 = vld [vmem:[#allocation12 + $0x340] sm:$0xff]  }
 0x240   :  { %2613 = vmatprep.subr.bf16.mxu0 %v2834_v62  ;;  %v495_v62 = vmul.f32 %v494_v50, %v493_v53  ;;  %v2883_v50 = vld [vmem:[#allocation12 + $0x278] sm:$0xff]  }
 0x241   :  { %2634 = vmatpush3.bf16.msra.mxu1 %v2833_v61  ;;  %v2886_v53 = vld [vmem:[#allocation12 + $0x2b8] sm:$0xff]  }
 0x242   :  { %2635 = vmatprep.subr.bf16.mxu1 %v2836_v0  ;;  %v482_v0 = vadd.f32 %v481_v58, %v469_v52  ;;  %v2885_v52 = vld [vmem:[#allocation12 + $0x2f8] sm:$0xff]   ;;  %v2891_v58 = vld [vmem:[#allocation12 + $0x380] sm:$0xff]  }
 0x243   :  { %2614 = vmatpush3.bf16.msra.mxu0 %v2835_v63  ;;  %v448_v63 = vadd.f32 %v447_v47, %v434_v57  ;;  %v2880_v47 = vld [vmem:[#allocation12 + $0x230] sm:$0xff]   ;;  %v2890_v57 = vld [vmem:[#allocation12 + $0x3c0] sm:$0xff]  }
 0x244   :  { %2615 = vmatprep.subr.bf16.mxu0 %v2838_v2  ;;  %v2857_v2 = vld [vmem:[#allocation12 + $0x2c0] sm:$0xff]  }
 0x245   :  { %2636 = vmatpush3.bf16.msra.mxu1 %v2837_v1  ;;  %v509_v1 = vmul.f32 %v508_v55, %v507_v59  ;;  %461 = vst.msk [vmem:[#allocation3 + $0xc] ss:$2 sm:$0x3f] %vm3975_vm0, %v448_v63  ;;  %v2889_v55 = vld [vmem:[#allocation12 + $0x300] sm:$0xff]   ;;  %v2894_v63 = vld [vmem:[#allocation12 + $0x3c8] sm:$0xff]  }
 0x246   :  { %2637 = vmatprep.subr.bf16.mxu1 %v2840_v4 }
 0x247   :  { %2616 = vmatpush3.bf16.msra.mxu0 %v2839_v3  ;;  %v496_v3 = vadd.f32 %v495_v62, %v482_v0  ;;  %v2893_v62 = vld [vmem:[#allocation12 + $0x308] sm:$0xff]  }
 0x248   :  { %2617 = vmatprep.subr.bf16.mxu0 %v2842_v6  ;;  %v2895_v0 = vld [vmem:[#allocation12 + $0x388] sm:$0xff]  }
 0x249   :  { %2638 = vmatpush3.bf16.msra.mxu1 %v2841_v5  ;;  %v510_v4 = vadd.f32 %v509_v1, %v496_v3  ;;  %v2896_v1 = vld [vmem:[#allocation12 + $0x350] sm:$0xff]  }
 0x24a   :  { %2639 = vmatprep.subr.bf16.mxu1 %v2844_v8  ;;  %v2898_v3 = vld [vmem:[#allocation12 + $0x3d0] sm:$0xff]  }
 0x24b   :  { %2618 = vmatpush3.bf16.msra.mxu0 %v2843_v7  ;;  %519 = vst.msk [vmem:[#allocation3 + $0xd] ss:$2 sm:$0x3f] %vm3975_vm0, %v510_v4  ;;  %v2899_v4 = vld [vmem:[#allocation12 + $0x390] sm:$0xff]  }
 0x24c   :  { %2619 = vmatprep.subr.bf16.mxu0 %v2846_v10  ;;  %v2856_v10 = vld [vmem:[#allocation12 + $0x200] sm:$0xff]  }
 0x24d   :  { %2640 = vmatpush3.bf16.msra.mxu1 %v2845_v9 }
 0x24e   :  { %2641 = vmatprep.subr.bf16.mxu1 %v2848_v12 }
 0x24f   :  { %2620 = vmatpush3.bf16.msra.mxu0 %v2847_v11 }
 0x250   :  { %2621 = vmatprep.subr.bf16.mxu0 %v2850_v14 }
 0x251   :  { %2642 = vmatpush3.bf16.msra.mxu1 %v2849_v13  ;;  %v2858_v13 = vld [vmem:[#allocation12 + $0x280] sm:$0xff]  }
 0x252   :  { %2643 = vmatprep.subr.bf16.mxu1 %v2852_v16  ;;  %v523_v23 = vld [vmem:[#allocation3 + $0x8] sm:$0xff]  ;;  %v524_v28 = vld [vmem:[#allocation3 + $0x10] sm:$0xff] }
 0x253   :  { %2622 = vmatpush3.bf16.msra.mxu0 %v2851_v15  ;;  %v556_v5 = vrot.slane %v523_v23, %v3954_v36  ;;  %v549_v6 = vcombine.high %v523_v23, %v523_v23  ;;  %v2859_v15 = vld [vmem:[#allocation12 + $0x248] sm:$0xff]   ;;  %v573_v30 = vrot.slane %v524_v28, %v3954_v36  ;;  %v566_v31 = vcombine.high %v524_v28, %v524_v28  ;;  %v2900_v23 = vld [vmem:[#allocation12 + $0x358] sm:$0xff]  }
 0x254   :  { %2651 = vmatprep.subr.bf16.mxu0 %v2854_v60  ;;  %v2892_v60 = vld [vmem:[#allocation12 + $0x348] sm:$0xff]   ;;  %v453_v28 = vstv %s357_s30 }
 0x255   :  { %2644 = vmatpush3.bf16.msra.mxu1 %v2853_v56  ;;  %v564_v7 = vcombine.high %v556_v5, %v556_v5  ;;  %v563_v8 = vrot.slane %v549_v6, %v3954_v36  ;;  %v630_v9 = vpack.c.bf16 %v556_v5, %v556_v5  ;;  %v581_v34 = vcombine.high %v573_v30, %v573_v30  ;;  %v2901_v5 = vld [vmem:[#allocation12 + $0x318] sm:$0xff]  }
 0x256   :  { %2673 = vmatprep.subr.bf16.mxu1 %v2857_v2  ;;  %v580_v35 = vrot.slane %v566_v31, %v3954_v36  ;;  %v634_v56 = vpack.c.bf16 %v573_v30, %v573_v30  ;;  %v2897_v2 = vld [vmem:[#allocation12 + $0x310] sm:$0xff]   ;;  %v2902_v6 = vld [vmem:[#allocation12 + $0x3d8] sm:$0xff]   ;;  %v2907_v30 = vld [vmem:[#allocation12 + $0x3a0] sm:$0xff]  }
 0x257   :  { %v631_v11 = vpack.c.bf16 %v564_v7, %v564_v7  ;;  %v565_v12 = vcombine.high %v563_v8, %v563_v8  ;;  %v632_v14 = vpack.c.bf16 %v563_v8, %v563_v8  ;;  %v635_v39 = vpack.c.bf16 %v581_v34, %v581_v34  ;;  %v2904_v7 = vld [vmem:[#allocation12 + $0x360] sm:$0xff]  }
 0x258   :  { %v582_v40 = vcombine.high %v580_v35, %v580_v35  ;;  %v636_v59 = vpack.c.bf16 %v580_v35, %v580_v35  ;;  %v409_v8 = vld [vmem:[#allocation2 + $0x4] ss:$8 sm:$0xf]  ;;  %v474_v34 = vstv %s359_s9  ;;  %v484_v35 = vld [vmem:[#allocation2 + $0x35] ss:$8 sm:$0xf] }
 0x259   :  { %1915 = vmatprep.mubr.bf16.mxu0 %v631_v11  ;;  %v633_v16 = vpack.c.bf16 %v565_v12, %v565_v12  ;;  %v412_v11 = vstv %s351_s12  ;;  %v422_v12 = vld [vmem:[#allocation2 + $0x5] ss:$8 sm:$0xf] }
 0x25a   :  { %1916 = vmatmul.mubr.bf16.vlgmr.msra.gmra.mrb[4].mxu0 %v630_v9  ;;  %v637_v43 = vpack.c.bf16 %v582_v40, %v582_v40  ;;  %v2903_v9 = vld [vmem:[#allocation12 + $0x398] sm:$0xff]   ;;  %v487_v40 = vstv %s361_s25 }
 0x25b   :  { %1955 = vmatprep.mubr.bf16.mxu1 %v633_v16  ;;  %2652 = vmatpush3.bf16.msra.mxu0 %v2856_v10  ;;  %v410_v10 = vld [vmem:[#allocation2 + $0x4] ss:$8 sm:$0x30]  ;;  %v425_v16 = vstv %s353_s4 }
 0x25c   :  { %1956 = vmatmul.mubr.bf16.vlgmr.msra.gmra.mrb[4].mxu1 %v632_v14  ;;  %2653 = vmatprep.subr.bf16.mxu0 %v2859_v15  ;;  %v411_v14 = vor.u32 %v410_v10, %v409_v8  ;;  %v423_v15 = vld [vmem:[#allocation2 + $0x5] ss:$8 sm:$0x30] }
 0x25d   :  { %2674 = vmatpush3.bf16.msra.mxu1 %v2858_v13  ;;  %1995 = vmatprep.mubr.bf16.mxu0 %v635_v39  ;;  %v2906_v13 = vld [vmem:[#allocation12 + $0x3e0] sm:$0xff]   ;;  %v2919_v8 = vld [vmem:[#allocation12 + $0x3b8] sm:$0xff]  }
 0x25e   :  { %2675 = vmatprep.subr.bf16.mxu1 %v2861_v18  ;;  %2035 = vmatprep.mubr.bf16.mxu1 %v637_v43  ;;  %v2905_v18 = vld [vmem:[#allocation12 + $0x320] sm:$0xff]  }
 0x25f   :  { %2654 = vmatpush3.bf16.msra.mxu0 %v2860_v17  ;;  %v436_v17 = vld [vmem:[#allocation2 + $0x6] ss:$8 sm:$0xf]  ;;  %v485_v39 = vld [vmem:[#allocation2 + $0x35] ss:$8 sm:$0x30] }
 0x260   :  { %2655 = vmatprep.subr.bf16.mxu0 %v2863_v20  ;;  %v437_v20 = vld [vmem:[#allocation2 + $0x6] ss:$8 sm:$0x30] }
 0x261   :  { %2676 = vmatpush3.bf16.msra.mxu1 %v2862_v19  ;;  %v424_v19 = vor.u32 %v423_v15, %v422_v12 }
 0x262   :  { %2677 = vmatprep.subr.bf16.mxu1 %v2865_v22  ;;  %v450_v22 = vld [vmem:[#allocation2 + $0x7] ss:$8 sm:$0xf] }
 0x263   :  { %2656 = vmatpush3.bf16.msra.mxu0 %v2864_v21  ;;  %v439_v21 = vstv %s355_s11  ;;  %v426_v31 = vmul.f32 %v425_v16, %v424_v19 }
 0x264   :  { %2657 = vmatprep.subr.bf16.mxu0 %v2867_v25  ;;  %v413_v25 = vmul.f32 %v412_v11, %v411_v14 }
 0x265   :  { %2678 = vmatpush3.bf16.msra.mxu1 %v2866_v24  ;;  %v2908_v24 = vld [vmem:[#allocation12 + $0x368] sm:$0xff]  }
 0x266   :  { %2679 = vmatprep.subr.bf16.mxu1 %v2869_v27  ;;  %v451_v27 = vld [vmem:[#allocation2 + $0x7] ss:$8 sm:$0x30]  ;;  %v427_v43 = vadd.f32 %v426_v31, %v413_v25  ;;  %v2932_v31 = vld [vmem:[#allocation12 + $0x428] sm:$0xff]  }
 0x267   :  { %2658 = vmatpush3.bf16.msra.mxu0 %v2868_v26  ;;  %v438_v26 = vor.u32 %v437_v20, %v436_v17  ;;  %v2923_v20 = vld [vmem:[#allocation12 + $0x448] sm:$0xff]   ;;  %v2925_v25 = vld [vmem:[#allocation12 + $0x450] sm:$0xff]  }
 0x268   :  { %2659 = vmatprep.subr.bf16.mxu0 %v2871_v32  ;;  %v452_v32 = vor.u32 %v451_v27, %v450_v22  ;;  %v2928_v27 = vld [vmem:[#allocation12 + $0x418] sm:$0xff]  }
 0x269   :  { %2680 = vmatpush3.bf16.msra.mxu1 %v2870_v29  ;;  %v471_v29 = vld [vmem:[#allocation2 + $0x34] ss:$8 sm:$0xf] }
 0x26a   :  { %2681 = vmatprep.subr.bf16.mxu1 %v2873_v37  ;;  %v440_v37 = vmul.f32 %v439_v21, %v438_v26  ;;  %v2927_v26 = vld [vmem:[#allocation12 + $0x458] sm:$0xff]  }
 0x26b   :  { %2660 = vmatpush3.bf16.msra.mxu0 %v2872_v33  ;;  %v472_v33 = vld [vmem:[#allocation2 + $0x34] ss:$8 sm:$0x30] }
 0x26c   :  { %2661 = vmatprep.subr.bf16.mxu0 %v2875_v41  ;;  %v498_v41 = vld [vmem:[#allocation2 + $0x36] ss:$8 sm:$0xf] }
 0x26d   :  { %2682 = vmatpush3.bf16.msra.mxu1 %v2874_v38  ;;  %v473_v38 = vor.u32 %v472_v33, %v471_v29  ;;  %v2930_v29 = vld [vmem:[#allocation12 + $0x420] sm:$0xff]   ;;  %v2934_v33 = vld [vmem:[#allocation12 + $0x430] sm:$0xff]  }
 0x26e   :  { %2683 = vmatprep.subr.bf16.mxu1 %v2877_v44  ;;  %v454_v44 = vmul.f32 %v453_v28, %v452_v32  ;;  %v2929_v28 = vld [vmem:[#allocation12 + $0x460] sm:$0xff]   ;;  %v2933_v32 = vld [vmem:[#allocation12 + $0x470] sm:$0xff]  }
 0x26f   :  { %2662 = vmatpush3.bf16.msra.mxu0 %v2876_v42  ;;  %v2909_v42 = vld [vmem:[#allocation12 + $0x328] sm:$0xff]  }
 0x270   :  { %2663 = vmatprep.subr.bf16.mxu0 %v2879_v46  ;;  %v499_v46 = vld [vmem:[#allocation2 + $0x36] ss:$8 sm:$0x30] }
 0x271   :  { %2684 = vmatpush3.bf16.msra.mxu1 %v2878_v45  ;;  %v486_v45 = vor.u32 %v485_v39, %v484_v35  ;;  %v2936_v35 = vld [vmem:[#allocation12 + $0x438] sm:$0xff]   ;;  %v2402_v39 = vld [vmem:[%s4028_s5] ss:$0 sm:$0xff]  ;;  %s3504_s5 = smov [#allocation17]  }
 0x272   :  { %2685 = vmatprep.subr.bf16.mxu1 %v2881_v48  ;;  %v512_v48 = vld [vmem:[#allocation2 + $0x37] ss:$8 sm:$0xf]  ;;  %s2170_s28 = sshll.u32 %s3504_s5, 4  ;;  %s2171_s28 = int_to_ptr.vmem [resolvable:$true] %s2170_s28 }
 0x273   :  { %2664 = vmatpush3.bf16.msra.mxu0 %v2880_v47  ;;  %v501_v47 = vstv %s363_s8  ;;  %s3411_s7 = scalar_lea.vmem %s2171_s28, 32  ;;  %p3416_p3 = scmp.lt.s32.totalorder %s2171_s28, %s2171_s28 }
 0x274   :  { %2665 = vmatprep.subr.bf16.mxu0 %v2883_v50  ;;  %v475_v50 = vmul.f32 %v474_v34, %v473_v38  ;;  %v2935_v34 = vld [vmem:[#allocation12 + $0x478] sm:$0xff]   ;;  %p3412_p2 = scmp.ne.s32.totalorder %s2171_s28, %s3411_s7  ;;  %p3417_p4 = scmp.lt.s32.totalorder %s3411_s7, %s3411_s7 }
 0x275   :  { %2686 = vmatpush3.bf16.msra.mxu1 %v2882_v49  ;;  %v2910_v49 = vld [vmem:[#allocation12 + $0x3e8] sm:$0xff]  }
 0x276   :  { %2687 = vmatprep.subr.bf16.mxu1 %v2885_v52  ;;  %v513_v52 = vld [vmem:[#allocation2 + $0x37] ss:$8 sm:$0x30]  ;;  %p3418_p5 = por %p3417_p4, %p3416_p3 }
 0x277   :  { %2666 = vmatpush3.bf16.msra.mxu0 %v2884_v51  ;;  %v500_v51 = vor.u32 %v499_v46, %v498_v41 }
 0x278   :  { %2695 = vmatprep.subr.bf16.mxu0 %v2887_v54  ;;  %v441_v54 = vadd.f32 %v440_v37, %v427_v43  ;;  %p3419_p6 = pnand %p3418_p5, %p3412_p2 }
 0x279   :  { %2688 = vmatpush3.bf16.msra.mxu1 %v2886_v53  ;;  %v515_v53 = vstv %s365_s22 }
 0x27a   :  { %1996 = vmatmul.mubr.bf16.vlgmr.msra.gmra.mrb[8].mxu0 %v634_v56  ;;  %2717 = vmatprep.subr.bf16.mxu1 %v2890_v57  ;;  %v514_v56 = vor.u32 %v513_v52, %v512_v48  ;;  %v2912_v57 = vld [vmem:[#allocation12 + $0x370] sm:$0xff]  }
 0x27b   :  { %2696 = vmatpush3.bf16.msra.mxu0 %v2889_v55  ;;  %v488_v55 = vmul.f32 %v487_v40, %v486_v45 }
 0x27c   :  { %2036 = vmatmul.mubr.bf16.vlgmr.msra.gmra.mrb[8].mxu1 %v636_v59  ;;  %2697 = vmatprep.subr.bf16.mxu0 %v2892_v60  ;;  %v2911_v59 = vld [vmem:[#allocation12 + $0x3a8] sm:$0xff]   ;;  %v455_v60 = vadd.f32 %v454_v44, %v441_v54 }
 0x27d   :  { %2718 = vmatpush3.bf16.msra.mxu1 %v2891_v58  ;;  %v502_v58 = vmul.f32 %v501_v47, %v500_v51 }
 0x27e   :  { %2719 = vmatprep.subr.bf16.mxu1 %v2894_v63  ;;  %v516_v63 = vmul.f32 %v515_v53, %v514_v56  ;;  %463 = vst.msk [vmem:[#allocation3 + $0x18] ss:$2 sm:$0x3f] %vm3975_vm0, %v455_v60 }
 0x27f   :  { %2698 = vmatpush3.bf16.msra.mxu0 %v2893_v62  ;;  %v489_v62 = vadd.f32 %v488_v55, %v475_v50 }
 0x280   :  { %2699 = vmatprep.subr.bf16.mxu0 %v2896_v1  ;;  %v2913_v1 = vld [vmem:[#allocation12 + $0x330] sm:$0xff]  }
 0x281   :  { %2720 = vmatpush3.bf16.msra.mxu1 %v2895_v0  ;;  %v2914_v0 = vld [vmem:[#allocation12 + $0x3f0] sm:$0xff]  }
 0x282   :  { %2721 = vmatprep.subr.bf16.mxu1 %v2898_v3  ;;  %v2916_v3 = vld [vmem:[#allocation12 + $0x378] sm:$0xff]  }
 0x283   :  { %2700 = vmatpush3.bf16.msra.mxu0 %v2897_v2  ;;  %v503_v2 = vadd.f32 %v502_v58, %v489_v62 }
 0x284   :  { %2701 = vmatprep.subr.bf16.mxu0 %v2900_v23 }
 0x285   :  { %2722 = vmatpush3.bf16.msra.mxu1 %v2899_v4  ;;  %v2915_v4 = vld [vmem:[#allocation12 + $0x3b0] sm:$0xff]   ;;  %v517_v23 = vadd.f32 %v516_v63, %v503_v2 }
 0x286   :  { %2723 = vmatprep.subr.bf16.mxu1 %v2902_v6  ;;  %v2917_v6 = vld [vmem:[#allocation12 + $0x338] sm:$0xff]  }
 0x287   :  { %2702 = vmatpush3.bf16.msra.mxu0 %v2901_v5  ;;  %v2918_v5 = vld [vmem:[#allocation12 + $0x3f8] sm:$0xff]   ;;  %521 = vst.msk [vmem:[#allocation3 + $0x19] ss:$2 sm:$0x3f] %vm3975_vm0, %v517_v23 }
 0x288   :  { %2703 = vmatprep.subr.bf16.mxu0 %v2904_v7  ;;  %v2920_v7 = vld [vmem:[#allocation12 + $0x440] sm:$0xff]  }
 0x289   :  { %2724 = vmatpush3.bf16.msra.mxu1 %v2903_v9 }
 0x28a   :  { %2725 = vmatprep.subr.bf16.mxu1 %v2906_v13 }
 0x28b   :  { %2704 = vmatpush3.bf16.msra.mxu0 %v2905_v18  ;;  %v2922_v18 = vld [vmem:[#allocation12 + $0x400] sm:$0xff]  }
 0x28c   :  { %2705 = vmatprep.subr.bf16.mxu0 %v2908_v24  ;;  %v2924_v24 = vld [vmem:[#allocation12 + $0x408] sm:$0xff]  }
 0x28d   :  { %2726 = vmatpush3.bf16.msra.mxu1 %v2907_v30  ;;  %v2931_v30 = vld [vmem:[#allocation12 + $0x468] sm:$0xff]  }
 0x28e   :  { %2727 = vmatprep.subr.bf16.mxu1 %v2910_v49  ;;  %v525_v9 = vld [vmem:[#allocation3 + $0x18] sm:$0xff]  ;;  %v2401_v12 = vld.sshfl [vmem:[#allocation3 + $0x20] sm:$0x33 pattern:$0x76325410] }
 0x28f   :  { %2706 = vmatpush3.bf16.msra.mxu0 %v2909_v42  ;;  %v590_v10 = vrot.slane %v525_v9, %v3954_v36  ;;  %v583_v11 = vcombine.high %v525_v9, %v525_v9  ;;  %v607_v15 = vcombine.high %v2401_v12, %v2401_v12  ;;  %v642_v37 = vpack.c.bf16 %v2401_v12, %v2401_v12 }
 0x290   :  { %2707 = vmatprep.subr.bf16.mxu0 %v2912_v57 }
 0x291   :  { %2728 = vmatpush3.bf16.msra.mxu1 %v2911_v59  ;;  %v598_v13 = vcombine.high %v590_v10, %v590_v10  ;;  %v597_v14 = vrot.slane %v583_v11, %v3954_v36  ;;  %v638_v16 = vpack.c.bf16 %v590_v10, %v590_v10  ;;  %v643_v22 = vpack.c.bf16 %v607_v15, %v607_v15  ;;  %v2926_v36 = vld [vmem:[#allocation12 + $0x410] sm:$0xff]  }
 0x292   :  { %2729 = vmatprep.subr.bf16.mxu1 %v2914_v0 }
 0x293   :  { %2708 = vmatpush3.bf16.msra.mxu0 %v2913_v1  ;;  %v639_v61 = vpack.c.bf16 %v598_v13, %v598_v13  ;;  %v599_v17 = vcombine.high %v597_v14, %v597_v14  ;;  %v640_v19 = vpack.c.bf16 %v597_v14, %v597_v14 }
 0x294   :  { %2709 = vmatprep.subr.bf16.mxu0 %v2916_v3 }
 0x295   :  { %2730 = vmatpush3.bf16.msra.mxu1 %v2915_v4  ;;  %2075 = vmatprep.mubr.bf16.mxu0 %v639_v61  ;;  %v641_v21 = vpack.c.bf16 %v599_v17, %v599_v17 }
 0x296   :  { %2731 = vmatprep.subr.bf16.mxu1 %v2918_v5 }
 0x297   :  { %2710 = vmatpush3.bf16.msra.mxu0 %v2917_v6  ;;  %2115 = vmatprep.mubr.bf16.mxu1 %v641_v21 }
 0x298   :  { %2739 = vmatprep.subr.bf16.mxu0 %v2920_v7 }
 0x299   :  { %2732 = vmatpush3.bf16.msra.mxu1 %v2919_v8 }
 0x29a   :  { %2076 = vmatmul.mubr.bf16.vlgmr.msra.gmra.mrb[12].mxu0 %v638_v16 }
 0x29b   :  { %2740 = vmatpush3.bf16.msra.mxu0 %v2922_v18  ;;  %2155 = vmatprep.mubr.bf16.mxu0 %v643_v22 }
 0x29c   :  { %2116 = vmatmul.mubr.bf16.vlgmr.msra.gmra.mrb[12].mxu1 %v640_v19  ;;  %2741 = vmatprep.subr.bf16.mxu0 %v2923_v20 }
 0x29f   :  { %2742 = vmatpush3.bf16.msra.mxu0 %v2924_v24 }
 0x2a0   :  { %2743 = vmatprep.subr.bf16.mxu0 %v2925_v25 }
 0x2a3   :  { %2744 = vmatpush3.bf16.msra.mxu0 %v2926_v36 }
 0x2a4   :  { %2745 = vmatprep.subr.bf16.mxu0 %v2927_v26 }
 0x2a7   :  { %2746 = vmatpush3.bf16.msra.mxu0 %v2928_v27 }
 0x2a8   :  { %2747 = vmatprep.subr.bf16.mxu0 %v2929_v28 }
 0x2ab   :  { %2748 = vmatpush3.bf16.msra.mxu0 %v2930_v29 }
 0x2ac   :  { %2749 = vmatprep.subr.bf16.mxu0 %v2931_v30 }
 0x2af   :  { %2750 = vmatpush3.bf16.msra.mxu0 %v2932_v31 }
 0x2b0   :  { %2751 = vmatprep.subr.bf16.mxu0 %v2933_v32 }
 0x2b3   :  { %2752 = vmatpush3.bf16.msra.mxu0 %v2934_v33 }
 0x2b4   :  { %2753 = vmatprep.subr.bf16.mxu0 %v2935_v34 }
 0x2b7   :  { %2754 = vmatpush3.bf16.msra.mxu0 %v2936_v35 }
 0x2ba   :  { %2156 = vmatmul.mubr.bf16.vlgmr.msra.gmra.mrb[16].mxu0 %v642_v37 }
 0x309   :  { %v2579_v38 = vpop.f32.mrb[0].mxu0 }
 0x30a   :  { %v2580_v40 = vpop.f32.mrb[1].mxu0 }
 0x30b   :  { %v2581_v41 = vadd.f32 %v2580_v40, %v2579_v38  ;;  %v2582_v42 = vpop.f32.mrb[2].mxu0  ;;  %v2601_v43 = vpop.f32.mrb[0].mxu1 }
 0x30c   :  { %v2583_v44 = vpop.f32.mrb[3].mxu0  ;;  %v2602_v45 = vpop.f32.mrb[1].mxu1 }
 0x30d   :  { %v1838_v46 = vadd.f32 %v2581_v41, %v2402_v39  ;;  %v2603_v47 = vadd.f32 %v2602_v45, %v2601_v43  ;;  %v2604_v48 = vpop.f32.mrb[2].mxu1 }
 0x30e   :  { %v2605_v49 = vpop.f32.mrb[3].mxu1 }
 0x30f   :  { %v1878_v50 = vadd.f32 %v2603_v47, %v1838_v46 }
 0x32d   :  { %v2623_v51 = vpop.f32.mrb[4].mxu0 }
 0x32e   :  { %v2624_v52 = vpop.f32.mrb[5].mxu0 }
 0x32f   :  { %v2625_v53 = vadd.f32 %v2624_v52, %v2623_v51  ;;  %v2626_v54 = vpop.f32.mrb[6].mxu0  ;;  %v2645_v55 = vpop.f32.mrb[4].mxu1 }
 0x330   :  { %v2627_v56 = vpop.f32.mrb[7].mxu0  ;;  %v2646_v57 = vpop.f32.mrb[5].mxu1 }
 0x331   :  { %v1918_v58 = vadd.f32 %v2625_v53, %v1878_v50  ;;  %v2647_v59 = vadd.f32 %v2646_v57, %v2645_v55  ;;  %v2648_v60 = vpop.f32.mrb[6].mxu1 }
 0x332   :  { %v2649_v62 = vpop.f32.mrb[7].mxu1 }
 0x333   :  { %v1958_v63 = vadd.f32 %v2647_v59, %v1918_v58 }
 0x34d   :  { %v2667_v0 = vpop.f32.mrb[8].mxu0 }
 0x34e   :  { %v2668_v1 = vpop.f32.mrb[9].mxu0 }
 0x34f   :  { %v2669_v2 = vadd.f32 %v2668_v1, %v2667_v0  ;;  %v2670_v3 = vpop.f32.mrb[10].mxu0  ;;  %v2689_v4 = vpop.f32.mrb[8].mxu1 }
 0x350   :  { %v2671_v23 = vpop.f32.mrb[11].mxu0  ;;  %v2690_v5 = vpop.f32.mrb[9].mxu1 }
 0x351   :  { %v1998_v6 = vadd.f32 %v2669_v2, %v1958_v63  ;;  %v2691_v7 = vadd.f32 %v2690_v5, %v2689_v4  ;;  %v2692_v8 = vpop.f32.mrb[10].mxu1 }
 0x352   :  { %v2693_v9 = vpop.f32.mrb[11].mxu1 }
 0x353   :  { %v2038_v10 = vadd.f32 %v2691_v7, %v1998_v6 }
 0x36d   :  { %v2711_v11 = vpop.f32.mrb[12].mxu0 }
 0x36e   :  { %v2712_v12 = vpop.f32.mrb[13].mxu0 }
 0x36f   :  { %v2713_v13 = vadd.f32 %v2712_v12, %v2711_v11  ;;  %v2714_v14 = vpop.f32.mrb[14].mxu0  ;;  %v2733_v15 = vpop.f32.mrb[12].mxu1 }
 0x370   :  { %v2715_v16 = vpop.f32.mrb[15].mxu0  ;;  %v2734_v61 = vpop.f32.mrb[13].mxu1 }
 0x371   :  { %v2078_v17 = vadd.f32 %v2713_v13, %v2038_v10  ;;  %v2735_v18 = vadd.f32 %v2734_v61, %v2733_v15  ;;  %v2736_v19 = vpop.f32.mrb[14].mxu1 }
 0x372   :  { %v2737_v20 = vpop.f32.mrb[15].mxu1 }
 0x373   :  { %v2118_v21 = vadd.f32 %v2735_v18, %v2078_v17 }
 0x38d   :  { %v2755_v22 = vpop.f32.mrb[16].mxu0 }
 0x38e   :  { %v2756_v24 = vpop.f32.mrb[17].mxu0 }
 0x38f   :  { %v2757_v25 = vadd.f32 %v2756_v24, %v2755_v22  ;;  %v2758_v36 = vpop.f32.mrb[18].mxu0 }
 0x390   :  { %v2759_v26 = vpop.f32.mrb[19].mxu0 }
 0x391   :  { %v2158_v27 = vadd.f32 %v2757_v25, %v2118_v21 }
 0x393   :  { %2163 = vst [vmem:[#allocation17] sm:$0x3] %v2158_v27 }
 0x394   :  { %3422 = shalt.err (!%p3419_p6)
}
 0x395   :  { %s4045_s29 = sld [smem:[#allocation56_spill]] }
 0x39b   :  { %s3423_s17 = scalar_lea.hbm %s4045_s29, 32 }
 0x39c   :  { %p3424_p7 = scmp.ne.s32.totalorder %s4045_s29, %s3423_s17  ;;  %p3427_p8 = scmp.lt.u32.totalorder %s3423_s17, %s4045_s29 }
 0x39e   :  { %p3429_p9 = pnand %p3427_p8, %p3424_p7 }
 0x3a0   :  { %3432 = shalt.err (!%p3429_p9)
}
 0x3a1   :  { %2173 = dma.vmem_to_hbm [thread:$0]  %s2171_s28, 32, %s4045_s29, [#allocation10]  }
 0x3a2   :  { %3475 = dma.done.wait [#allocation10], 32  }
 0x3a3   :  { %3476 = vsyncadd [#allocation10], 4294967264 }
 0x3a4   :  { %2177 = vsyncpa [#allocation9], 1 }
 0x3a5   :  { %2178 = vsyncpa [#allocation13], 1 }
 0x3a6   :  { %2179 = vsyncpa [#allocation10], 1 }
 0x3a7   :  { %2180 = vsyncpa [#allocation11], 1 }
 0x3a8   :  { %2181 = vsyncpa [#allocation16], 1 }
 0x3a9   :  { %2182 = vsyncmov [#allocation4] }
 0x3ac   :  { %s2183_s8 = vpop.sfrf %2182 }
 0x3ad   :  { %p2547_p10 = scmp.ne.s32.totalorder %s2183_s8, 0 }
 0x3af   :  { %2187 = shalt.err (%p2547_p10)  }
 0x3b0   :  { %2189 = vsyncmov [#allocation4 + $0x1] }
 0x3b3   :  { %s2190_s27 = vpop.sfrf %2189 }
 0x3b4   :  { %p2548_p11 = scmp.ne.s32.totalorder %s2190_s27, 0 }
 0x3b6   :  { %2194 = shalt.err (%p2548_p11)  }
 0x3b7   :  { %2196 = vsyncmov [#allocation4 + $0x2] }
 0x3ba   :  { %s2197_s18 = vpop.sfrf %2196 }
 0x3bb   :  { %p2549_p12 = scmp.ne.s32.totalorder %s2197_s18, 0 }
 0x3bd   :  { %2201 = shalt.err (%p2549_p12)  }
 0x3be   :  { %2203 = vsyncmov [#allocation4 + $0x3] }
 0x3c1   :  { %s2204_s6 = vpop.sfrf %2203 }
 0x3c2   :  { %p2550_p13 = scmp.ne.s32.totalorder %s2204_s6, 0 }
 0x3c4   :  { %2208 = shalt.err (%p2550_p13)  }
 0x3c5   :  { %2210 = vsyncmov [#allocation4 + $0x4] }
 0x3c8   :  { %s2211_s13 = vpop.sfrf %2210 }
 0x3c9   :  { %p2551_p0 = scmp.ne.s32.totalorder %s2211_s13, 0 }
 0x3cb   :  { %2215 = shalt.err (%p2551_p0)  }
 0x3cc   :  { %2217 = vsyncmov [#allocation4 + $0x5] }
 0x3cf   :  { %s2218_s0 = vpop.sfrf %2217 }
 0x3d0   :  { %p2552_p1 = scmp.ne.s32.totalorder %s2218_s0, 0 }
 0x3d2   :  { %2222 = shalt.err (%p2552_p1)  }
 0x3d3   :  { %2224 = vsyncmov [#allocation4 + $0x6] }
 0x3d6   :  { %s2225_s20 = vpop.sfrf %2224 }
 0x3d7   :  { %p2553_p2 = scmp.ne.s32.totalorder %s2225_s20, 0 }
 0x3d9   :  { %2229 = shalt.err (%p2553_p2)  }
 0x3da   :  { %2231 = vsyncmov [#allocation4 + $0x7] }
 0x3dd   :  { %s2232_s24 = vpop.sfrf %2231 }
 0x3de   :  { %p2554_p3 = scmp.ne.s32.totalorder %s2232_s24, 0 }
 0x3e0   :  { %2236 = shalt.err (%p2554_p3)  }
 0x3e1   :  { %2238 = vsyncmov [#allocation4 + $0x8] }
 0x3e4   :  { %s2239_s12 = vpop.sfrf %2238 }
 0x3e5   :  { %p2555_p4 = scmp.ne.s32.totalorder %s2239_s12, 0 }
 0x3e7   :  { %2243 = shalt.err (%p2555_p4)  }
 0x3e8   :  { %2245 = vsyncmov [#allocation4 + $0x9] }
 0x3eb   :  { %s2246_s4 = vpop.sfrf %2245 }
 0x3ec   :  { %p2556_p5 = scmp.ne.s32.totalorder %s2246_s4, 0 }
 0x3ee   :  { %2250 = shalt.err (%p2556_p5)  }
 0x3ef   :  { %2252 = vsyncmov [#allocation4 + $0xa] }
 0x3f2   :  { %s2253_s11 = vpop.sfrf %2252 }
 0x3f3   :  { %p2557_p6 = scmp.ne.s32.totalorder %s2253_s11, 0 }
 0x3f5   :  { %2257 = shalt.err (%p2557_p6)  }
 0x3f6   :  { %2259 = vsyncmov [#allocation4 + $0xb] }
 0x3f9   :  { %s2260_s30 = vpop.sfrf %2259 }
 0x3fa   :  { %p2558_p7 = scmp.ne.s32.totalorder %s2260_s30, 0 }
 0x3fc   :  { %2264 = shalt.err (%p2558_p7)  }
 0x3fd   :  { %2266 = vsyncmov [#allocation4 + $0xc] }
 0x400   :  { %s2267_s9 = vpop.sfrf %2266 }
 0x401   :  { %p2559_p8 = scmp.ne.s32.totalorder %s2267_s9, 0 }
 0x403   :  { %2271 = shalt.err (%p2559_p8)  }
 0x404   :  { %2273 = vsyncmov [#allocation4 + $0xd] }
 0x407   :  { %s2274_s25 = vpop.sfrf %2273 }
 0x408   :  { %p2560_p9 = scmp.ne.s32.totalorder %s2274_s25, 0 }
 0x40a   :  { %2278 = shalt.err (%p2560_p9)  }
 0x40b   :  { %2280 = vsyncmov [#allocation4 + $0xe] }
 0x40e   :  { %s2281_s2 = vpop.sfrf %2280 }
 0x40f   :  { %p2561_p10 = scmp.ne.s32.totalorder %s2281_s2, 0 }
 0x411   :  { %2285 = shalt.err (%p2561_p10)  }
 0x412   :  { %2287 = vsyncmov [#allocation4 + $0xf] }
 0x415   :  { %s2288_s26 = vpop.sfrf %2287 }
 0x416   :  { %p2562_p11 = scmp.ne.s32.totalorder %s2288_s26, 0 }
 0x418   :  { %2292 = shalt.err (%p2562_p11)  }

</bundles_post_ra>
